<compile_context>
chip_gen: v6e
topology: v6e:2x2x1
jax: 0.10.0
libtpu: 0.0.40
codegen_flags: <defaults>
</compile_context>

<pallas_src>
import math

import jax
import jax.numpy as jnp
from jax import lax
from jax.experimental import pallas as pl
from jax.experimental.pallas import tpu as pltpu

# ---- tiny Marian-like config (synthetic, deterministic init; no checkpoint load) ----
D_MODEL = 32
N_HEADS = 4
HEAD_DIM = D_MODEL // N_HEADS
D_FF = 64
VOCAB = 64
VOCAB_PAD = 128              # lane-dense LM head (pad cols get -1e9 bias)
N_ENC_LAYERS = 2
N_DEC_LAYERS = 2
PAD_ID = 0                   # Marian uses pad_token_id as decoder_start_token_id
LN_EPS = 1e-5
MAX_LEN = 64
NEG_INF = -1e9
ATTN_SCALE = 1.0 / math.sqrt(HEAD_DIM)
EMB_SCALE = math.sqrt(D_MODEL)
STRIPE = 128                 # every packed parameter segment starts on a 128-lane boundary


# ----------------------------- static packing layouts -----------------------------
def _layout(entries):
    lay = {name: (i * STRIPE, width) for i, (name, width) in enumerate(entries)}
    return lay, len(entries) * STRIPE


def _wd_entries():                                    # all matrices with D_MODEL rows
    e = []
    for l in range(N_ENC_LAYERS):
        p = f"e{l}."
        e += [(p + "wqkv", 3 * D_MODEL), (p + "wo", D_MODEL), (p + "w1", D_FF)]
    for l in range(N_DEC_LAYERS):
        p = f"d{l}."
        e += [(p + "wqkv", 3 * D_MODEL), (p + "swo", D_MODEL), (p + "cwq", D_MODEL),
              (p + "cwkv", 2 * D_MODEL), (p + "cwo", D_MODEL), (p + "w1", D_FF)]
    e.append(("lm.w", VOCAB_PAD))                     # tied LM head (embed.T, padded)
    return e


def _wff_entries():                                   # all matrices with D_FF rows (w2)
    return ([(f"e{l}.w2", D_MODEL) for l in range(N_ENC_LAYERS)]
            + [(f"d{l}.w2", D_MODEL) for l in range(N_DEC_LAYERS)])


def _bias_entries():                                  # all (1, N) biases / LN params
    e = []
    for l in range(N_ENC_LAYERS):
        p = f"e{l}."
        e += [(p + "bqkv", 3 * D_MODEL), (p + "bo", D_MODEL),
              (p + "ln1g", D_MODEL), (p + "ln1b", D_MODEL),
              (p + "b1", D_FF), (p + "b2", D_MODEL),
              (p + "ln2g", D_MODEL), (p + "ln2b", D_MODEL)]
    for l in range(N_DEC_LAYERS):
        p = f"d{l}."
        e += [(p + "bqkv", 3 * D_MODEL), (p + "sbo", D_MODEL),
              (p + "ln1g", D_MODEL), (p + "ln1b", D_MODEL),
              (p + "cbq", D_MODEL), (p + "cbkv", 2 * D_MODEL), (p + "cbo", D_MODEL),
              (p + "ln2g", D_MODEL), (p + "ln2b", D_MODEL),
              (p + "b1", D_FF), (p + "b2", D_MODEL),
              (p + "ln3g", D_MODEL), (p + "ln3b", D_MODEL)]
    e.append(("lm.b", VOCAB_PAD))
    return e


WD_LAYOUT, WD_COLS = _layout(_wd_entries())
WFF_LAYOUT, WFF_COLS = _layout(_wff_entries())
B_LAYOUT, B_COLS = _layout(_bias_entries())


# ----------------------------- the fused whole-model kernel -----------------------------
def _marian_fwd_kernel(src_ref, dec_ref, tgt_ref, sbias_ref, emb_ref, pos_ref,
                       wd_ref, wff_ref, b_ref,
                       logits_ref, loss_ref):
    Ss = src_ref.shape[1]
    St = dec_ref.shape[1]

    # --- lane-aligned static slices out of the packed slabs (ref-views, loaded on demand) ---
    def wd(name):
        o, n = WD_LAYOUT[name]
        return wd_ref[:, o:o + n]

    def wff(name):
        o, n = WFF_LAYOUT[name]
        return wff_ref[:, o:o + n]

    def bias(name):
        o, n = B_LAYOUT[name]
        return b_ref[:, o:o + n]

    # --- in-kernel building blocks ---
    def embed_tokens(ids_ref, seq_len):
        ids = ids_ref[0]                                               # (S, 1) int32
        one_hot = (lax.broadcasted_iota(jnp.int32, (seq_len, VOCAB), 1)
                   == ids).astype(jnp.float32)                        # (S, VOCAB)
        tok = jnp.dot(one_hot, emb_ref[...], preferred_element_type=jnp.float32)
        return tok * EMB_SCALE + pos_ref[0:seq_len, :]

    def layer_norm(x, g, b):
        mean = jnp.mean(x, axis=-1, keepdims=True)
        var = jnp.mean((x - mean) ** 2, axis=-1, keepdims=True)
        return (x - mean) * lax.rsqrt(var + LN_EPS) * g + b

    def mha(q, k, v, w_o, b_o, attn_bias):
        heads = []
        for h in range(N_HEADS):                                       # static unroll
            sl = slice(h * HEAD_DIM, (h + 1) * HEAD_DIM)
            qh, kh, vh = q[:, sl], k[:, sl], v[:, sl]
            s = lax.dot_general(qh, kh, (((1,), (1,)), ((), ())),
                                preferred_element_type=jnp.float32) * ATTN_SCALE
            if attn_bias is not None:
                s = s + attn_bias
            m = jnp.max(s, axis=-1, keepdims=True)
            p = jnp.exp(s - m)
            p = p * pl.reciprocal(jnp.sum(p, axis=-1, keepdims=True), approx=True)
            heads.append(jnp.dot(p, vh, preferred_element_type=jnp.float32))
        ctx = jnp.concatenate(heads, axis=-1)                          # (Sq, D)
        # single K=32 output projection instead of 4 K=8 matmuls
        return jnp.dot(ctx, w_o, preferred_element_type=jnp.float32) + b_o

    def ffn(x, w1, b1, w2, b2):
        h = jnp.dot(x, w1, preferred_element_type=jnp.float32) + b1
        h = h * jax.nn.sigmoid(h)                                      # SiLU, sigmoid -> EUP
        return jnp.dot(h, w2, preferred_element_type=jnp.float32) + b2

    src_key_bias = sbias_ref[0]                                        # (1, Ss) additive PAD mask

    # ---------------- encoder ----------------
    x = embed_tokens(src_ref, Ss)
    for l in range(N_ENC_LAYERS):
        p = f"e{l}."
        qkv = jnp.dot(x, wd(p + "wqkv"), preferred_element_type=jnp.float32) + bias(p + "bqkv")
        attn = mha(qkv[:, :D_MODEL], qkv[:, D_MODEL:2 * D_MODEL], qkv[:, 2 * D_MODEL:],
                   wd(p + "wo"), bias(p + "bo"), src_key_bias)
        h1 = layer_norm(x + attn, bias(p + "ln1g"), bias(p + "ln1b"))
        f = ffn(h1, wd(p + "w1"), bias(p + "b1"), wff(p + "w2"), bias(p + "b2"))
        x = layer_norm(h1 + f, bias(p + "ln2g"), bias(p + "ln2b"))
    enc_out = x

    # ---------------- decoder ----------------
    row = lax.broadcasted_iota(jnp.int32, (St, St), 0)
    col = lax.broadcasted_iota(jnp.int32, (St, St), 1)
    causal = jnp.where(col <= row, 0.0, NEG_INF).astype(jnp.float32)   # built in-kernel, no DMA

    y = embed_tokens(dec_ref, St)
    for l in range(N_DEC_LAYERS):
        p = f"d{l}."
        # masked self-attention (fused QKV)
        qkv = jnp.dot(y, wd(p + "wqkv"), preferred_element_type=jnp.float32) + bias(p + "bqkv")
        attn = mha(qkv[:, :D_MODEL], qkv[:, D_MODEL:2 * D_MODEL], qkv[:, 2 * D_MODEL:],
                   wd(p + "swo"), bias(p + "sbo"), causal)
        h1 = layer_norm(y + attn, bias(p + "ln1g"), bias(p + "ln1b"))
        # cross-attention over encoder output (fused KV, src PAD key-mask)
        q2 = jnp.dot(h1, wd(p + "cwq"), preferred_element_type=jnp.float32) + bias(p + "cbq")
        kv = jnp.dot(enc_out, wd(p + "cwkv"), preferred_element_type=jnp.float32) + bias(p + "cbkv")
        attn2 = mha(q2, kv[:, :D_MODEL], kv[:, D_MODEL:],
                    wd(p + "cwo"), bias(p + "cbo"), src_key_bias)
        h2 = layer_norm(h1 + attn2, bias(p + "ln2g"), bias(p + "ln2b"))
        # FFN
        f = ffn(h2, wd(p + "w1"), bias(p + "b1"), wff(p + "w2"), bias(p + "b2"))
        y = layer_norm(h2 + f, bias(p + "ln3g"), bias(p + "ln3b"))

    # ---------------- LM head (lane-dense, vocab padded to 128) ----------------
    logits = jnp.dot(y, wd("lm.w"), preferred_element_type=jnp.float32) + bias("lm.b")
    logits_ref[0] = logits                                             # full-lane store

    # ---------------- fused log-softmax + PAD-masked NLL (per-batch partial sums) ----------
    m = jnp.max(logits, axis=-1, keepdims=True)
    lse = m + jnp.log(jnp.sum(jnp.exp(logits - m), axis=-1, keepdims=True))
    tgt = tgt_ref[0]                                                   # (St, 1) int32
    tgt_oh = (lax.broadcasted_iota(jnp.int32, (St, VOCAB_PAD), 1) == tgt).astype(jnp.float32)
    tgt_logit = jnp.sum(logits * tgt_oh, axis=-1, keepdims=True)       # (St, 1)
    nll = lse - tgt_logit
    valid = (tgt != PAD_ID).astype(jnp.float32)
    sum_nll = jnp.sum(nll * valid, axis=0, keepdims=True)              # (1, 1)
    sum_tok = jnp.sum(valid, axis=0, keepdims=True)                    # (1, 1)
    lane = lax.broadcasted_iota(jnp.int32, (1, VOCAB_PAD), 1)
    loss_ref[0] = jnp.where(lane == 0, sum_nll, jnp.where(lane == 1, sum_tok, 0.0))


# ----------------------------- model glue (plain JAX) -----------------------------
def sinusoidal_positions(seq_len, dim):
    pos = jnp.arange(seq_len, dtype=jnp.float32)[:, None]
    i = jnp.arange(dim // 2, dtype=jnp.float32)[None, :]
    angle = pos / jnp.power(10000.0, 2.0 * i / dim)
    return jnp.concatenate([jnp.sin(angle), jnp.cos(angle)], axis=-1)


def shift_tokens_right(labels):
    # Marian: decoder_input_ids = [decoder_start_token_id(=pad), labels[:-1]]
    return jnp.concatenate(
        [jnp.full((labels.shape[0], 1), PAD_ID, labels.dtype), labels[:, :-1]], axis=1)


@jax.jit
def marian_forward(params, src_ids, tgt_ids):
    """Returns (loss, logits) — mirrors MarianMTModel(**inputs) with labels."""
    # TODO(synk): MarianTokenizer (string -> ids, padding) has no Pallas equivalent;
    #             src_ids / tgt_ids here are pre-tokenized integer arrays.
    B, Ss = src_ids.shape
    St = tgt_ids.shape[1]

    dec_in = shift_tokens_right(tgt_ids)
    src3 = src_ids[..., None].astype(jnp.int32)                        # (B, Ss, 1)
    dec3 = dec_in[..., None].astype(jnp.int32)                         # (B, St, 1)
    tgt3 = tgt_ids[..., None].astype(jnp.int32)                        # (B, St, 1)
    src_key_bias = jnp.where(src_ids == PAD_ID, NEG_INF, 0.0
                             ).astype(jnp.float32)[:, None, :]         # (B, 1, Ss)

    def full_spec(shape):
        return pl.BlockSpec(shape, lambda b: (0,) * len(shape))

    logits_pad, loss_parts = pl.pallas_call(
        _marian_fwd_kernel,
        out_shape=(jax.ShapeDtypeStruct((B, St, VOCAB_PAD), jnp.float32),
                   jax.ShapeDtypeStruct((B, 1, VOCAB_PAD), jnp.float32)),
        grid=(B,),
        in_specs=[
            pl.BlockSpec((1, Ss, 1), lambda b: (b, 0, 0)),              # src ids
            pl.BlockSpec((1, St, 1), lambda b: (b, 0, 0)),              # decoder-input ids
            pl.BlockSpec((1, St, 1), lambda b: (b, 0, 0)),              # labels
            pl.BlockSpec((1, 1, Ss), lambda b: (b, 0, 0)),              # src PAD key-bias
            full_spec((VOCAB, D_MODEL)),                                # embedding table
            full_spec((MAX_LEN, D_MODEL)),                              # sinusoidal positions
            full_spec((D_MODEL, WD_COLS)),                              # packed D-leading weights
            full_spec((D_FF, WFF_COLS)),                                # packed FFN-out weights
            full_spec((1, B_COLS)),                                     # packed biases / LN params
        ],
        out_specs=(pl.BlockSpec((1, St, VOCAB_PAD), lambda b: (b, 0, 0)),
                   pl.BlockSpec((1, 1, VOCAB_PAD), lambda b: (b, 0, 0))),
        compiler_params=pltpu.CompilerParams(dimension_semantics=("parallel",)),
    )(src3, dec3, tgt3, src_key_bias,
      params["embed"], params["pos"], params["wd"], params["wff"], params["bias"])

    logits = logits_pad[..., :VOCAB]
    sum_nll = jnp.sum(loss_parts[:, 0, 0])
    sum_tok = jnp.sum(loss_parts[:, 0, 1])
    loss = sum_nll / jnp.maximum(sum_tok, 1.0)
    return loss, logits


# ----------------------------- deterministic params (packed slabs) -----------------------------
def init_params(key):
    keys = iter(jax.random.split(key, 64))

    def nrm(shape, s=0.02):
        return s * jax.random.normal(next(keys), shape, dtype=jnp.float32)

    embed = nrm((VOCAB, D_MODEL))

    wd = jnp.zeros((D_MODEL, WD_COLS), jnp.float32)
    wff = jnp.zeros((D_FF, WFF_COLS), jnp.float32)
    bias = jnp.zeros((1, B_COLS), jnp.float32)

    def put_wd(name, val):
        nonlocal wd
        o, n = WD_LAYOUT[name]
        wd = wd.at[:, o:o + n].set(val)

    def put_wff(name, val):
        nonlocal wff
        o, n = WFF_LAYOUT[name]
        wff = wff.at[:, o:o + n].set(val)

    def put_b(name, val):
        nonlocal bias
        o, n = B_LAYOUT[name]
        bias = bias.at[:, o:o + n].set(val)

    ones_d = jnp.ones((1, D_MODEL), jnp.float32)
    for l in range(N_ENC_LAYERS):
        p = f"e{l}."
        put_wd(p + "wqkv", nrm((D_MODEL, 3 * D_MODEL)))
        put_wd(p + "wo", nrm((D_MODEL, D_MODEL)))
        put_wd(p + "w1", nrm((D_MODEL, D_FF)))
        put_wff(p + "w2", nrm((D_FF, D_MODEL)))
        put_b(p + "ln1g", ones_d)
        put_b(p + "ln2g", ones_d)
        # linear biases / LN betas stay zero (slab already zero-initialized)
    for l in range(N_DEC_LAYERS):
        p = f"d{l}."
        put_wd(p + "wqkv", nrm((D_MODEL, 3 * D_MODEL)))
        put_wd(p + "swo", nrm((D_MODEL, D_MODEL)))
        put_wd(p + "cwq", nrm((D_MODEL, D_MODEL)))
        put_wd(p + "cwkv", nrm((D_MODEL, 2 * D_MODEL)))
        put_wd(p + "cwo", nrm((D_MODEL, D_MODEL)))
        put_wd(p + "w1", nrm((D_MODEL, D_FF)))
        put_wff(p + "w2", nrm((D_FF, D_MODEL)))
        put_b(p + "ln1g", ones_d)
        put_b(p + "ln2g", ones_d)
        put_b(p + "ln3g", ones_d)

    # tied LM head (embed.T), padded to 128 lanes; pad columns get -1e9 bias so the
    # in-kernel softmax / logsumexp over 128 lanes matches a 64-wide vocab exactly.
    lm_w = jnp.zeros((D_MODEL, VOCAB_PAD), jnp.float32).at[:, :VOCAB].set(embed.T)
    put_wd("lm.w", lm_w)
    lm_b = jnp.full((1, VOCAB_PAD), NEG_INF, jnp.float32).at[:, :VOCAB].set(0.0)
    put_b("lm.b", lm_b)

    return {"embed": embed,
            "pos": sinusoidal_positions(MAX_LEN, D_MODEL),
            "wd": wd, "wff": wff, "bias": bias}


# ----------------------------- main -----------------------------
if __name__ == "__main__":
    root = jax.random.PRNGKey(0)
    k_params, k_src, k_tgt = jax.random.split(root, 3)

    params = init_params(k_params)

    B, S_SRC, S_TGT = 2, 8, 8
    src_ids = jax.random.randint(k_src, (B, S_SRC), 1, VOCAB, dtype=jnp.int32)
    tgt_ids = jax.random.randint(k_tgt, (B, S_TGT), 1, VOCAB, dtype=jnp.int32)

    loss, logits = marian_forward(params, src_ids, tgt_ids)
    jax.block_until_ready((loss, logits))

    assert logits.shape == (B, S_TGT, VOCAB)
    assert bool(jnp.isfinite(loss))
    print("KERNEL_OK")
</pallas_src>

<mosaic_0001>
module attributes {stable_mosaic.version = 11 : i64} {
  func.func @_marian_fwd_kernel(%arg0: i32, %arg1: memref<1x8x1xi32, #tpu.memory_space<vmem>>, %arg2: memref<1x8x1xi32, #tpu.memory_space<vmem>>, %arg3: memref<1x8x1xi32, #tpu.memory_space<vmem>>, %arg4: memref<1x1x8xf32, #tpu.memory_space<vmem>>, %arg5: memref<64x32xf32, #tpu.memory_space<vmem>>, %arg6: memref<64x32xf32, #tpu.memory_space<vmem>>, %arg7: memref<32x2432xf32, #tpu.memory_space<vmem>>, %arg8: memref<64x512xf32, #tpu.memory_space<vmem>>, %arg9: memref<1x5504xf32, #tpu.memory_space<vmem>>, %arg10: memref<1x8x128xf32, #tpu.memory_space<vmem>>, %arg11: memref<1x1x128xf32, #tpu.memory_space<vmem>>) attributes {dimension_semantics = [#tpu.dimension_semantics<parallel>], iteration_bounds = array<i64: 2>, scalar_prefetch = 0 : i64, scratch_operands = 0 : i64, tpu.core_type = #tpu.core_type<tc>, window_params = [{transform_indices = @transform_0, window_bounds = array<i64: 1, 8, 1>}, {transform_indices = @transform_1, window_bounds = array<i64: 1, 8, 1>}, {transform_indices = @transform_2, window_bounds = array<i64: 1, 8, 1>}, {transform_indices = @transform_3, window_bounds = array<i64: 1, 1, 8>}, {pipeline_mode = #tpu.pipeline_mode<synchronous>, transform_indices = @transform_4, window_bounds = array<i64: 64, 32>}, {pipeline_mode = #tpu.pipeline_mode<synchronous>, transform_indices = @transform_5, window_bounds = array<i64: 64, 32>}, {pipeline_mode = #tpu.pipeline_mode<synchronous>, transform_indices = @transform_6, window_bounds = array<i64: 32, 2432>}, {pipeline_mode = #tpu.pipeline_mode<synchronous>, transform_indices = @transform_7, window_bounds = array<i64: 64, 512>}, {pipeline_mode = #tpu.pipeline_mode<synchronous>, transform_indices = @transform_8, window_bounds = array<i64: 1, 5504>}, {transform_indices = @transform_9, window_bounds = array<i64: 1, 8, 128>}, {transform_indices = @transform_10, window_bounds = array<i64: 1, 1, 128>}]} {
    %c0 = arith.constant 0 : index
    %c0_0 = arith.constant 0 : index
    %c0_1 = arith.constant 0 : index
    %0 = vector.load %arg4[%c0, %c0_0, %c0_1] : memref<1x1x8xf32, #tpu.memory_space<vmem>>, vector<1x1x8xf32>
    %1 = vector.shape_cast %0 : vector<1x1x8xf32> to vector<1x8xf32>
    %c0_2 = arith.constant 0 : index
    %c0_3 = arith.constant 0 : index
    %c0_4 = arith.constant 0 : index
    %2 = vector.load %arg1[%c0_2, %c0_3, %c0_4] : memref<1x8x1xi32, #tpu.memory_space<vmem>>, vector<1x8x1xi32>
    %3 = vector.shape_cast %2 : vector<1x8x1xi32> to vector<8x1xi32>
    %4 = tpu.iota {dimensions = array<i32: 1>} : vector<8x64xi32>
    %5 = vector.broadcast %3 : vector<8x1xi32> to vector<8x64xi32>
    %6 = arith.cmpi eq, %4, %5 : vector<8x64xi32>
    %7 = arith.extui %6 : vector<8x64xi1> to vector<8x64xi32>
    %8 = arith.sitofp %7 : vector<8x64xi32> to vector<8x64xf32>
    %c0_5 = arith.constant 0 : index
    %c0_6 = arith.constant 0 : index
    %9 = vector.load %arg5[%c0_5, %c0_6] : memref<64x32xf32, #tpu.memory_space<vmem>>, vector<64x32xf32>
    %cst = arith.constant dense<0.000000e+00> : vector<8x32xf32>
    %10 = tpu.matmul %8, %9, %cst {dimension_numbers = #tpu.dot_dimension_numbers<[1], [0], [0], [1], [0, 0, 1, 1], [], []>} : vector<8x64xf32>, vector<64x32xf32>, vector<8x32xf32> -> vector<8x32xf32>
    %cst_7 = arith.constant 5.65685415 : f32
    %11 = vector.broadcast %cst_7 : f32 to vector<8x32xf32>
    %12 = arith.mulf %10, %11 : vector<8x32xf32>
    %c0_8 = arith.constant 0 : index
    %c0_9 = arith.constant 0 : index
    %13 = vector.load %arg6[%c0_8, %c0_9] : memref<64x32xf32, #tpu.memory_space<vmem>>, vector<8x32xf32>
    %14 = arith.addf %12, %13 : vector<8x32xf32>
    %c0_10 = arith.constant 0 : index
    %c0_11 = arith.constant 0 : index
    %15 = vector.load %arg7[%c0_10, %c0_11] : memref<32x2432xf32, #tpu.memory_space<vmem>>, vector<32x96xf32>
    %cst_12 = arith.constant dense<0.000000e+00> : vector<8x96xf32>
    %16 = tpu.matmul %14, %15, %cst_12 {dimension_numbers = #tpu.dot_dimension_numbers<[1], [0], [0], [1], [0, 0, 1, 1], [], []>} : vector<8x32xf32>, vector<32x96xf32>, vector<8x96xf32> -> vector<8x96xf32>
    %c0_13 = arith.constant 0 : index
    %c0_14 = arith.constant 0 : index
    %17 = vector.load %arg9[%c0_13, %c0_14] : memref<1x5504xf32, #tpu.memory_space<vmem>>, vector<1x96xf32>
    %18 = vector.broadcast %17 : vector<1x96xf32> to vector<8x96xf32>
    %19 = arith.addf %16, %18 : vector<8x96xf32>
    %20 = vector.extract_strided_slice %19 {offsets = [0, 0], sizes = [8, 32], strides = [1, 1]} : vector<8x96xf32> to vector<8x32xf32>
    %21 = vector.extract_strided_slice %19 {offsets = [0, 32], sizes = [8, 32], strides = [1, 1]} : vector<8x96xf32> to vector<8x32xf32>
    %22 = vector.extract_strided_slice %19 {offsets = [0, 64], sizes = [8, 32], strides = [1, 1]} : vector<8x96xf32> to vector<8x32xf32>
    %c0_15 = arith.constant 0 : index
    %c128 = arith.constant 128 : index
    %23 = vector.load %arg7[%c0_15, %c128] : memref<32x2432xf32, #tpu.memory_space<vmem>>, vector<32x32xf32>
    %c0_16 = arith.constant 0 : index
    %c128_17 = arith.constant 128 : index
    %24 = vector.load %arg9[%c0_16, %c128_17] : memref<1x5504xf32, #tpu.memory_space<vmem>>, vector<1x32xf32>
    %25 = vector.extract_strided_slice %20 {offsets = [0, 0], sizes = [8, 8], strides = [1, 1]} : vector<8x32xf32> to vector<8x8xf32>
    %26 = vector.extract_strided_slice %21 {offsets = [0, 0], sizes = [8, 8], strides = [1, 1]} : vector<8x32xf32> to vector<8x8xf32>
    %27 = vector.extract_strided_slice %22 {offsets = [0, 0], sizes = [8, 8], strides = [1, 1]} : vector<8x32xf32> to vector<8x8xf32>
    %cst_18 = arith.constant dense<0.000000e+00> : vector<8x8xf32>
    %28 = tpu.matmul %25, %26, %cst_18 {dimension_numbers = #tpu.dot_dimension_numbers<[1], [1], [0], [0], [0, 0, 1, 0], [], []>} : vector<8x8xf32>, vector<8x8xf32>, vector<8x8xf32> -> vector<8x8xf32>
    %cst_19 = arith.constant 0.353553385 : f32
    %29 = vector.broadcast %cst_19 : f32 to vector<8x8xf32>
    %30 = arith.mulf %28, %29 : vector<8x8xf32>
    %31 = vector.broadcast %1 : vector<1x8xf32> to vector<8x8xf32>
    %32 = arith.addf %30, %31 : vector<8x8xf32>
    %cst_20 = arith.constant dense<0xFF800000> : vector<8xf32>
    %33 = vector.multi_reduction <maximumf>, %32, %cst_20 [1] : vector<8x8xf32> to vector<8xf32>
    %34 = vector.shape_cast %33 : vector<8xf32> to vector<8x1xf32>
    %35 = vector.broadcast %34 : vector<8x1xf32> to vector<8x8xf32>
    %36 = arith.subf %32, %35 : vector<8x8xf32>
    %37 = math.exp %36 : vector<8x8xf32>
    %cst_21 = arith.constant dense<0.000000e+00> : vector<8xf32>
    %38 = vector.multi_reduction <add>, %37, %cst_21 [1] : vector<8x8xf32> to vector<8xf32>
    %39 = vector.shape_cast %38 : vector<8xf32> to vector<8x1xf32>
    %40 = tpu.reciprocal %39 {approx = true} : vector<8x1xf32> -> vector<8x1xf32>
    %41 = vector.broadcast %40 : vector<8x1xf32> to vector<8x8xf32>
    %42 = arith.mulf %37, %41 : vector<8x8xf32>
    %cst_22 = arith.constant dense<0.000000e+00> : vector<8x8xf32>
    %43 = tpu.matmul %42, %27, %cst_22 {dimension_numbers = #tpu.dot_dimension_numbers<[1], [0], [0], [1], [0, 0, 1, 1], [], []>} : vector<8x8xf32>, vector<8x8xf32>, vector<8x8xf32> -> vector<8x8xf32>
    %44 = vector.extract_strided_slice %20 {offsets = [0, 8], sizes = [8, 8], strides = [1, 1]} : vector<8x32xf32> to vector<8x8xf32>
    %45 = vector.extract_strided_slice %21 {offsets = [0, 8], sizes = [8, 8], strides = [1, 1]} : vector<8x32xf32> to vector<8x8xf32>
    %46 = vector.extract_strided_slice %22 {offsets = [0, 8], sizes = [8, 8], strides = [1, 1]} : vector<8x32xf32> to vector<8x8xf32>
    %cst_23 = arith.constant dense<0.000000e+00> : vector<8x8xf32>
    %47 = tpu.matmul %44, %45, %cst_23 {dimension_numbers = #tpu.dot_dimension_numbers<[1], [1], [0], [0], [0, 0, 1, 0], [], []>} : vector<8x8xf32>, vector<8x8xf32>, vector<8x8xf32> -> vector<8x8xf32>
    %cst_24 = arith.constant 0.353553385 : f32
    %48 = vector.broadcast %cst_24 : f32 to vector<8x8xf32>
    %49 = arith.mulf %47, %48 : vector<8x8xf32>
    %50 = vector.broadcast %1 : vector<1x8xf32> to vector<8x8xf32>
    %51 = arith.addf %49, %50 : vector<8x8xf32>
    %cst_25 = arith.constant dense<0xFF800000> : vector<8xf32>
    %52 = vector.multi_reduction <maximumf>, %51, %cst_25 [1] : vector<8x8xf32> to vector<8xf32>
    %53 = vector.shape_cast %52 : vector<8xf32> to vector<8x1xf32>
    %54 = vector.broadcast %53 : vector<8x1xf32> to vector<8x8xf32>
    %55 = arith.subf %51, %54 : vector<8x8xf32>
    %56 = math.exp %55 : vector<8x8xf32>
    %cst_26 = arith.constant dense<0.000000e+00> : vector<8xf32>
    %57 = vector.multi_reduction <add>, %56, %cst_26 [1] : vector<8x8xf32> to vector<8xf32>
    %58 = vector.shape_cast %57 : vector<8xf32> to vector<8x1xf32>
    %59 = tpu.reciprocal %58 {approx = true} : vector<8x1xf32> -> vector<8x1xf32>
    %60 = vector.broadcast %59 : vector<8x1xf32> to vector<8x8xf32>
    %61 = arith.mulf %56, %60 : vector<8x8xf32>
    %cst_27 = arith.constant dense<0.000000e+00> : vector<8x8xf32>
    %62 = tpu.matmul %61, %46, %cst_27 {dimension_numbers = #tpu.dot_dimension_numbers<[1], [0], [0], [1], [0, 0, 1, 1], [], []>} : vector<8x8xf32>, vector<8x8xf32>, vector<8x8xf32> -> vector<8x8xf32>
    %63 = vector.extract_strided_slice %20 {offsets = [0, 16], sizes = [8, 8], strides = [1, 1]} : vector<8x32xf32> to vector<8x8xf32>
    %64 = vector.extract_strided_slice %21 {offsets = [0, 16], sizes = [8, 8], strides = [1, 1]} : vector<8x32xf32> to vector<8x8xf32>
    %65 = vector.extract_strided_slice %22 {offsets = [0, 16], sizes = [8, 8], strides = [1, 1]} : vector<8x32xf32> to vector<8x8xf32>
    %cst_28 = arith.constant dense<0.000000e+00> : vector<8x8xf32>
    %66 = tpu.matmul %63, %64, %cst_28 {dimension_numbers = #tpu.dot_dimension_numbers<[1], [1], [0], [0], [0, 0, 1, 0], [], []>} : vector<8x8xf32>, vector<8x8xf32>, vector<8x8xf32> -> vector<8x8xf32>
    %cst_29 = arith.constant 0.353553385 : f32
    %67 = vector.broadcast %cst_29 : f32 to vector<8x8xf32>
    %68 = arith.mulf %66, %67 : vector<8x8xf32>
    %69 = vector.broadcast %1 : vector<1x8xf32> to vector<8x8xf32>
    %70 = arith.addf %68, %69 : vector<8x8xf32>
    %cst_30 = arith.constant dense<0xFF800000> : vector<8xf32>
    %71 = vector.multi_reduction <maximumf>, %70, %cst_30 [1] : vector<8x8xf32> to vector<8xf32>
    %72 = vector.shape_cast %71 : vector<8xf32> to vector<8x1xf32>
    %73 = vector.broadcast %72 : vector<8x1xf32> to vector<8x8xf32>
    %74 = arith.subf %70, %73 : vector<8x8xf32>
    %75 = math.exp %74 : vector<8x8xf32>
    %cst_31 = arith.constant dense<0.000000e+00> : vector<8xf32>
    %76 = vector.multi_reduction <add>, %75, %cst_31 [1] : vector<8x8xf32> to vector<8xf32>
    %77 = vector.shape_cast %76 : vector<8xf32> to vector<8x1xf32>
    %78 = tpu.reciprocal %77 {approx = true} : vector<8x1xf32> -> vector<8x1xf32>
    %79 = vector.broadcast %78 : vector<8x1xf32> to vector<8x8xf32>
    %80 = arith.mulf %75, %79 : vector<8x8xf32>
    %cst_32 = arith.constant dense<0.000000e+00> : vector<8x8xf32>
    %81 = tpu.matmul %80, %65, %cst_32 {dimension_numbers = #tpu.dot_dimension_numbers<[1], [0], [0], [1], [0, 0, 1, 1], [], []>} : vector<8x8xf32>, vector<8x8xf32>, vector<8x8xf32> -> vector<8x8xf32>
    %82 = vector.extract_strided_slice %20 {offsets = [0, 24], sizes = [8, 8], strides = [1, 1]} : vector<8x32xf32> to vector<8x8xf32>
    %83 = vector.extract_strided_slice %21 {offsets = [0, 24], sizes = [8, 8], strides = [1, 1]} : vector<8x32xf32> to vector<8x8xf32>
    %84 = vector.extract_strided_slice %22 {offsets = [0, 24], sizes = [8, 8], strides = [1, 1]} : vector<8x32xf32> to vector<8x8xf32>
    %cst_33 = arith.constant dense<0.000000e+00> : vector<8x8xf32>
    %85 = tpu.matmul %82, %83, %cst_33 {dimension_numbers = #tpu.dot_dimension_numbers<[1], [1], [0], [0], [0, 0, 1, 0], [], []>} : vector<8x8xf32>, vector<8x8xf32>, vector<8x8xf32> -> vector<8x8xf32>
    %cst_34 = arith.constant 0.353553385 : f32
    %86 = vector.broadcast %cst_34 : f32 to vector<8x8xf32>
    %87 = arith.mulf %85, %86 : vector<8x8xf32>
    %88 = vector.broadcast %1 : vector<1x8xf32> to vector<8x8xf32>
    %89 = arith.addf %87, %88 : vector<8x8xf32>
    %cst_35 = arith.constant dense<0xFF800000> : vector<8xf32>
    %90 = vector.multi_reduction <maximumf>, %89, %cst_35 [1] : vector<8x8xf32> to vector<8xf32>
    %91 = vector.shape_cast %90 : vector<8xf32> to vector<8x1xf32>
    %92 = vector.broadcast %91 : vector<8x1xf32> to vector<8x8xf32>
    %93 = arith.subf %89, %92 : vector<8x8xf32>
    %94 = math.exp %93 : vector<8x8xf32>
    %cst_36 = arith.constant dense<0.000000e+00> : vector<8xf32>
    %95 = vector.multi_reduction <add>, %94, %cst_36 [1] : vector<8x8xf32> to vector<8xf32>
    %96 = vector.shape_cast %95 : vector<8xf32> to vector<8x1xf32>
    %97 = tpu.reciprocal %96 {approx = true} : vector<8x1xf32> -> vector<8x1xf32>
    %98 = vector.broadcast %97 : vector<8x1xf32> to vector<8x8xf32>
    %99 = arith.mulf %94, %98 : vector<8x8xf32>
    %cst_37 = arith.constant dense<0.000000e+00> : vector<8x8xf32>
    %100 = tpu.matmul %99, %84, %cst_37 {dimension_numbers = #tpu.dot_dimension_numbers<[1], [0], [0], [1], [0, 0, 1, 1], [], []>} : vector<8x8xf32>, vector<8x8xf32>, vector<8x8xf32> -> vector<8x8xf32>
    %101 = tpu.concatenate %43, %62, %81, %100 in 1 : vector<8x8xf32>, vector<8x8xf32>, vector<8x8xf32>, vector<8x8xf32> -> vector<8x32xf32>
    %cst_38 = arith.constant dense<0.000000e+00> : vector<8x32xf32>
    %102 = tpu.matmul %101, %23, %cst_38 {dimension_numbers = #tpu.dot_dimension_numbers<[1], [0], [0], [1], [0, 0, 1, 1], [], []>} : vector<8x32xf32>, vector<32x32xf32>, vector<8x32xf32> -> vector<8x32xf32>
    %103 = vector.broadcast %24 : vector<1x32xf32> to vector<8x32xf32>
    %104 = arith.addf %102, %103 : vector<8x32xf32>
    %105 = arith.addf %14, %104 : vector<8x32xf32>
    %c0_39 = arith.constant 0 : index
    %c256 = arith.constant 256 : index
    %106 = vector.load %arg9[%c0_39, %c256] : memref<1x5504xf32, #tpu.memory_space<vmem>>, vector<1x32xf32>
    %c0_40 = arith.constant 0 : index
    %c384 = arith.constant 384 : index
    %107 = vector.load %arg9[%c0_40, %c384] : memref<1x5504xf32, #tpu.memory_space<vmem>>, vector<1x32xf32>
    %cst_41 = arith.constant dense<0.000000e+00> : vector<8xf32>
    %108 = vector.multi_reduction <add>, %105, %cst_41 [1] : vector<8x32xf32> to vector<8xf32>
    %109 = vector.shape_cast %108 : vector<8xf32> to vector<8x1xf32>
    %cst_42 = arith.constant 3.200000e+01 : f32
    %110 = vector.broadcast %cst_42 : f32 to vector<8x1xf32>
    %111 = arith.divf %109, %110 : vector<8x1xf32>
    %112 = vector.broadcast %111 : vector<8x1xf32> to vector<8x32xf32>
    %113 = arith.subf %105, %112 : vector<8x32xf32>
    %114 = arith.mulf %113, %113 : vector<8x32xf32>
    %cst_43 = arith.constant dense<0.000000e+00> : vector<8xf32>
    %115 = vector.multi_reduction <add>, %114, %cst_43 [1] : vector<8x32xf32> to vector<8xf32>
    %116 = vector.shape_cast %115 : vector<8xf32> to vector<8x1xf32>
    %cst_44 = arith.constant 3.200000e+01 : f32
    %117 = vector.broadcast %cst_44 : f32 to vector<8x1xf32>
    %118 = arith.divf %116, %117 : vector<8x1xf32>
    %119 = vector.broadcast %111 : vector<8x1xf32> to vector<8x32xf32>
    %120 = arith.subf %105, %119 : vector<8x32xf32>
    %cst_45 = arith.constant 9.99999974E-6 : f32
    %121 = vector.broadcast %cst_45 : f32 to vector<8x1xf32>
    %122 = arith.addf %118, %121 : vector<8x1xf32>
    %123 = math.rsqrt %122 : vector<8x1xf32>
    %124 = vector.broadcast %123 : vector<8x1xf32> to vector<8x32xf32>
    %125 = arith.mulf %120, %124 : vector<8x32xf32>
    %126 = vector.broadcast %106 : vector<1x32xf32> to vector<8x32xf32>
    %127 = arith.mulf %125, %126 : vector<8x32xf32>
    %128 = vector.broadcast %107 : vector<1x32xf32> to vector<8x32xf32>
    %129 = arith.addf %127, %128 : vector<8x32xf32>
    %c0_46 = arith.constant 0 : index
    %c256_47 = arith.constant 256 : index
    %130 = vector.load %arg7[%c0_46, %c256_47] : memref<32x2432xf32, #tpu.memory_space<vmem>>, vector<32x64xf32>
    %c0_48 = arith.constant 0 : index
    %c512 = arith.constant 512 : index
    %131 = vector.load %arg9[%c0_48, %c512] : memref<1x5504xf32, #tpu.memory_space<vmem>>, vector<1x64xf32>
    %c0_49 = arith.constant 0 : index
    %c0_50 = arith.constant 0 : index
    %132 = vector.load %arg8[%c0_49, %c0_50] : memref<64x512xf32, #tpu.memory_space<vmem>>, vector<64x32xf32>
    %c0_51 = arith.constant 0 : index
    %c640 = arith.constant 640 : index
    %133 = vector.load %arg9[%c0_51, %c640] : memref<1x5504xf32, #tpu.memory_space<vmem>>, vector<1x32xf32>
    %cst_52 = arith.constant dense<0.000000e+00> : vector<8x64xf32>
    %134 = tpu.matmul %129, %130, %cst_52 {dimension_numbers = #tpu.dot_dimension_numbers<[1], [0], [0], [1], [0, 0, 1, 1], [], []>} : vector<8x32xf32>, vector<32x64xf32>, vector<8x64xf32> -> vector<8x64xf32>
    %135 = vector.broadcast %131 : vector<1x64xf32> to vector<8x64xf32>
    %136 = arith.addf %134, %135 : vector<8x64xf32>
    %137 = arith.negf %136 : vector<8x64xf32>
    %138 = math.exp %137 : vector<8x64xf32>
    %cst_53 = arith.constant 1.000000e+00 : f32
    %139 = vector.broadcast %cst_53 : f32 to vector<8x64xf32>
    %140 = arith.addf %139, %138 : vector<8x64xf32>
    %141 = arith.divf %139, %140 : vector<8x64xf32>
    %142 = arith.mulf %136, %141 : vector<8x64xf32>
    %cst_54 = arith.constant dense<0.000000e+00> : vector<8x32xf32>
    %143 = tpu.matmul %142, %132, %cst_54 {dimension_numbers = #tpu.dot_dimension_numbers<[1], [0], [0], [1], [0, 0, 1, 1], [], []>} : vector<8x64xf32>, vector<64x32xf32>, vector<8x32xf32> -> vector<8x32xf32>
    %144 = vector.broadcast %133 : vector<1x32xf32> to vector<8x32xf32>
    %145 = arith.addf %143, %144 : vector<8x32xf32>
    %146 = arith.addf %129, %145 : vector<8x32xf32>
    %c0_55 = arith.constant 0 : index
    %c768 = arith.constant 768 : index
    %147 = vector.load %arg9[%c0_55, %c768] : memref<1x5504xf32, #tpu.memory_space<vmem>>, vector<1x32xf32>
    %c0_56 = arith.constant 0 : index
    %c896 = arith.constant 896 : index
    %148 = vector.load %arg9[%c0_56, %c896] : memref<1x5504xf32, #tpu.memory_space<vmem>>, vector<1x32xf32>
    %cst_57 = arith.constant dense<0.000000e+00> : vector<8xf32>
    %149 = vector.multi_reduction <add>, %146, %cst_57 [1] : vector<8x32xf32> to vector<8xf32>
    %150 = vector.shape_cast %149 : vector<8xf32> to vector<8x1xf32>
    %cst_58 = arith.constant 3.200000e+01 : f32
    %151 = vector.broadcast %cst_58 : f32 to vector<8x1xf32>
    %152 = arith.divf %150, %151 : vector<8x1xf32>
    %153 = vector.broadcast %152 : vector<8x1xf32> to vector<8x32xf32>
    %154 = arith.subf %146, %153 : vector<8x32xf32>
    %155 = arith.mulf %154, %154 : vector<8x32xf32>
    %cst_59 = arith.constant dense<0.000000e+00> : vector<8xf32>
    %156 = vector.multi_reduction <add>, %155, %cst_59 [1] : vector<8x32xf32> to vector<8xf32>
    %157 = vector.shape_cast %156 : vector<8xf32> to vector<8x1xf32>
    %cst_60 = arith.constant 3.200000e+01 : f32
    %158 = vector.broadcast %cst_60 : f32 to vector<8x1xf32>
    %159 = arith.divf %157, %158 : vector<8x1xf32>
    %160 = vector.broadcast %152 : vector<8x1xf32> to vector<8x32xf32>
    %161 = arith.subf %146, %160 : vector<8x32xf32>
    %cst_61 = arith.constant 9.99999974E-6 : f32
    %162 = vector.broadcast %cst_61 : f32 to vector<8x1xf32>
    %163 = arith.addf %159, %162 : vector<8x1xf32>
    %164 = math.rsqrt %163 : vector<8x1xf32>
    %165 = vector.broadcast %164 : vector<8x1xf32> to vector<8x32xf32>
    %166 = arith.mulf %161, %165 : vector<8x32xf32>
    %167 = vector.broadcast %147 : vector<1x32xf32> to vector<8x32xf32>
    %168 = arith.mulf %166, %167 : vector<8x32xf32>
    %169 = vector.broadcast %148 : vector<1x32xf32> to vector<8x32xf32>
    %170 = arith.addf %168, %169 : vector<8x32xf32>
    %c0_62 = arith.constant 0 : index
    %c384_63 = arith.constant 384 : index
    %171 = vector.load %arg7[%c0_62, %c384_63] : memref<32x2432xf32, #tpu.memory_space<vmem>>, vector<32x96xf32>
    %cst_64 = arith.constant dense<0.000000e+00> : vector<8x96xf32>
    %172 = tpu.matmul %170, %171, %cst_64 {dimension_numbers = #tpu.dot_dimension_numbers<[1], [0], [0], [1], [0, 0, 1, 1], [], []>} : vector<8x32xf32>, vector<32x96xf32>, vector<8x96xf32> -> vector<8x96xf32>
    %c0_65 = arith.constant 0 : index
    %c1024 = arith.constant 1024 : index
    %173 = vector.load %arg9[%c0_65, %c1024] : memref<1x5504xf32, #tpu.memory_space<vmem>>, vector<1x96xf32>
    %174 = vector.broadcast %173 : vector<1x96xf32> to vector<8x96xf32>
    %175 = arith.addf %172, %174 : vector<8x96xf32>
    %176 = vector.extract_strided_slice %175 {offsets = [0, 0], sizes = [8, 32], strides = [1, 1]} : vector<8x96xf32> to vector<8x32xf32>
    %177 = vector.extract_strided_slice %175 {offsets = [0, 32], sizes = [8, 32], strides = [1, 1]} : vector<8x96xf32> to vector<8x32xf32>
    %178 = vector.extract_strided_slice %175 {offsets = [0, 64], sizes = [8, 32], strides = [1, 1]} : vector<8x96xf32> to vector<8x32xf32>
    %c0_66 = arith.constant 0 : index
    %c512_67 = arith.constant 512 : index
    %179 = vector.load %arg7[%c0_66, %c512_67] : memref<32x2432xf32, #tpu.memory_space<vmem>>, vector<32x32xf32>
    %c0_68 = arith.constant 0 : index
    %c1152 = arith.constant 1152 : index
    %180 = vector.load %arg9[%c0_68, %c1152] : memref<1x5504xf32, #tpu.memory_space<vmem>>, vector<1x32xf32>
    %181 = vector.extract_strided_slice %176 {offsets = [0, 0], sizes = [8, 8], strides = [1, 1]} : vector<8x32xf32> to vector<8x8xf32>
    %182 = vector.extract_strided_slice %177 {offsets = [0, 0], sizes = [8, 8], strides = [1, 1]} : vector<8x32xf32> to vector<8x8xf32>
    %183 = vector.extract_strided_slice %178 {offsets = [0, 0], sizes = [8, 8], strides = [1, 1]} : vector<8x32xf32> to vector<8x8xf32>
    %cst_69 = arith.constant dense<0.000000e+00> : vector<8x8xf32>
    %184 = tpu.matmul %181, %182, %cst_69 {dimension_numbers = #tpu.dot_dimension_numbers<[1], [1], [0], [0], [0, 0, 1, 0], [], []>} : vector<8x8xf32>, vector<8x8xf32>, vector<8x8xf32> -> vector<8x8xf32>
    %cst_70 = arith.constant 0.353553385 : f32
    %185 = vector.broadcast %cst_70 : f32 to vector<8x8xf32>
    %186 = arith.mulf %184, %185 : vector<8x8xf32>
    %187 = vector.broadcast %1 : vector<1x8xf32> to vector<8x8xf32>
    %188 = arith.addf %186, %187 : vector<8x8xf32>
    %cst_71 = arith.constant dense<0xFF800000> : vector<8xf32>
    %189 = vector.multi_reduction <maximumf>, %188, %cst_71 [1] : vector<8x8xf32> to vector<8xf32>
    %190 = vector.shape_cast %189 : vector<8xf32> to vector<8x1xf32>
    %191 = vector.broadcast %190 : vector<8x1xf32> to vector<8x8xf32>
    %192 = arith.subf %188, %191 : vector<8x8xf32>
    %193 = math.exp %192 : vector<8x8xf32>
    %cst_72 = arith.constant dense<0.000000e+00> : vector<8xf32>
    %194 = vector.multi_reduction <add>, %193, %cst_72 [1] : vector<8x8xf32> to vector<8xf32>
    %195 = vector.shape_cast %194 : vector<8xf32> to vector<8x1xf32>
    %196 = tpu.reciprocal %195 {approx = true} : vector<8x1xf32> -> vector<8x1xf32>
    %197 = vector.broadcast %196 : vector<8x1xf32> to vector<8x8xf32>
    %198 = arith.mulf %193, %197 : vector<8x8xf32>
    %cst_73 = arith.constant dense<0.000000e+00> : vector<8x8xf32>
    %199 = tpu.matmul %198, %183, %cst_73 {dimension_numbers = #tpu.dot_dimension_numbers<[1], [0], [0], [1], [0, 0, 1, 1], [], []>} : vector<8x8xf32>, vector<8x8xf32>, vector<8x8xf32> -> vector<8x8xf32>
    %200 = vector.extract_strided_slice %176 {offsets = [0, 8], sizes = [8, 8], strides = [1, 1]} : vector<8x32xf32> to vector<8x8xf32>
    %201 = vector.extract_strided_slice %177 {offsets = [0, 8], sizes = [8, 8], strides = [1, 1]} : vector<8x32xf32> to vector<8x8xf32>
    %202 = vector.extract_strided_slice %178 {offsets = [0, 8], sizes = [8, 8], strides = [1, 1]} : vector<8x32xf32> to vector<8x8xf32>
    %cst_74 = arith.constant dense<0.000000e+00> : vector<8x8xf32>
    %203 = tpu.matmul %200, %201, %cst_74 {dimension_numbers = #tpu.dot_dimension_numbers<[1], [1], [0], [0], [0, 0, 1, 0], [], []>} : vector<8x8xf32>, vector<8x8xf32>, vector<8x8xf32> -> vector<8x8xf32>
    %cst_75 = arith.constant 0.353553385 : f32
    %204 = vector.broadcast %cst_75 : f32 to vector<8x8xf32>
    %205 = arith.mulf %203, %204 : vector<8x8xf32>
    %206 = vector.broadcast %1 : vector<1x8xf32> to vector<8x8xf32>
    %207 = arith.addf %205, %206 : vector<8x8xf32>
    %cst_76 = arith.constant dense<0xFF800000> : vector<8xf32>
    %208 = vector.multi_reduction <maximumf>, %207, %cst_76 [1] : vector<8x8xf32> to vector<8xf32>
    %209 = vector.shape_cast %208 : vector<8xf32> to vector<8x1xf32>
    %210 = vector.broadcast %209 : vector<8x1xf32> to vector<8x8xf32>
    %211 = arith.subf %207, %210 : vector<8x8xf32>
    %212 = math.exp %211 : vector<8x8xf32>
    %cst_77 = arith.constant dense<0.000000e+00> : vector<8xf32>
    %213 = vector.multi_reduction <add>, %212, %cst_77 [1] : vector<8x8xf32> to vector<8xf32>
    %214 = vector.shape_cast %213 : vector<8xf32> to vector<8x1xf32>
    %215 = tpu.reciprocal %214 {approx = true} : vector<8x1xf32> -> vector<8x1xf32>
    %216 = vector.broadcast %215 : vector<8x1xf32> to vector<8x8xf32>
    %217 = arith.mulf %212, %216 : vector<8x8xf32>
    %cst_78 = arith.constant dense<0.000000e+00> : vector<8x8xf32>
    %218 = tpu.matmul %217, %202, %cst_78 {dimension_numbers = #tpu.dot_dimension_numbers<[1], [0], [0], [1], [0, 0, 1, 1], [], []>} : vector<8x8xf32>, vector<8x8xf32>, vector<8x8xf32> -> vector<8x8xf32>
    %219 = vector.extract_strided_slice %176 {offsets = [0, 16], sizes = [8, 8], strides = [1, 1]} : vector<8x32xf32> to vector<8x8xf32>
    %220 = vector.extract_strided_slice %177 {offsets = [0, 16], sizes = [8, 8], strides = [1, 1]} : vector<8x32xf32> to vector<8x8xf32>
    %221 = vector.extract_strided_slice %178 {offsets = [0, 16], sizes = [8, 8], strides = [1, 1]} : vector<8x32xf32> to vector<8x8xf32>
    %cst_79 = arith.constant dense<0.000000e+00> : vector<8x8xf32>
    %222 = tpu.matmul %219, %220, %cst_79 {dimension_numbers = #tpu.dot_dimension_numbers<[1], [1], [0], [0], [0, 0, 1, 0], [], []>} : vector<8x8xf32>, vector<8x8xf32>, vector<8x8xf32> -> vector<8x8xf32>
    %cst_80 = arith.constant 0.353553385 : f32
    %223 = vector.broadcast %cst_80 : f32 to vector<8x8xf32>
    %224 = arith.mulf %222, %223 : vector<8x8xf32>
    %225 = vector.broadcast %1 : vector<1x8xf32> to vector<8x8xf32>
    %226 = arith.addf %224, %225 : vector<8x8xf32>
    %cst_81 = arith.constant dense<0xFF800000> : vector<8xf32>
    %227 = vector.multi_reduction <maximumf>, %226, %cst_81 [1] : vector<8x8xf32> to vector<8xf32>
    %228 = vector.shape_cast %227 : vector<8xf32> to vector<8x1xf32>
    %229 = vector.broadcast %228 : vector<8x1xf32> to vector<8x8xf32>
    %230 = arith.subf %226, %229 : vector<8x8xf32>
    %231 = math.exp %230 : vector<8x8xf32>
    %cst_82 = arith.constant dense<0.000000e+00> : vector<8xf32>
    %232 = vector.multi_reduction <add>, %231, %cst_82 [1] : vector<8x8xf32> to vector<8xf32>
    %233 = vector.shape_cast %232 : vector<8xf32> to vector<8x1xf32>
    %234 = tpu.reciprocal %233 {approx = true} : vector<8x1xf32> -> vector<8x1xf32>
    %235 = vector.broadcast %234 : vector<8x1xf32> to vector<8x8xf32>
    %236 = arith.mulf %231, %235 : vector<8x8xf32>
    %cst_83 = arith.constant dense<0.000000e+00> : vector<8x8xf32>
    %237 = tpu.matmul %236, %221, %cst_83 {dimension_numbers = #tpu.dot_dimension_numbers<[1], [0], [0], [1], [0, 0, 1, 1], [], []>} : vector<8x8xf32>, vector<8x8xf32>, vector<8x8xf32> -> vector<8x8xf32>
    %238 = vector.extract_strided_slice %176 {offsets = [0, 24], sizes = [8, 8], strides = [1, 1]} : vector<8x32xf32> to vector<8x8xf32>
    %239 = vector.extract_strided_slice %177 {offsets = [0, 24], sizes = [8, 8], strides = [1, 1]} : vector<8x32xf32> to vector<8x8xf32>
    %240 = vector.extract_strided_slice %178 {offsets = [0, 24], sizes = [8, 8], strides = [1, 1]} : vector<8x32xf32> to vector<8x8xf32>
    %cst_84 = arith.constant dense<0.000000e+00> : vector<8x8xf32>
    %241 = tpu.matmul %238, %239, %cst_84 {dimension_numbers = #tpu.dot_dimension_numbers<[1], [1], [0], [0], [0, 0, 1, 0], [], []>} : vector<8x8xf32>, vector<8x8xf32>, vector<8x8xf32> -> vector<8x8xf32>
    %cst_85 = arith.constant 0.353553385 : f32
    %242 = vector.broadcast %cst_85 : f32 to vector<8x8xf32>
    %243 = arith.mulf %241, %242 : vector<8x8xf32>
    %244 = vector.broadcast %1 : vector<1x8xf32> to vector<8x8xf32>
    %245 = arith.addf %243, %244 : vector<8x8xf32>
    %cst_86 = arith.constant dense<0xFF800000> : vector<8xf32>
    %246 = vector.multi_reduction <maximumf>, %245, %cst_86 [1] : vector<8x8xf32> to vector<8xf32>
    %247 = vector.shape_cast %246 : vector<8xf32> to vector<8x1xf32>
    %248 = vector.broadcast %247 : vector<8x1xf32> to vector<8x8xf32>
    %249 = arith.subf %245, %248 : vector<8x8xf32>
    %250 = math.exp %249 : vector<8x8xf32>
    %cst_87 = arith.constant dense<0.000000e+00> : vector<8xf32>
    %251 = vector.multi_reduction <add>, %250, %cst_87 [1] : vector<8x8xf32> to vector<8xf32>
    %252 = vector.shape_cast %251 : vector<8xf32> to vector<8x1xf32>
    %253 = tpu.reciprocal %252 {approx = true} : vector<8x1xf32> -> vector<8x1xf32>
    %254 = vector.broadcast %253 : vector<8x1xf32> to vector<8x8xf32>
    %255 = arith.mulf %250, %254 : vector<8x8xf32>
    %cst_88 = arith.constant dense<0.000000e+00> : vector<8x8xf32>
    %256 = tpu.matmul %255, %240, %cst_88 {dimension_numbers = #tpu.dot_dimension_numbers<[1], [0], [0], [1], [0, 0, 1, 1], [], []>} : vector<8x8xf32>, vector<8x8xf32>, vector<8x8xf32> -> vector<8x8xf32>
    %257 = tpu.concatenate %199, %218, %237, %256 in 1 : vector<8x8xf32>, vector<8x8xf32>, vector<8x8xf32>, vector<8x8xf32> -> vector<8x32xf32>
    %cst_89 = arith.constant dense<0.000000e+00> : vector<8x32xf32>
    %258 = tpu.matmul %257, %179, %cst_89 {dimension_numbers = #tpu.dot_dimension_numbers<[1], [0], [0], [1], [0, 0, 1, 1], [], []>} : vector<8x32xf32>, vector<32x32xf32>, vector<8x32xf32> -> vector<8x32xf32>
    %259 = vector.broadcast %180 : vector<1x32xf32> to vector<8x32xf32>
    %260 = arith.addf %258, %259 : vector<8x32xf32>
    %261 = arith.addf %170, %260 : vector<8x32xf32>
    %c0_90 = arith.constant 0 : index
    %c1280 = arith.constant 1280 : index
    %262 = vector.load %arg9[%c0_90, %c1280] : memref<1x5504xf32, #tpu.memory_space<vmem>>, vector<1x32xf32>
    %c0_91 = arith.constant 0 : index
    %c1408 = arith.constant 1408 : index
    %263 = vector.load %arg9[%c0_91, %c1408] : memref<1x5504xf32, #tpu.memory_space<vmem>>, vector<1x32xf32>
    %cst_92 = arith.constant dense<0.000000e+00> : vector<8xf32>
    %264 = vector.multi_reduction <add>, %261, %cst_92 [1] : vector<8x32xf32> to vector<8xf32>
    %265 = vector.shape_cast %264 : vector<8xf32> to vector<8x1xf32>
    %cst_93 = arith.constant 3.200000e+01 : f32
    %266 = vector.broadcast %cst_93 : f32 to vector<8x1xf32>
    %267 = arith.divf %265, %266 : vector<8x1xf32>
    %268 = vector.broadcast %267 : vector<8x1xf32> to vector<8x32xf32>
    %269 = arith.subf %261, %268 : vector<8x32xf32>
    %270 = arith.mulf %269, %269 : vector<8x32xf32>
    %cst_94 = arith.constant dense<0.000000e+00> : vector<8xf32>
    %271 = vector.multi_reduction <add>, %270, %cst_94 [1] : vector<8x32xf32> to vector<8xf32>
    %272 = vector.shape_cast %271 : vector<8xf32> to vector<8x1xf32>
    %cst_95 = arith.constant 3.200000e+01 : f32
    %273 = vector.broadcast %cst_95 : f32 to vector<8x1xf32>
    %274 = arith.divf %272, %273 : vector<8x1xf32>
    %275 = vector.broadcast %267 : vector<8x1xf32> to vector<8x32xf32>
    %276 = arith.subf %261, %275 : vector<8x32xf32>
    %cst_96 = arith.constant 9.99999974E-6 : f32
    %277 = vector.broadcast %cst_96 : f32 to vector<8x1xf32>
    %278 = arith.addf %274, %277 : vector<8x1xf32>
    %279 = math.rsqrt %278 : vector<8x1xf32>
    %280 = vector.broadcast %279 : vector<8x1xf32> to vector<8x32xf32>
    %281 = arith.mulf %276, %280 : vector<8x32xf32>
    %282 = vector.broadcast %262 : vector<1x32xf32> to vector<8x32xf32>
    %283 = arith.mulf %281, %282 : vector<8x32xf32>
    %284 = vector.broadcast %263 : vector<1x32xf32> to vector<8x32xf32>
    %285 = arith.addf %283, %284 : vector<8x32xf32>
    %c0_97 = arith.constant 0 : index
    %c640_98 = arith.constant 640 : index
    %286 = vector.load %arg7[%c0_97, %c640_98] : memref<32x2432xf32, #tpu.memory_space<vmem>>, vector<32x64xf32>
    %c0_99 = arith.constant 0 : index
    %c1536 = arith.constant 1536 : index
    %287 = vector.load %arg9[%c0_99, %c1536] : memref<1x5504xf32, #tpu.memory_space<vmem>>, vector<1x64xf32>
    %c0_100 = arith.constant 0 : index
    %c128_101 = arith.constant 128 : index
    %288 = vector.load %arg8[%c0_100, %c128_101] : memref<64x512xf32, #tpu.memory_space<vmem>>, vector<64x32xf32>
    %c0_102 = arith.constant 0 : index
    %c1664 = arith.constant 1664 : index
    %289 = vector.load %arg9[%c0_102, %c1664] : memref<1x5504xf32, #tpu.memory_space<vmem>>, vector<1x32xf32>
    %cst_103 = arith.constant dense<0.000000e+00> : vector<8x64xf32>
    %290 = tpu.matmul %285, %286, %cst_103 {dimension_numbers = #tpu.dot_dimension_numbers<[1], [0], [0], [1], [0, 0, 1, 1], [], []>} : vector<8x32xf32>, vector<32x64xf32>, vector<8x64xf32> -> vector<8x64xf32>
    %291 = vector.broadcast %287 : vector<1x64xf32> to vector<8x64xf32>
    %292 = arith.addf %290, %291 : vector<8x64xf32>
    %293 = arith.negf %292 : vector<8x64xf32>
    %294 = math.exp %293 : vector<8x64xf32>
    %cst_104 = arith.constant 1.000000e+00 : f32
    %295 = vector.broadcast %cst_104 : f32 to vector<8x64xf32>
    %296 = arith.addf %295, %294 : vector<8x64xf32>
    %297 = arith.divf %295, %296 : vector<8x64xf32>
    %298 = arith.mulf %292, %297 : vector<8x64xf32>
    %cst_105 = arith.constant dense<0.000000e+00> : vector<8x32xf32>
    %299 = tpu.matmul %298, %288, %cst_105 {dimension_numbers = #tpu.dot_dimension_numbers<[1], [0], [0], [1], [0, 0, 1, 1], [], []>} : vector<8x64xf32>, vector<64x32xf32>, vector<8x32xf32> -> vector<8x32xf32>
    %300 = vector.broadcast %289 : vector<1x32xf32> to vector<8x32xf32>
    %301 = arith.addf %299, %300 : vector<8x32xf32>
    %302 = arith.addf %285, %301 : vector<8x32xf32>
    %c0_106 = arith.constant 0 : index
    %c1792 = arith.constant 1792 : index
    %303 = vector.load %arg9[%c0_106, %c1792] : memref<1x5504xf32, #tpu.memory_space<vmem>>, vector<1x32xf32>
    %c0_107 = arith.constant 0 : index
    %c1920 = arith.constant 1920 : index
    %304 = vector.load %arg9[%c0_107, %c1920] : memref<1x5504xf32, #tpu.memory_space<vmem>>, vector<1x32xf32>
    %cst_108 = arith.constant dense<0.000000e+00> : vector<8xf32>
    %305 = vector.multi_reduction <add>, %302, %cst_108 [1] : vector<8x32xf32> to vector<8xf32>
    %306 = vector.shape_cast %305 : vector<8xf32> to vector<8x1xf32>
    %cst_109 = arith.constant 3.200000e+01 : f32
    %307 = vector.broadcast %cst_109 : f32 to vector<8x1xf32>
    %308 = arith.divf %306, %307 : vector<8x1xf32>
    %309 = vector.broadcast %308 : vector<8x1xf32> to vector<8x32xf32>
    %310 = arith.subf %302, %309 : vector<8x32xf32>
    %311 = arith.mulf %310, %310 : vector<8x32xf32>
    %cst_110 = arith.constant dense<0.000000e+00> : vector<8xf32>
    %312 = vector.multi_reduction <add>, %311, %cst_110 [1] : vector<8x32xf32> to vector<8xf32>
    %313 = vector.shape_cast %312 : vector<8xf32> to vector<8x1xf32>
    %cst_111 = arith.constant 3.200000e+01 : f32
    %314 = vector.broadcast %cst_111 : f32 to vector<8x1xf32>
    %315 = arith.divf %313, %314 : vector<8x1xf32>
    %316 = vector.broadcast %308 : vector<8x1xf32> to vector<8x32xf32>
    %317 = arith.subf %302, %316 : vector<8x32xf32>
    %cst_112 = arith.constant 9.99999974E-6 : f32
    %318 = vector.broadcast %cst_112 : f32 to vector<8x1xf32>
    %319 = arith.addf %315, %318 : vector<8x1xf32>
    %320 = math.rsqrt %319 : vector<8x1xf32>
    %321 = vector.broadcast %320 : vector<8x1xf32> to vector<8x32xf32>
    %322 = arith.mulf %317, %321 : vector<8x32xf32>
    %323 = vector.broadcast %303 : vector<1x32xf32> to vector<8x32xf32>
    %324 = arith.mulf %322, %323 : vector<8x32xf32>
    %325 = vector.broadcast %304 : vector<1x32xf32> to vector<8x32xf32>
    %326 = arith.addf %324, %325 : vector<8x32xf32>
    %327 = tpu.iota {dimensions = array<i32: 0>} : vector<8x8xi32>
    %328 = tpu.iota {dimensions = array<i32: 1>} : vector<8x8xi32>
    %329 = arith.cmpi sle, %328, %327 : vector<8x8xi32>
    %cst_113 = arith.constant 0.000000e+00 : f32
    %cst_114 = arith.constant -1.000000e+09 : f32
    %330 = vector.broadcast %cst_113 : f32 to vector<8x8xf32>
    %331 = vector.broadcast %cst_114 : f32 to vector<8x8xf32>
    %332 = arith.select %329, %330, %331 : vector<8x8xi1>, vector<8x8xf32>
    %c0_115 = arith.constant 0 : index
    %c0_116 = arith.constant 0 : index
    %c0_117 = arith.constant 0 : index
    %333 = vector.load %arg2[%c0_115, %c0_116, %c0_117] : memref<1x8x1xi32, #tpu.memory_space<vmem>>, vector<1x8x1xi32>
    %334 = vector.shape_cast %333 : vector<1x8x1xi32> to vector<8x1xi32>
    %335 = tpu.iota {dimensions = array<i32: 1>} : vector<8x64xi32>
    %336 = vector.broadcast %334 : vector<8x1xi32> to vector<8x64xi32>
    %337 = arith.cmpi eq, %335, %336 : vector<8x64xi32>
    %338 = arith.extui %337 : vector<8x64xi1> to vector<8x64xi32>
    %339 = arith.sitofp %338 : vector<8x64xi32> to vector<8x64xf32>
    %c0_118 = arith.constant 0 : index
    %c0_119 = arith.constant 0 : index
    %340 = vector.load %arg5[%c0_118, %c0_119] : memref<64x32xf32, #tpu.memory_space<vmem>>, vector<64x32xf32>
    %cst_120 = arith.constant dense<0.000000e+00> : vector<8x32xf32>
    %341 = tpu.matmul %339, %340, %cst_120 {dimension_numbers = #tpu.dot_dimension_numbers<[1], [0], [0], [1], [0, 0, 1, 1], [], []>} : vector<8x64xf32>, vector<64x32xf32>, vector<8x32xf32> -> vector<8x32xf32>
    %cst_121 = arith.constant 5.65685415 : f32
    %342 = vector.broadcast %cst_121 : f32 to vector<8x32xf32>
    %343 = arith.mulf %341, %342 : vector<8x32xf32>
    %c0_122 = arith.constant 0 : index
    %c0_123 = arith.constant 0 : index
    %344 = vector.load %arg6[%c0_122, %c0_123] : memref<64x32xf32, #tpu.memory_space<vmem>>, vector<8x32xf32>
    %345 = arith.addf %343, %344 : vector<8x32xf32>
    %c0_124 = arith.constant 0 : index
    %c768_125 = arith.constant 768 : index
    %346 = vector.load %arg7[%c0_124, %c768_125] : memref<32x2432xf32, #tpu.memory_space<vmem>>, vector<32x96xf32>
    %cst_126 = arith.constant dense<0.000000e+00> : vector<8x96xf32>
    %347 = tpu.matmul %345, %346, %cst_126 {dimension_numbers = #tpu.dot_dimension_numbers<[1], [0], [0], [1], [0, 0, 1, 1], [], []>} : vector<8x32xf32>, vector<32x96xf32>, vector<8x96xf32> -> vector<8x96xf32>
    %c0_127 = arith.constant 0 : index
    %c2048 = arith.constant 2048 : index
    %348 = vector.load %arg9[%c0_127, %c2048] : memref<1x5504xf32, #tpu.memory_space<vmem>>, vector<1x96xf32>
    %349 = vector.broadcast %348 : vector<1x96xf32> to vector<8x96xf32>
    %350 = arith.addf %347, %349 : vector<8x96xf32>
    %351 = vector.extract_strided_slice %350 {offsets = [0, 0], sizes = [8, 32], strides = [1, 1]} : vector<8x96xf32> to vector<8x32xf32>
    %352 = vector.extract_strided_slice %350 {offsets = [0, 32], sizes = [8, 32], strides = [1, 1]} : vector<8x96xf32> to vector<8x32xf32>
    %353 = vector.extract_strided_slice %350 {offsets = [0, 64], sizes = [8, 32], strides = [1, 1]} : vector<8x96xf32> to vector<8x32xf32>
    %c0_128 = arith.constant 0 : index
    %c896_129 = arith.constant 896 : index
    %354 = vector.load %arg7[%c0_128, %c896_129] : memref<32x2432xf32, #tpu.memory_space<vmem>>, vector<32x32xf32>
    %c0_130 = arith.constant 0 : index
    %c2176 = arith.constant 2176 : index
    %355 = vector.load %arg9[%c0_130, %c2176] : memref<1x5504xf32, #tpu.memory_space<vmem>>, vector<1x32xf32>
    %356 = vector.extract_strided_slice %351 {offsets = [0, 0], sizes = [8, 8], strides = [1, 1]} : vector<8x32xf32> to vector<8x8xf32>
    %357 = vector.extract_strided_slice %352 {offsets = [0, 0], sizes = [8, 8], strides = [1, 1]} : vector<8x32xf32> to vector<8x8xf32>
    %358 = vector.extract_strided_slice %353 {offsets = [0, 0], sizes = [8, 8], strides = [1, 1]} : vector<8x32xf32> to vector<8x8xf32>
    %cst_131 = arith.constant dense<0.000000e+00> : vector<8x8xf32>
    %359 = tpu.matmul %356, %357, %cst_131 {dimension_numbers = #tpu.dot_dimension_numbers<[1], [1], [0], [0], [0, 0, 1, 0], [], []>} : vector<8x8xf32>, vector<8x8xf32>, vector<8x8xf32> -> vector<8x8xf32>
    %cst_132 = arith.constant 0.353553385 : f32
    %360 = vector.broadcast %cst_132 : f32 to vector<8x8xf32>
    %361 = arith.mulf %359, %360 : vector<8x8xf32>
    %362 = arith.addf %361, %332 : vector<8x8xf32>
    %cst_133 = arith.constant dense<0xFF800000> : vector<8xf32>
    %363 = vector.multi_reduction <maximumf>, %362, %cst_133 [1] : vector<8x8xf32> to vector<8xf32>
    %364 = vector.shape_cast %363 : vector<8xf32> to vector<8x1xf32>
    %365 = vector.broadcast %364 : vector<8x1xf32> to vector<8x8xf32>
    %366 = arith.subf %362, %365 : vector<8x8xf32>
    %367 = math.exp %366 : vector<8x8xf32>
    %cst_134 = arith.constant dense<0.000000e+00> : vector<8xf32>
    %368 = vector.multi_reduction <add>, %367, %cst_134 [1] : vector<8x8xf32> to vector<8xf32>
    %369 = vector.shape_cast %368 : vector<8xf32> to vector<8x1xf32>
    %370 = tpu.reciprocal %369 {approx = true} : vector<8x1xf32> -> vector<8x1xf32>
    %371 = vector.broadcast %370 : vector<8x1xf32> to vector<8x8xf32>
    %372 = arith.mulf %367, %371 : vector<8x8xf32>
    %cst_135 = arith.constant dense<0.000000e+00> : vector<8x8xf32>
    %373 = tpu.matmul %372, %358, %cst_135 {dimension_numbers = #tpu.dot_dimension_numbers<[1], [0], [0], [1], [0, 0, 1, 1], [], []>} : vector<8x8xf32>, vector<8x8xf32>, vector<8x8xf32> -> vector<8x8xf32>
    %374 = vector.extract_strided_slice %351 {offsets = [0, 8], sizes = [8, 8], strides = [1, 1]} : vector<8x32xf32> to vector<8x8xf32>
    %375 = vector.extract_strided_slice %352 {offsets = [0, 8], sizes = [8, 8], strides = [1, 1]} : vector<8x32xf32> to vector<8x8xf32>
    %376 = vector.extract_strided_slice %353 {offsets = [0, 8], sizes = [8, 8], strides = [1, 1]} : vector<8x32xf32> to vector<8x8xf32>
    %cst_136 = arith.constant dense<0.000000e+00> : vector<8x8xf32>
    %377 = tpu.matmul %374, %375, %cst_136 {dimension_numbers = #tpu.dot_dimension_numbers<[1], [1], [0], [0], [0, 0, 1, 0], [], []>} : vector<8x8xf32>, vector<8x8xf32>, vector<8x8xf32> -> vector<8x8xf32>
    %cst_137 = arith.constant 0.353553385 : f32
    %378 = vector.broadcast %cst_137 : f32 to vector<8x8xf32>
    %379 = arith.mulf %377, %378 : vector<8x8xf32>
    %380 = arith.addf %379, %332 : vector<8x8xf32>
    %cst_138 = arith.constant dense<0xFF800000> : vector<8xf32>
    %381 = vector.multi_reduction <maximumf>, %380, %cst_138 [1] : vector<8x8xf32> to vector<8xf32>
    %382 = vector.shape_cast %381 : vector<8xf32> to vector<8x1xf32>
    %383 = vector.broadcast %382 : vector<8x1xf32> to vector<8x8xf32>
    %384 = arith.subf %380, %383 : vector<8x8xf32>
    %385 = math.exp %384 : vector<8x8xf32>
    %cst_139 = arith.constant dense<0.000000e+00> : vector<8xf32>
    %386 = vector.multi_reduction <add>, %385, %cst_139 [1] : vector<8x8xf32> to vector<8xf32>
    %387 = vector.shape_cast %386 : vector<8xf32> to vector<8x1xf32>
    %388 = tpu.reciprocal %387 {approx = true} : vector<8x1xf32> -> vector<8x1xf32>
    %389 = vector.broadcast %388 : vector<8x1xf32> to vector<8x8xf32>
    %390 = arith.mulf %385, %389 : vector<8x8xf32>
    %cst_140 = arith.constant dense<0.000000e+00> : vector<8x8xf32>
    %391 = tpu.matmul %390, %376, %cst_140 {dimension_numbers = #tpu.dot_dimension_numbers<[1], [0], [0], [1], [0, 0, 1, 1], [], []>} : vector<8x8xf32>, vector<8x8xf32>, vector<8x8xf32> -> vector<8x8xf32>
    %392 = vector.extract_strided_slice %351 {offsets = [0, 16], sizes = [8, 8], strides = [1, 1]} : vector<8x32xf32> to vector<8x8xf32>
    %393 = vector.extract_strided_slice %352 {offsets = [0, 16], sizes = [8, 8], strides = [1, 1]} : vector<8x32xf32> to vector<8x8xf32>
    %394 = vector.extract_strided_slice %353 {offsets = [0, 16], sizes = [8, 8], strides = [1, 1]} : vector<8x32xf32> to vector<8x8xf32>
    %cst_141 = arith.constant dense<0.000000e+00> : vector<8x8xf32>
    %395 = tpu.matmul %392, %393, %cst_141 {dimension_numbers = #tpu.dot_dimension_numbers<[1], [1], [0], [0], [0, 0, 1, 0], [], []>} : vector<8x8xf32>, vector<8x8xf32>, vector<8x8xf32> -> vector<8x8xf32>
    %cst_142 = arith.constant 0.353553385 : f32
    %396 = vector.broadcast %cst_142 : f32 to vector<8x8xf32>
    %397 = arith.mulf %395, %396 : vector<8x8xf32>
    %398 = arith.addf %397, %332 : vector<8x8xf32>
    %cst_143 = arith.constant dense<0xFF800000> : vector<8xf32>
    %399 = vector.multi_reduction <maximumf>, %398, %cst_143 [1] : vector<8x8xf32> to vector<8xf32>
    %400 = vector.shape_cast %399 : vector<8xf32> to vector<8x1xf32>
    %401 = vector.broadcast %400 : vector<8x1xf32> to vector<8x8xf32>
    %402 = arith.subf %398, %401 : vector<8x8xf32>
    %403 = math.exp %402 : vector<8x8xf32>
    %cst_144 = arith.constant dense<0.000000e+00> : vector<8xf32>
    %404 = vector.multi_reduction <add>, %403, %cst_144 [1] : vector<8x8xf32> to vector<8xf32>
    %405 = vector.shape_cast %404 : vector<8xf32> to vector<8x1xf32>
    %406 = tpu.reciprocal %405 {approx = true} : vector<8x1xf32> -> vector<8x1xf32>
    %407 = vector.broadcast %406 : vector<8x1xf32> to vector<8x8xf32>
    %408 = arith.mulf %403, %407 : vector<8x8xf32>
    %cst_145 = arith.constant dense<0.000000e+00> : vector<8x8xf32>
    %409 = tpu.matmul %408, %394, %cst_145 {dimension_numbers = #tpu.dot_dimension_numbers<[1], [0], [0], [1], [0, 0, 1, 1], [], []>} : vector<8x8xf32>, vector<8x8xf32>, vector<8x8xf32> -> vector<8x8xf32>
    %410 = vector.extract_strided_slice %351 {offsets = [0, 24], sizes = [8, 8], strides = [1, 1]} : vector<8x32xf32> to vector<8x8xf32>
    %411 = vector.extract_strided_slice %352 {offsets = [0, 24], sizes = [8, 8], strides = [1, 1]} : vector<8x32xf32> to vector<8x8xf32>
    %412 = vector.extract_strided_slice %353 {offsets = [0, 24], sizes = [8, 8], strides = [1, 1]} : vector<8x32xf32> to vector<8x8xf32>
    %cst_146 = arith.constant dense<0.000000e+00> : vector<8x8xf32>
    %413 = tpu.matmul %410, %411, %cst_146 {dimension_numbers = #tpu.dot_dimension_numbers<[1], [1], [0], [0], [0, 0, 1, 0], [], []>} : vector<8x8xf32>, vector<8x8xf32>, vector<8x8xf32> -> vector<8x8xf32>
    %cst_147 = arith.constant 0.353553385 : f32
    %414 = vector.broadcast %cst_147 : f32 to vector<8x8xf32>
    %415 = arith.mulf %413, %414 : vector<8x8xf32>
    %416 = arith.addf %415, %332 : vector<8x8xf32>
    %cst_148 = arith.constant dense<0xFF800000> : vector<8xf32>
    %417 = vector.multi_reduction <maximumf>, %416, %cst_148 [1] : vector<8x8xf32> to vector<8xf32>
    %418 = vector.shape_cast %417 : vector<8xf32> to vector<8x1xf32>
    %419 = vector.broadcast %418 : vector<8x1xf32> to vector<8x8xf32>
    %420 = arith.subf %416, %419 : vector<8x8xf32>
    %421 = math.exp %420 : vector<8x8xf32>
    %cst_149 = arith.constant dense<0.000000e+00> : vector<8xf32>
    %422 = vector.multi_reduction <add>, %421, %cst_149 [1] : vector<8x8xf32> to vector<8xf32>
    %423 = vector.shape_cast %422 : vector<8xf32> to vector<8x1xf32>
    %424 = tpu.reciprocal %423 {approx = true} : vector<8x1xf32> -> vector<8x1xf32>
    %425 = vector.broadcast %424 : vector<8x1xf32> to vector<8x8xf32>
    %426 = arith.mulf %421, %425 : vector<8x8xf32>
    %cst_150 = arith.constant dense<0.000000e+00> : vector<8x8xf32>
    %427 = tpu.matmul %426, %412, %cst_150 {dimension_numbers = #tpu.dot_dimension_numbers<[1], [0], [0], [1], [0, 0, 1, 1], [], []>} : vector<8x8xf32>, vector<8x8xf32>, vector<8x8xf32> -> vector<8x8xf32>
    %428 = tpu.concatenate %373, %391, %409, %427 in 1 : vector<8x8xf32>, vector<8x8xf32>, vector<8x8xf32>, vector<8x8xf32> -> vector<8x32xf32>
    %cst_151 = arith.constant dense<0.000000e+00> : vector<8x32xf32>
    %429 = tpu.matmul %428, %354, %cst_151 {dimension_numbers = #tpu.dot_dimension_numbers<[1], [0], [0], [1], [0, 0, 1, 1], [], []>} : vector<8x32xf32>, vector<32x32xf32>, vector<8x32xf32> -> vector<8x32xf32>
    %430 = vector.broadcast %355 : vector<1x32xf32> to vector<8x32xf32>
    %431 = arith.addf %429, %430 : vector<8x32xf32>
    %432 = arith.addf %345, %431 : vector<8x32xf32>
    %c0_152 = arith.constant 0 : index
    %c2304 = arith.constant 2304 : index
    %433 = vector.load %arg9[%c0_152, %c2304] : memref<1x5504xf32, #tpu.memory_space<vmem>>, vector<1x32xf32>
    %c0_153 = arith.constant 0 : index
    %c2432 = arith.constant 2432 : index
    %434 = vector.load %arg9[%c0_153, %c2432] : memref<1x5504xf32, #tpu.memory_space<vmem>>, vector<1x32xf32>
    %cst_154 = arith.constant dense<0.000000e+00> : vector<8xf32>
    %435 = vector.multi_reduction <add>, %432, %cst_154 [1] : vector<8x32xf32> to vector<8xf32>
    %436 = vector.shape_cast %435 : vector<8xf32> to vector<8x1xf32>
    %cst_155 = arith.constant 3.200000e+01 : f32
    %437 = vector.broadcast %cst_155 : f32 to vector<8x1xf32>
    %438 = arith.divf %436, %437 : vector<8x1xf32>
    %439 = vector.broadcast %438 : vector<8x1xf32> to vector<8x32xf32>
    %440 = arith.subf %432, %439 : vector<8x32xf32>
    %441 = arith.mulf %440, %440 : vector<8x32xf32>
    %cst_156 = arith.constant dense<0.000000e+00> : vector<8xf32>
    %442 = vector.multi_reduction <add>, %441, %cst_156 [1] : vector<8x32xf32> to vector<8xf32>
    %443 = vector.shape_cast %442 : vector<8xf32> to vector<8x1xf32>
    %cst_157 = arith.constant 3.200000e+01 : f32
    %444 = vector.broadcast %cst_157 : f32 to vector<8x1xf32>
    %445 = arith.divf %443, %444 : vector<8x1xf32>
    %446 = vector.broadcast %438 : vector<8x1xf32> to vector<8x32xf32>
    %447 = arith.subf %432, %446 : vector<8x32xf32>
    %cst_158 = arith.constant 9.99999974E-6 : f32
    %448 = vector.broadcast %cst_158 : f32 to vector<8x1xf32>
    %449 = arith.addf %445, %448 : vector<8x1xf32>
    %450 = math.rsqrt %449 : vector<8x1xf32>
    %451 = vector.broadcast %450 : vector<8x1xf32> to vector<8x32xf32>
    %452 = arith.mulf %447, %451 : vector<8x32xf32>
    %453 = vector.broadcast %433 : vector<1x32xf32> to vector<8x32xf32>
    %454 = arith.mulf %452, %453 : vector<8x32xf32>
    %455 = vector.broadcast %434 : vector<1x32xf32> to vector<8x32xf32>
    %456 = arith.addf %454, %455 : vector<8x32xf32>
    %c0_159 = arith.constant 0 : index
    %c1024_160 = arith.constant 1024 : index
    %457 = vector.load %arg7[%c0_159, %c1024_160] : memref<32x2432xf32, #tpu.memory_space<vmem>>, vector<32x32xf32>
    %cst_161 = arith.constant dense<0.000000e+00> : vector<8x32xf32>
    %458 = tpu.matmul %456, %457, %cst_161 {dimension_numbers = #tpu.dot_dimension_numbers<[1], [0], [0], [1], [0, 0, 1, 1], [], []>} : vector<8x32xf32>, vector<32x32xf32>, vector<8x32xf32> -> vector<8x32xf32>
    %c0_162 = arith.constant 0 : index
    %c2560 = arith.constant 2560 : index
    %459 = vector.load %arg9[%c0_162, %c2560] : memref<1x5504xf32, #tpu.memory_space<vmem>>, vector<1x32xf32>
    %460 = vector.broadcast %459 : vector<1x32xf32> to vector<8x32xf32>
    %461 = arith.addf %458, %460 : vector<8x32xf32>
    %c0_163 = arith.constant 0 : index
    %c1152_164 = arith.constant 1152 : index
    %462 = vector.load %arg7[%c0_163, %c1152_164] : memref<32x2432xf32, #tpu.memory_space<vmem>>, vector<32x64xf32>
    %cst_165 = arith.constant dense<0.000000e+00> : vector<8x64xf32>
    %463 = tpu.matmul %326, %462, %cst_165 {dimension_numbers = #tpu.dot_dimension_numbers<[1], [0], [0], [1], [0, 0, 1, 1], [], []>} : vector<8x32xf32>, vector<32x64xf32>, vector<8x64xf32> -> vector<8x64xf32>
    %c0_166 = arith.constant 0 : index
    %c2688 = arith.constant 2688 : index
    %464 = vector.load %arg9[%c0_166, %c2688] : memref<1x5504xf32, #tpu.memory_space<vmem>>, vector<1x64xf32>
    %465 = vector.broadcast %464 : vector<1x64xf32> to vector<8x64xf32>
    %466 = arith.addf %463, %465 : vector<8x64xf32>
    %467 = vector.extract_strided_slice %466 {offsets = [0, 0], sizes = [8, 32], strides = [1, 1]} : vector<8x64xf32> to vector<8x32xf32>
    %468 = vector.extract_strided_slice %466 {offsets = [0, 32], sizes = [8, 32], strides = [1, 1]} : vector<8x64xf32> to vector<8x32xf32>
    %c0_167 = arith.constant 0 : index
    %c1280_168 = arith.constant 1280 : index
    %469 = vector.load %arg7[%c0_167, %c1280_168] : memref<32x2432xf32, #tpu.memory_space<vmem>>, vector<32x32xf32>
    %c0_169 = arith.constant 0 : index
    %c2816 = arith.constant 2816 : index
    %470 = vector.load %arg9[%c0_169, %c2816] : memref<1x5504xf32, #tpu.memory_space<vmem>>, vector<1x32xf32>
    %471 = vector.extract_strided_slice %461 {offsets = [0, 0], sizes = [8, 8], strides = [1, 1]} : vector<8x32xf32> to vector<8x8xf32>
    %472 = vector.extract_strided_slice %467 {offsets = [0, 0], sizes = [8, 8], strides = [1, 1]} : vector<8x32xf32> to vector<8x8xf32>
    %473 = vector.extract_strided_slice %468 {offsets = [0, 0], sizes = [8, 8], strides = [1, 1]} : vector<8x32xf32> to vector<8x8xf32>
    %cst_170 = arith.constant dense<0.000000e+00> : vector<8x8xf32>
    %474 = tpu.matmul %471, %472, %cst_170 {dimension_numbers = #tpu.dot_dimension_numbers<[1], [1], [0], [0], [0, 0, 1, 0], [], []>} : vector<8x8xf32>, vector<8x8xf32>, vector<8x8xf32> -> vector<8x8xf32>
    %cst_171 = arith.constant 0.353553385 : f32
    %475 = vector.broadcast %cst_171 : f32 to vector<8x8xf32>
    %476 = arith.mulf %474, %475 : vector<8x8xf32>
    %477 = vector.broadcast %1 : vector<1x8xf32> to vector<8x8xf32>
    %478 = arith.addf %476, %477 : vector<8x8xf32>
    %cst_172 = arith.constant dense<0xFF800000> : vector<8xf32>
    %479 = vector.multi_reduction <maximumf>, %478, %cst_172 [1] : vector<8x8xf32> to vector<8xf32>
    %480 = vector.shape_cast %479 : vector<8xf32> to vector<8x1xf32>
    %481 = vector.broadcast %480 : vector<8x1xf32> to vector<8x8xf32>
    %482 = arith.subf %478, %481 : vector<8x8xf32>
    %483 = math.exp %482 : vector<8x8xf32>
    %cst_173 = arith.constant dense<0.000000e+00> : vector<8xf32>
    %484 = vector.multi_reduction <add>, %483, %cst_173 [1] : vector<8x8xf32> to vector<8xf32>
    %485 = vector.shape_cast %484 : vector<8xf32> to vector<8x1xf32>
    %486 = tpu.reciprocal %485 {approx = true} : vector<8x1xf32> -> vector<8x1xf32>
    %487 = vector.broadcast %486 : vector<8x1xf32> to vector<8x8xf32>
    %488 = arith.mulf %483, %487 : vector<8x8xf32>
    %cst_174 = arith.constant dense<0.000000e+00> : vector<8x8xf32>
    %489 = tpu.matmul %488, %473, %cst_174 {dimension_numbers = #tpu.dot_dimension_numbers<[1], [0], [0], [1], [0, 0, 1, 1], [], []>} : vector<8x8xf32>, vector<8x8xf32>, vector<8x8xf32> -> vector<8x8xf32>
    %490 = vector.extract_strided_slice %461 {offsets = [0, 8], sizes = [8, 8], strides = [1, 1]} : vector<8x32xf32> to vector<8x8xf32>
    %491 = vector.extract_strided_slice %467 {offsets = [0, 8], sizes = [8, 8], strides = [1, 1]} : vector<8x32xf32> to vector<8x8xf32>
    %492 = vector.extract_strided_slice %468 {offsets = [0, 8], sizes = [8, 8], strides = [1, 1]} : vector<8x32xf32> to vector<8x8xf32>
    %cst_175 = arith.constant dense<0.000000e+00> : vector<8x8xf32>
    %493 = tpu.matmul %490, %491, %cst_175 {dimension_numbers = #tpu.dot_dimension_numbers<[1], [1], [0], [0], [0, 0, 1, 0], [], []>} : vector<8x8xf32>, vector<8x8xf32>, vector<8x8xf32> -> vector<8x8xf32>
    %cst_176 = arith.constant 0.353553385 : f32
    %494 = vector.broadcast %cst_176 : f32 to vector<8x8xf32>
    %495 = arith.mulf %493, %494 : vector<8x8xf32>
    %496 = vector.broadcast %1 : vector<1x8xf32> to vector<8x8xf32>
    %497 = arith.addf %495, %496 : vector<8x8xf32>
    %cst_177 = arith.constant dense<0xFF800000> : vector<8xf32>
    %498 = vector.multi_reduction <maximumf>, %497, %cst_177 [1] : vector<8x8xf32> to vector<8xf32>
    %499 = vector.shape_cast %498 : vector<8xf32> to vector<8x1xf32>
    %500 = vector.broadcast %499 : vector<8x1xf32> to vector<8x8xf32>
    %501 = arith.subf %497, %500 : vector<8x8xf32>
    %502 = math.exp %501 : vector<8x8xf32>
    %cst_178 = arith.constant dense<0.000000e+00> : vector<8xf32>
    %503 = vector.multi_reduction <add>, %502, %cst_178 [1] : vector<8x8xf32> to vector<8xf32>
    %504 = vector.shape_cast %503 : vector<8xf32> to vector<8x1xf32>
    %505 = tpu.reciprocal %504 {approx = true} : vector<8x1xf32> -> vector<8x1xf32>
    %506 = vector.broadcast %505 : vector<8x1xf32> to vector<8x8xf32>
    %507 = arith.mulf %502, %506 : vector<8x8xf32>
    %cst_179 = arith.constant dense<0.000000e+00> : vector<8x8xf32>
    %508 = tpu.matmul %507, %492, %cst_179 {dimension_numbers = #tpu.dot_dimension_numbers<[1], [0], [0], [1], [0, 0, 1, 1], [], []>} : vector<8x8xf32>, vector<8x8xf32>, vector<8x8xf32> -> vector<8x8xf32>
    %509 = vector.extract_strided_slice %461 {offsets = [0, 16], sizes = [8, 8], strides = [1, 1]} : vector<8x32xf32> to vector<8x8xf32>
    %510 = vector.extract_strided_slice %467 {offsets = [0, 16], sizes = [8, 8], strides = [1, 1]} : vector<8x32xf32> to vector<8x8xf32>
    %511 = vector.extract_strided_slice %468 {offsets = [0, 16], sizes = [8, 8], strides = [1, 1]} : vector<8x32xf32> to vector<8x8xf32>
    %cst_180 = arith.constant dense<0.000000e+00> : vector<8x8xf32>
    %512 = tpu.matmul %509, %510, %cst_180 {dimension_numbers = #tpu.dot_dimension_numbers<[1], [1], [0], [0], [0, 0, 1, 0], [], []>} : vector<8x8xf32>, vector<8x8xf32>, vector<8x8xf32> -> vector<8x8xf32>
    %cst_181 = arith.constant 0.353553385 : f32
    %513 = vector.broadcast %cst_181 : f32 to vector<8x8xf32>
    %514 = arith.mulf %512, %513 : vector<8x8xf32>
    %515 = vector.broadcast %1 : vector<1x8xf32> to vector<8x8xf32>
    %516 = arith.addf %514, %515 : vector<8x8xf32>
    %cst_182 = arith.constant dense<0xFF800000> : vector<8xf32>
    %517 = vector.multi_reduction <maximumf>, %516, %cst_182 [1] : vector<8x8xf32> to vector<8xf32>
    %518 = vector.shape_cast %517 : vector<8xf32> to vector<8x1xf32>
    %519 = vector.broadcast %518 : vector<8x1xf32> to vector<8x8xf32>
    %520 = arith.subf %516, %519 : vector<8x8xf32>
    %521 = math.exp %520 : vector<8x8xf32>
    %cst_183 = arith.constant dense<0.000000e+00> : vector<8xf32>
    %522 = vector.multi_reduction <add>, %521, %cst_183 [1] : vector<8x8xf32> to vector<8xf32>
    %523 = vector.shape_cast %522 : vector<8xf32> to vector<8x1xf32>
    %524 = tpu.reciprocal %523 {approx = true} : vector<8x1xf32> -> vector<8x1xf32>
    %525 = vector.broadcast %524 : vector<8x1xf32> to vector<8x8xf32>
    %526 = arith.mulf %521, %525 : vector<8x8xf32>
    %cst_184 = arith.constant dense<0.000000e+00> : vector<8x8xf32>
    %527 = tpu.matmul %526, %511, %cst_184 {dimension_numbers = #tpu.dot_dimension_numbers<[1], [0], [0], [1], [0, 0, 1, 1], [], []>} : vector<8x8xf32>, vector<8x8xf32>, vector<8x8xf32> -> vector<8x8xf32>
    %528 = vector.extract_strided_slice %461 {offsets = [0, 24], sizes = [8, 8], strides = [1, 1]} : vector<8x32xf32> to vector<8x8xf32>
    %529 = vector.extract_strided_slice %467 {offsets = [0, 24], sizes = [8, 8], strides = [1, 1]} : vector<8x32xf32> to vector<8x8xf32>
    %530 = vector.extract_strided_slice %468 {offsets = [0, 24], sizes = [8, 8], strides = [1, 1]} : vector<8x32xf32> to vector<8x8xf32>
    %cst_185 = arith.constant dense<0.000000e+00> : vector<8x8xf32>
    %531 = tpu.matmul %528, %529, %cst_185 {dimension_numbers = #tpu.dot_dimension_numbers<[1], [1], [0], [0], [0, 0, 1, 0], [], []>} : vector<8x8xf32>, vector<8x8xf32>, vector<8x8xf32> -> vector<8x8xf32>
    %cst_186 = arith.constant 0.353553385 : f32
    %532 = vector.broadcast %cst_186 : f32 to vector<8x8xf32>
    %533 = arith.mulf %531, %532 : vector<8x8xf32>
    %534 = vector.broadcast %1 : vector<1x8xf32> to vector<8x8xf32>
    %535 = arith.addf %533, %534 : vector<8x8xf32>
    %cst_187 = arith.constant dense<0xFF800000> : vector<8xf32>
    %536 = vector.multi_reduction <maximumf>, %535, %cst_187 [1] : vector<8x8xf32> to vector<8xf32>
    %537 = vector.shape_cast %536 : vector<8xf32> to vector<8x1xf32>
    %538 = vector.broadcast %537 : vector<8x1xf32> to vector<8x8xf32>
    %539 = arith.subf %535, %538 : vector<8x8xf32>
    %540 = math.exp %539 : vector<8x8xf32>
    %cst_188 = arith.constant dense<0.000000e+00> : vector<8xf32>
    %541 = vector.multi_reduction <add>, %540, %cst_188 [1] : vector<8x8xf32> to vector<8xf32>
    %542 = vector.shape_cast %541 : vector<8xf32> to vector<8x1xf32>
    %543 = tpu.reciprocal %542 {approx = true} : vector<8x1xf32> -> vector<8x1xf32>
    %544 = vector.broadcast %543 : vector<8x1xf32> to vector<8x8xf32>
    %545 = arith.mulf %540, %544 : vector<8x8xf32>
    %cst_189 = arith.constant dense<0.000000e+00> : vector<8x8xf32>
    %546 = tpu.matmul %545, %530, %cst_189 {dimension_numbers = #tpu.dot_dimension_numbers<[1], [0], [0], [1], [0, 0, 1, 1], [], []>} : vector<8x8xf32>, vector<8x8xf32>, vector<8x8xf32> -> vector<8x8xf32>
    %547 = tpu.concatenate %489, %508, %527, %546 in 1 : vector<8x8xf32>, vector<8x8xf32>, vector<8x8xf32>, vector<8x8xf32> -> vector<8x32xf32>
    %cst_190 = arith.constant dense<0.000000e+00> : vector<8x32xf32>
    %548 = tpu.matmul %547, %469, %cst_190 {dimension_numbers = #tpu.dot_dimension_numbers<[1], [0], [0], [1], [0, 0, 1, 1], [], []>} : vector<8x32xf32>, vector<32x32xf32>, vector<8x32xf32> -> vector<8x32xf32>
    %549 = vector.broadcast %470 : vector<1x32xf32> to vector<8x32xf32>
    %550 = arith.addf %548, %549 : vector<8x32xf32>
    %551 = arith.addf %456, %550 : vector<8x32xf32>
    %c0_191 = arith.constant 0 : index
    %c2944 = arith.constant 2944 : index
    %552 = vector.load %arg9[%c0_191, %c2944] : memref<1x5504xf32, #tpu.memory_space<vmem>>, vector<1x32xf32>
    %c0_192 = arith.constant 0 : index
    %c3072 = arith.constant 3072 : index
    %553 = vector.load %arg9[%c0_192, %c3072] : memref<1x5504xf32, #tpu.memory_space<vmem>>, vector<1x32xf32>
    %cst_193 = arith.constant dense<0.000000e+00> : vector<8xf32>
    %554 = vector.multi_reduction <add>, %551, %cst_193 [1] : vector<8x32xf32> to vector<8xf32>
    %555 = vector.shape_cast %554 : vector<8xf32> to vector<8x1xf32>
    %cst_194 = arith.constant 3.200000e+01 : f32
    %556 = vector.broadcast %cst_194 : f32 to vector<8x1xf32>
    %557 = arith.divf %555, %556 : vector<8x1xf32>
    %558 = vector.broadcast %557 : vector<8x1xf32> to vector<8x32xf32>
    %559 = arith.subf %551, %558 : vector<8x32xf32>
    %560 = arith.mulf %559, %559 : vector<8x32xf32>
    %cst_195 = arith.constant dense<0.000000e+00> : vector<8xf32>
    %561 = vector.multi_reduction <add>, %560, %cst_195 [1] : vector<8x32xf32> to vector<8xf32>
    %562 = vector.shape_cast %561 : vector<8xf32> to vector<8x1xf32>
    %cst_196 = arith.constant 3.200000e+01 : f32
    %563 = vector.broadcast %cst_196 : f32 to vector<8x1xf32>
    %564 = arith.divf %562, %563 : vector<8x1xf32>
    %565 = vector.broadcast %557 : vector<8x1xf32> to vector<8x32xf32>
    %566 = arith.subf %551, %565 : vector<8x32xf32>
    %cst_197 = arith.constant 9.99999974E-6 : f32
    %567 = vector.broadcast %cst_197 : f32 to vector<8x1xf32>
    %568 = arith.addf %564, %567 : vector<8x1xf32>
    %569 = math.rsqrt %568 : vector<8x1xf32>
    %570 = vector.broadcast %569 : vector<8x1xf32> to vector<8x32xf32>
    %571 = arith.mulf %566, %570 : vector<8x32xf32>
    %572 = vector.broadcast %552 : vector<1x32xf32> to vector<8x32xf32>
    %573 = arith.mulf %571, %572 : vector<8x32xf32>
    %574 = vector.broadcast %553 : vector<1x32xf32> to vector<8x32xf32>
    %575 = arith.addf %573, %574 : vector<8x32xf32>
    %c0_198 = arith.constant 0 : index
    %c1408_199 = arith.constant 1408 : index
    %576 = vector.load %arg7[%c0_198, %c1408_199] : memref<32x2432xf32, #tpu.memory_space<vmem>>, vector<32x64xf32>
    %c0_200 = arith.constant 0 : index
    %c3200 = arith.constant 3200 : index
    %577 = vector.load %arg9[%c0_200, %c3200] : memref<1x5504xf32, #tpu.memory_space<vmem>>, vector<1x64xf32>
    %c0_201 = arith.constant 0 : index
    %c256_202 = arith.constant 256 : index
    %578 = vector.load %arg8[%c0_201, %c256_202] : memref<64x512xf32, #tpu.memory_space<vmem>>, vector<64x32xf32>
    %c0_203 = arith.constant 0 : index
    %c3328 = arith.constant 3328 : index
    %579 = vector.load %arg9[%c0_203, %c3328] : memref<1x5504xf32, #tpu.memory_space<vmem>>, vector<1x32xf32>
    %cst_204 = arith.constant dense<0.000000e+00> : vector<8x64xf32>
    %580 = tpu.matmul %575, %576, %cst_204 {dimension_numbers = #tpu.dot_dimension_numbers<[1], [0], [0], [1], [0, 0, 1, 1], [], []>} : vector<8x32xf32>, vector<32x64xf32>, vector<8x64xf32> -> vector<8x64xf32>
    %581 = vector.broadcast %577 : vector<1x64xf32> to vector<8x64xf32>
    %582 = arith.addf %580, %581 : vector<8x64xf32>
    %583 = arith.negf %582 : vector<8x64xf32>
    %584 = math.exp %583 : vector<8x64xf32>
    %cst_205 = arith.constant 1.000000e+00 : f32
    %585 = vector.broadcast %cst_205 : f32 to vector<8x64xf32>
    %586 = arith.addf %585, %584 : vector<8x64xf32>
    %587 = arith.divf %585, %586 : vector<8x64xf32>
    %588 = arith.mulf %582, %587 : vector<8x64xf32>
    %cst_206 = arith.constant dense<0.000000e+00> : vector<8x32xf32>
    %589 = tpu.matmul %588, %578, %cst_206 {dimension_numbers = #tpu.dot_dimension_numbers<[1], [0], [0], [1], [0, 0, 1, 1], [], []>} : vector<8x64xf32>, vector<64x32xf32>, vector<8x32xf32> -> vector<8x32xf32>
    %590 = vector.broadcast %579 : vector<1x32xf32> to vector<8x32xf32>
    %591 = arith.addf %589, %590 : vector<8x32xf32>
    %592 = arith.addf %575, %591 : vector<8x32xf32>
    %c0_207 = arith.constant 0 : index
    %c3456 = arith.constant 3456 : index
    %593 = vector.load %arg9[%c0_207, %c3456] : memref<1x5504xf32, #tpu.memory_space<vmem>>, vector<1x32xf32>
    %c0_208 = arith.constant 0 : index
    %c3584 = arith.constant 3584 : index
    %594 = vector.load %arg9[%c0_208, %c3584] : memref<1x5504xf32, #tpu.memory_space<vmem>>, vector<1x32xf32>
    %cst_209 = arith.constant dense<0.000000e+00> : vector<8xf32>
    %595 = vector.multi_reduction <add>, %592, %cst_209 [1] : vector<8x32xf32> to vector<8xf32>
    %596 = vector.shape_cast %595 : vector<8xf32> to vector<8x1xf32>
    %cst_210 = arith.constant 3.200000e+01 : f32
    %597 = vector.broadcast %cst_210 : f32 to vector<8x1xf32>
    %598 = arith.divf %596, %597 : vector<8x1xf32>
    %599 = vector.broadcast %598 : vector<8x1xf32> to vector<8x32xf32>
    %600 = arith.subf %592, %599 : vector<8x32xf32>
    %601 = arith.mulf %600, %600 : vector<8x32xf32>
    %cst_211 = arith.constant dense<0.000000e+00> : vector<8xf32>
    %602 = vector.multi_reduction <add>, %601, %cst_211 [1] : vector<8x32xf32> to vector<8xf32>
    %603 = vector.shape_cast %602 : vector<8xf32> to vector<8x1xf32>
    %cst_212 = arith.constant 3.200000e+01 : f32
    %604 = vector.broadcast %cst_212 : f32 to vector<8x1xf32>
    %605 = arith.divf %603, %604 : vector<8x1xf32>
    %606 = vector.broadcast %598 : vector<8x1xf32> to vector<8x32xf32>
    %607 = arith.subf %592, %606 : vector<8x32xf32>
    %cst_213 = arith.constant 9.99999974E-6 : f32
    %608 = vector.broadcast %cst_213 : f32 to vector<8x1xf32>
    %609 = arith.addf %605, %608 : vector<8x1xf32>
    %610 = math.rsqrt %609 : vector<8x1xf32>
    %611 = vector.broadcast %610 : vector<8x1xf32> to vector<8x32xf32>
    %612 = arith.mulf %607, %611 : vector<8x32xf32>
    %613 = vector.broadcast %593 : vector<1x32xf32> to vector<8x32xf32>
    %614 = arith.mulf %612, %613 : vector<8x32xf32>
    %615 = vector.broadcast %594 : vector<1x32xf32> to vector<8x32xf32>
    %616 = arith.addf %614, %615 : vector<8x32xf32>
    %c0_214 = arith.constant 0 : index
    %c1536_215 = arith.constant 1536 : index
    %617 = vector.load %arg7[%c0_214, %c1536_215] : memref<32x2432xf32, #tpu.memory_space<vmem>>, vector<32x96xf32>
    %cst_216 = arith.constant dense<0.000000e+00> : vector<8x96xf32>
    %618 = tpu.matmul %616, %617, %cst_216 {dimension_numbers = #tpu.dot_dimension_numbers<[1], [0], [0], [1], [0, 0, 1, 1], [], []>} : vector<8x32xf32>, vector<32x96xf32>, vector<8x96xf32> -> vector<8x96xf32>
    %c0_217 = arith.constant 0 : index
    %c3712 = arith.constant 3712 : index
    %619 = vector.load %arg9[%c0_217, %c3712] : memref<1x5504xf32, #tpu.memory_space<vmem>>, vector<1x96xf32>
    %620 = vector.broadcast %619 : vector<1x96xf32> to vector<8x96xf32>
    %621 = arith.addf %618, %620 : vector<8x96xf32>
    %622 = vector.extract_strided_slice %621 {offsets = [0, 0], sizes = [8, 32], strides = [1, 1]} : vector<8x96xf32> to vector<8x32xf32>
    %623 = vector.extract_strided_slice %621 {offsets = [0, 32], sizes = [8, 32], strides = [1, 1]} : vector<8x96xf32> to vector<8x32xf32>
    %624 = vector.extract_strided_slice %621 {offsets = [0, 64], sizes = [8, 32], strides = [1, 1]} : vector<8x96xf32> to vector<8x32xf32>
    %c0_218 = arith.constant 0 : index
    %c1664_219 = arith.constant 1664 : index
    %625 = vector.load %arg7[%c0_218, %c1664_219] : memref<32x2432xf32, #tpu.memory_space<vmem>>, vector<32x32xf32>
    %c0_220 = arith.constant 0 : index
    %c3840 = arith.constant 3840 : index
    %626 = vector.load %arg9[%c0_220, %c3840] : memref<1x5504xf32, #tpu.memory_space<vmem>>, vector<1x32xf32>
    %627 = vector.extract_strided_slice %622 {offsets = [0, 0], sizes = [8, 8], strides = [1, 1]} : vector<8x32xf32> to vector<8x8xf32>
    %628 = vector.extract_strided_slice %623 {offsets = [0, 0], sizes = [8, 8], strides = [1, 1]} : vector<8x32xf32> to vector<8x8xf32>
    %629 = vector.extract_strided_slice %624 {offsets = [0, 0], sizes = [8, 8], strides = [1, 1]} : vector<8x32xf32> to vector<8x8xf32>
    %cst_221 = arith.constant dense<0.000000e+00> : vector<8x8xf32>
    %630 = tpu.matmul %627, %628, %cst_221 {dimension_numbers = #tpu.dot_dimension_numbers<[1], [1], [0], [0], [0, 0, 1, 0], [], []>} : vector<8x8xf32>, vector<8x8xf32>, vector<8x8xf32> -> vector<8x8xf32>
    %cst_222 = arith.constant 0.353553385 : f32
    %631 = vector.broadcast %cst_222 : f32 to vector<8x8xf32>
    %632 = arith.mulf %630, %631 : vector<8x8xf32>
    %633 = arith.addf %632, %332 : vector<8x8xf32>
    %cst_223 = arith.constant dense<0xFF800000> : vector<8xf32>
    %634 = vector.multi_reduction <maximumf>, %633, %cst_223 [1] : vector<8x8xf32> to vector<8xf32>
    %635 = vector.shape_cast %634 : vector<8xf32> to vector<8x1xf32>
    %636 = vector.broadcast %635 : vector<8x1xf32> to vector<8x8xf32>
    %637 = arith.subf %633, %636 : vector<8x8xf32>
    %638 = math.exp %637 : vector<8x8xf32>
    %cst_224 = arith.constant dense<0.000000e+00> : vector<8xf32>
    %639 = vector.multi_reduction <add>, %638, %cst_224 [1] : vector<8x8xf32> to vector<8xf32>
    %640 = vector.shape_cast %639 : vector<8xf32> to vector<8x1xf32>
    %641 = tpu.reciprocal %640 {approx = true} : vector<8x1xf32> -> vector<8x1xf32>
    %642 = vector.broadcast %641 : vector<8x1xf32> to vector<8x8xf32>
    %643 = arith.mulf %638, %642 : vector<8x8xf32>
    %cst_225 = arith.constant dense<0.000000e+00> : vector<8x8xf32>
    %644 = tpu.matmul %643, %629, %cst_225 {dimension_numbers = #tpu.dot_dimension_numbers<[1], [0], [0], [1], [0, 0, 1, 1], [], []>} : vector<8x8xf32>, vector<8x8xf32>, vector<8x8xf32> -> vector<8x8xf32>
    %645 = vector.extract_strided_slice %622 {offsets = [0, 8], sizes = [8, 8], strides = [1, 1]} : vector<8x32xf32> to vector<8x8xf32>
    %646 = vector.extract_strided_slice %623 {offsets = [0, 8], sizes = [8, 8], strides = [1, 1]} : vector<8x32xf32> to vector<8x8xf32>
    %647 = vector.extract_strided_slice %624 {offsets = [0, 8], sizes = [8, 8], strides = [1, 1]} : vector<8x32xf32> to vector<8x8xf32>
    %cst_226 = arith.constant dense<0.000000e+00> : vector<8x8xf32>
    %648 = tpu.matmul %645, %646, %cst_226 {dimension_numbers = #tpu.dot_dimension_numbers<[1], [1], [0], [0], [0, 0, 1, 0], [], []>} : vector<8x8xf32>, vector<8x8xf32>, vector<8x8xf32> -> vector<8x8xf32>
    %cst_227 = arith.constant 0.353553385 : f32
    %649 = vector.broadcast %cst_227 : f32 to vector<8x8xf32>
    %650 = arith.mulf %648, %649 : vector<8x8xf32>
    %651 = arith.addf %650, %332 : vector<8x8xf32>
    %cst_228 = arith.constant dense<0xFF800000> : vector<8xf32>
    %652 = vector.multi_reduction <maximumf>, %651, %cst_228 [1] : vector<8x8xf32> to vector<8xf32>
    %653 = vector.shape_cast %652 : vector<8xf32> to vector<8x1xf32>
    %654 = vector.broadcast %653 : vector<8x1xf32> to vector<8x8xf32>
    %655 = arith.subf %651, %654 : vector<8x8xf32>
    %656 = math.exp %655 : vector<8x8xf32>
    %cst_229 = arith.constant dense<0.000000e+00> : vector<8xf32>
    %657 = vector.multi_reduction <add>, %656, %cst_229 [1] : vector<8x8xf32> to vector<8xf32>
    %658 = vector.shape_cast %657 : vector<8xf32> to vector<8x1xf32>
    %659 = tpu.reciprocal %658 {approx = true} : vector<8x1xf32> -> vector<8x1xf32>
    %660 = vector.broadcast %659 : vector<8x1xf32> to vector<8x8xf32>
    %661 = arith.mulf %656, %660 : vector<8x8xf32>
    %cst_230 = arith.constant dense<0.000000e+00> : vector<8x8xf32>
    %662 = tpu.matmul %661, %647, %cst_230 {dimension_numbers = #tpu.dot_dimension_numbers<[1], [0], [0], [1], [0, 0, 1, 1], [], []>} : vector<8x8xf32>, vector<8x8xf32>, vector<8x8xf32> -> vector<8x8xf32>
    %663 = vector.extract_strided_slice %622 {offsets = [0, 16], sizes = [8, 8], strides = [1, 1]} : vector<8x32xf32> to vector<8x8xf32>
    %664 = vector.extract_strided_slice %623 {offsets = [0, 16], sizes = [8, 8], strides = [1, 1]} : vector<8x32xf32> to vector<8x8xf32>
    %665 = vector.extract_strided_slice %624 {offsets = [0, 16], sizes = [8, 8], strides = [1, 1]} : vector<8x32xf32> to vector<8x8xf32>
    %cst_231 = arith.constant dense<0.000000e+00> : vector<8x8xf32>
    %666 = tpu.matmul %663, %664, %cst_231 {dimension_numbers = #tpu.dot_dimension_numbers<[1], [1], [0], [0], [0, 0, 1, 0], [], []>} : vector<8x8xf32>, vector<8x8xf32>, vector<8x8xf32> -> vector<8x8xf32>
    %cst_232 = arith.constant 0.353553385 : f32
    %667 = vector.broadcast %cst_232 : f32 to vector<8x8xf32>
    %668 = arith.mulf %666, %667 : vector<8x8xf32>
    %669 = arith.addf %668, %332 : vector<8x8xf32>
    %cst_233 = arith.constant dense<0xFF800000> : vector<8xf32>
    %670 = vector.multi_reduction <maximumf>, %669, %cst_233 [1] : vector<8x8xf32> to vector<8xf32>
    %671 = vector.shape_cast %670 : vector<8xf32> to vector<8x1xf32>
    %672 = vector.broadcast %671 : vector<8x1xf32> to vector<8x8xf32>
    %673 = arith.subf %669, %672 : vector<8x8xf32>
    %674 = math.exp %673 : vector<8x8xf32>
    %cst_234 = arith.constant dense<0.000000e+00> : vector<8xf32>
    %675 = vector.multi_reduction <add>, %674, %cst_234 [1] : vector<8x8xf32> to vector<8xf32>
    %676 = vector.shape_cast %675 : vector<8xf32> to vector<8x1xf32>
    %677 = tpu.reciprocal %676 {approx = true} : vector<8x1xf32> -> vector<8x1xf32>
    %678 = vector.broadcast %677 : vector<8x1xf32> to vector<8x8xf32>
    %679 = arith.mulf %674, %678 : vector<8x8xf32>
    %cst_235 = arith.constant dense<0.000000e+00> : vector<8x8xf32>
    %680 = tpu.matmul %679, %665, %cst_235 {dimension_numbers = #tpu.dot_dimension_numbers<[1], [0], [0], [1], [0, 0, 1, 1], [], []>} : vector<8x8xf32>, vector<8x8xf32>, vector<8x8xf32> -> vector<8x8xf32>
    %681 = vector.extract_strided_slice %622 {offsets = [0, 24], sizes = [8, 8], strides = [1, 1]} : vector<8x32xf32> to vector<8x8xf32>
    %682 = vector.extract_strided_slice %623 {offsets = [0, 24], sizes = [8, 8], strides = [1, 1]} : vector<8x32xf32> to vector<8x8xf32>
    %683 = vector.extract_strided_slice %624 {offsets = [0, 24], sizes = [8, 8], strides = [1, 1]} : vector<8x32xf32> to vector<8x8xf32>
    %cst_236 = arith.constant dense<0.000000e+00> : vector<8x8xf32>
    %684 = tpu.matmul %681, %682, %cst_236 {dimension_numbers = #tpu.dot_dimension_numbers<[1], [1], [0], [0], [0, 0, 1, 0], [], []>} : vector<8x8xf32>, vector<8x8xf32>, vector<8x8xf32> -> vector<8x8xf32>
    %cst_237 = arith.constant 0.353553385 : f32
    %685 = vector.broadcast %cst_237 : f32 to vector<8x8xf32>
    %686 = arith.mulf %684, %685 : vector<8x8xf32>
    %687 = arith.addf %686, %332 : vector<8x8xf32>
    %cst_238 = arith.constant dense<0xFF800000> : vector<8xf32>
    %688 = vector.multi_reduction <maximumf>, %687, %cst_238 [1] : vector<8x8xf32> to vector<8xf32>
    %689 = vector.shape_cast %688 : vector<8xf32> to vector<8x1xf32>
    %690 = vector.broadcast %689 : vector<8x1xf32> to vector<8x8xf32>
    %691 = arith.subf %687, %690 : vector<8x8xf32>
    %692 = math.exp %691 : vector<8x8xf32>
    %cst_239 = arith.constant dense<0.000000e+00> : vector<8xf32>
    %693 = vector.multi_reduction <add>, %692, %cst_239 [1] : vector<8x8xf32> to vector<8xf32>
    %694 = vector.shape_cast %693 : vector<8xf32> to vector<8x1xf32>
    %695 = tpu.reciprocal %694 {approx = true} : vector<8x1xf32> -> vector<8x1xf32>
    %696 = vector.broadcast %695 : vector<8x1xf32> to vector<8x8xf32>
    %697 = arith.mulf %692, %696 : vector<8x8xf32>
    %cst_240 = arith.constant dense<0.000000e+00> : vector<8x8xf32>
    %698 = tpu.matmul %697, %683, %cst_240 {dimension_numbers = #tpu.dot_dimension_numbers<[1], [0], [0], [1], [0, 0, 1, 1], [], []>} : vector<8x8xf32>, vector<8x8xf32>, vector<8x8xf32> -> vector<8x8xf32>
    %699 = tpu.concatenate %644, %662, %680, %698 in 1 : vector<8x8xf32>, vector<8x8xf32>, vector<8x8xf32>, vector<8x8xf32> -> vector<8x32xf32>
    %cst_241 = arith.constant dense<0.000000e+00> : vector<8x32xf32>
    %700 = tpu.matmul %699, %625, %cst_241 {dimension_numbers = #tpu.dot_dimension_numbers<[1], [0], [0], [1], [0, 0, 1, 1], [], []>} : vector<8x32xf32>, vector<32x32xf32>, vector<8x32xf32> -> vector<8x32xf32>
    %701 = vector.broadcast %626 : vector<1x32xf32> to vector<8x32xf32>
    %702 = arith.addf %700, %701 : vector<8x32xf32>
    %703 = arith.addf %616, %702 : vector<8x32xf32>
    %c0_242 = arith.constant 0 : index
    %c3968 = arith.constant 3968 : index
    %704 = vector.load %arg9[%c0_242, %c3968] : memref<1x5504xf32, #tpu.memory_space<vmem>>, vector<1x32xf32>
    %c0_243 = arith.constant 0 : index
    %c4096 = arith.constant 4096 : index
    %705 = vector.load %arg9[%c0_243, %c4096] : memref<1x5504xf32, #tpu.memory_space<vmem>>, vector<1x32xf32>
    %cst_244 = arith.constant dense<0.000000e+00> : vector<8xf32>
    %706 = vector.multi_reduction <add>, %703, %cst_244 [1] : vector<8x32xf32> to vector<8xf32>
    %707 = vector.shape_cast %706 : vector<8xf32> to vector<8x1xf32>
    %cst_245 = arith.constant 3.200000e+01 : f32
    %708 = vector.broadcast %cst_245 : f32 to vector<8x1xf32>
    %709 = arith.divf %707, %708 : vector<8x1xf32>
    %710 = vector.broadcast %709 : vector<8x1xf32> to vector<8x32xf32>
    %711 = arith.subf %703, %710 : vector<8x32xf32>
    %712 = arith.mulf %711, %711 : vector<8x32xf32>
    %cst_246 = arith.constant dense<0.000000e+00> : vector<8xf32>
    %713 = vector.multi_reduction <add>, %712, %cst_246 [1] : vector<8x32xf32> to vector<8xf32>
    %714 = vector.shape_cast %713 : vector<8xf32> to vector<8x1xf32>
    %cst_247 = arith.constant 3.200000e+01 : f32
    %715 = vector.broadcast %cst_247 : f32 to vector<8x1xf32>
    %716 = arith.divf %714, %715 : vector<8x1xf32>
    %717 = vector.broadcast %709 : vector<8x1xf32> to vector<8x32xf32>
    %718 = arith.subf %703, %717 : vector<8x32xf32>
    %cst_248 = arith.constant 9.99999974E-6 : f32
    %719 = vector.broadcast %cst_248 : f32 to vector<8x1xf32>
    %720 = arith.addf %716, %719 : vector<8x1xf32>
    %721 = math.rsqrt %720 : vector<8x1xf32>
    %722 = vector.broadcast %721 : vector<8x1xf32> to vector<8x32xf32>
    %723 = arith.mulf %718, %722 : vector<8x32xf32>
    %724 = vector.broadcast %704 : vector<1x32xf32> to vector<8x32xf32>
    %725 = arith.mulf %723, %724 : vector<8x32xf32>
    %726 = vector.broadcast %705 : vector<1x32xf32> to vector<8x32xf32>
    %727 = arith.addf %725, %726 : vector<8x32xf32>
    %c0_249 = arith.constant 0 : index
    %c1792_250 = arith.constant 1792 : index
    %728 = vector.load %arg7[%c0_249, %c1792_250] : memref<32x2432xf32, #tpu.memory_space<vmem>>, vector<32x32xf32>
    %cst_251 = arith.constant dense<0.000000e+00> : vector<8x32xf32>
    %729 = tpu.matmul %727, %728, %cst_251 {dimension_numbers = #tpu.dot_dimension_numbers<[1], [0], [0], [1], [0, 0, 1, 1], [], []>} : vector<8x32xf32>, vector<32x32xf32>, vector<8x32xf32> -> vector<8x32xf32>
    %c0_252 = arith.constant 0 : index
    %c4224 = arith.constant 4224 : index
    %730 = vector.load %arg9[%c0_252, %c4224] : memref<1x5504xf32, #tpu.memory_space<vmem>>, vector<1x32xf32>
    %731 = vector.broadcast %730 : vector<1x32xf32> to vector<8x32xf32>
    %732 = arith.addf %729, %731 : vector<8x32xf32>
    %c0_253 = arith.constant 0 : index
    %c1920_254 = arith.constant 1920 : index
    %733 = vector.load %arg7[%c0_253, %c1920_254] : memref<32x2432xf32, #tpu.memory_space<vmem>>, vector<32x64xf32>
    %cst_255 = arith.constant dense<0.000000e+00> : vector<8x64xf32>
    %734 = tpu.matmul %326, %733, %cst_255 {dimension_numbers = #tpu.dot_dimension_numbers<[1], [0], [0], [1], [0, 0, 1, 1], [], []>} : vector<8x32xf32>, vector<32x64xf32>, vector<8x64xf32> -> vector<8x64xf32>
    %c0_256 = arith.constant 0 : index
    %c4352 = arith.constant 4352 : index
    %735 = vector.load %arg9[%c0_256, %c4352] : memref<1x5504xf32, #tpu.memory_space<vmem>>, vector<1x64xf32>
    %736 = vector.broadcast %735 : vector<1x64xf32> to vector<8x64xf32>
    %737 = arith.addf %734, %736 : vector<8x64xf32>
    %738 = vector.extract_strided_slice %737 {offsets = [0, 0], sizes = [8, 32], strides = [1, 1]} : vector<8x64xf32> to vector<8x32xf32>
    %739 = vector.extract_strided_slice %737 {offsets = [0, 32], sizes = [8, 32], strides = [1, 1]} : vector<8x64xf32> to vector<8x32xf32>
    %c0_257 = arith.constant 0 : index
    %c2048_258 = arith.constant 2048 : index
    %740 = vector.load %arg7[%c0_257, %c2048_258] : memref<32x2432xf32, #tpu.memory_space<vmem>>, vector<32x32xf32>
    %c0_259 = arith.constant 0 : index
    %c4480 = arith.constant 4480 : index
    %741 = vector.load %arg9[%c0_259, %c4480] : memref<1x5504xf32, #tpu.memory_space<vmem>>, vector<1x32xf32>
    %742 = vector.extract_strided_slice %732 {offsets = [0, 0], sizes = [8, 8], strides = [1, 1]} : vector<8x32xf32> to vector<8x8xf32>
    %743 = vector.extract_strided_slice %738 {offsets = [0, 0], sizes = [8, 8], strides = [1, 1]} : vector<8x32xf32> to vector<8x8xf32>
    %744 = vector.extract_strided_slice %739 {offsets = [0, 0], sizes = [8, 8], strides = [1, 1]} : vector<8x32xf32> to vector<8x8xf32>
    %cst_260 = arith.constant dense<0.000000e+00> : vector<8x8xf32>
    %745 = tpu.matmul %742, %743, %cst_260 {dimension_numbers = #tpu.dot_dimension_numbers<[1], [1], [0], [0], [0, 0, 1, 0], [], []>} : vector<8x8xf32>, vector<8x8xf32>, vector<8x8xf32> -> vector<8x8xf32>
    %cst_261 = arith.constant 0.353553385 : f32
    %746 = vector.broadcast %cst_261 : f32 to vector<8x8xf32>
    %747 = arith.mulf %745, %746 : vector<8x8xf32>
    %748 = vector.broadcast %1 : vector<1x8xf32> to vector<8x8xf32>
    %749 = arith.addf %747, %748 : vector<8x8xf32>
    %cst_262 = arith.constant dense<0xFF800000> : vector<8xf32>
    %750 = vector.multi_reduction <maximumf>, %749, %cst_262 [1] : vector<8x8xf32> to vector<8xf32>
    %751 = vector.shape_cast %750 : vector<8xf32> to vector<8x1xf32>
    %752 = vector.broadcast %751 : vector<8x1xf32> to vector<8x8xf32>
    %753 = arith.subf %749, %752 : vector<8x8xf32>
    %754 = math.exp %753 : vector<8x8xf32>
    %cst_263 = arith.constant dense<0.000000e+00> : vector<8xf32>
    %755 = vector.multi_reduction <add>, %754, %cst_263 [1] : vector<8x8xf32> to vector<8xf32>
    %756 = vector.shape_cast %755 : vector<8xf32> to vector<8x1xf32>
    %757 = tpu.reciprocal %756 {approx = true} : vector<8x1xf32> -> vector<8x1xf32>
    %758 = vector.broadcast %757 : vector<8x1xf32> to vector<8x8xf32>
    %759 = arith.mulf %754, %758 : vector<8x8xf32>
    %cst_264 = arith.constant dense<0.000000e+00> : vector<8x8xf32>
    %760 = tpu.matmul %759, %744, %cst_264 {dimension_numbers = #tpu.dot_dimension_numbers<[1], [0], [0], [1], [0, 0, 1, 1], [], []>} : vector<8x8xf32>, vector<8x8xf32>, vector<8x8xf32> -> vector<8x8xf32>
    %761 = vector.extract_strided_slice %732 {offsets = [0, 8], sizes = [8, 8], strides = [1, 1]} : vector<8x32xf32> to vector<8x8xf32>
    %762 = vector.extract_strided_slice %738 {offsets = [0, 8], sizes = [8, 8], strides = [1, 1]} : vector<8x32xf32> to vector<8x8xf32>
    %763 = vector.extract_strided_slice %739 {offsets = [0, 8], sizes = [8, 8], strides = [1, 1]} : vector<8x32xf32> to vector<8x8xf32>
    %cst_265 = arith.constant dense<0.000000e+00> : vector<8x8xf32>
    %764 = tpu.matmul %761, %762, %cst_265 {dimension_numbers = #tpu.dot_dimension_numbers<[1], [1], [0], [0], [0, 0, 1, 0], [], []>} : vector<8x8xf32>, vector<8x8xf32>, vector<8x8xf32> -> vector<8x8xf32>
    %cst_266 = arith.constant 0.353553385 : f32
    %765 = vector.broadcast %cst_266 : f32 to vector<8x8xf32>
    %766 = arith.mulf %764, %765 : vector<8x8xf32>
    %767 = vector.broadcast %1 : vector<1x8xf32> to vector<8x8xf32>
    %768 = arith.addf %766, %767 : vector<8x8xf32>
    %cst_267 = arith.constant dense<0xFF800000> : vector<8xf32>
    %769 = vector.multi_reduction <maximumf>, %768, %cst_267 [1] : vector<8x8xf32> to vector<8xf32>
    %770 = vector.shape_cast %769 : vector<8xf32> to vector<8x1xf32>
    %771 = vector.broadcast %770 : vector<8x1xf32> to vector<8x8xf32>
    %772 = arith.subf %768, %771 : vector<8x8xf32>
    %773 = math.exp %772 : vector<8x8xf32>
    %cst_268 = arith.constant dense<0.000000e+00> : vector<8xf32>
    %774 = vector.multi_reduction <add>, %773, %cst_268 [1] : vector<8x8xf32> to vector<8xf32>
    %775 = vector.shape_cast %774 : vector<8xf32> to vector<8x1xf32>
    %776 = tpu.reciprocal %775 {approx = true} : vector<8x1xf32> -> vector<8x1xf32>
    %777 = vector.broadcast %776 : vector<8x1xf32> to vector<8x8xf32>
    %778 = arith.mulf %773, %777 : vector<8x8xf32>
    %cst_269 = arith.constant dense<0.000000e+00> : vector<8x8xf32>
    %779 = tpu.matmul %778, %763, %cst_269 {dimension_numbers = #tpu.dot_dimension_numbers<[1], [0], [0], [1], [0, 0, 1, 1], [], []>} : vector<8x8xf32>, vector<8x8xf32>, vector<8x8xf32> -> vector<8x8xf32>
    %780 = vector.extract_strided_slice %732 {offsets = [0, 16], sizes = [8, 8], strides = [1, 1]} : vector<8x32xf32> to vector<8x8xf32>
    %781 = vector.extract_strided_slice %738 {offsets = [0, 16], sizes = [8, 8], strides = [1, 1]} : vector<8x32xf32> to vector<8x8xf32>
    %782 = vector.extract_strided_slice %739 {offsets = [0, 16], sizes = [8, 8], strides = [1, 1]} : vector<8x32xf32> to vector<8x8xf32>
    %cst_270 = arith.constant dense<0.000000e+00> : vector<8x8xf32>
    %783 = tpu.matmul %780, %781, %cst_270 {dimension_numbers = #tpu.dot_dimension_numbers<[1], [1], [0], [0], [0, 0, 1, 0], [], []>} : vector<8x8xf32>, vector<8x8xf32>, vector<8x8xf32> -> vector<8x8xf32>
    %cst_271 = arith.constant 0.353553385 : f32
    %784 = vector.broadcast %cst_271 : f32 to vector<8x8xf32>
    %785 = arith.mulf %783, %784 : vector<8x8xf32>
    %786 = vector.broadcast %1 : vector<1x8xf32> to vector<8x8xf32>
    %787 = arith.addf %785, %786 : vector<8x8xf32>
    %cst_272 = arith.constant dense<0xFF800000> : vector<8xf32>
    %788 = vector.multi_reduction <maximumf>, %787, %cst_272 [1] : vector<8x8xf32> to vector<8xf32>
    %789 = vector.shape_cast %788 : vector<8xf32> to vector<8x1xf32>
    %790 = vector.broadcast %789 : vector<8x1xf32> to vector<8x8xf32>
    %791 = arith.subf %787, %790 : vector<8x8xf32>
    %792 = math.exp %791 : vector<8x8xf32>
    %cst_273 = arith.constant dense<0.000000e+00> : vector<8xf32>
    %793 = vector.multi_reduction <add>, %792, %cst_273 [1] : vector<8x8xf32> to vector<8xf32>
    %794 = vector.shape_cast %793 : vector<8xf32> to vector<8x1xf32>
    %795 = tpu.reciprocal %794 {approx = true} : vector<8x1xf32> -> vector<8x1xf32>
    %796 = vector.broadcast %795 : vector<8x1xf32> to vector<8x8xf32>
    %797 = arith.mulf %792, %796 : vector<8x8xf32>
    %cst_274 = arith.constant dense<0.000000e+00> : vector<8x8xf32>
    %798 = tpu.matmul %797, %782, %cst_274 {dimension_numbers = #tpu.dot_dimension_numbers<[1], [0], [0], [1], [0, 0, 1, 1], [], []>} : vector<8x8xf32>, vector<8x8xf32>, vector<8x8xf32> -> vector<8x8xf32>
    %799 = vector.extract_strided_slice %732 {offsets = [0, 24], sizes = [8, 8], strides = [1, 1]} : vector<8x32xf32> to vector<8x8xf32>
    %800 = vector.extract_strided_slice %738 {offsets = [0, 24], sizes = [8, 8], strides = [1, 1]} : vector<8x32xf32> to vector<8x8xf32>
    %801 = vector.extract_strided_slice %739 {offsets = [0, 24], sizes = [8, 8], strides = [1, 1]} : vector<8x32xf32> to vector<8x8xf32>
    %cst_275 = arith.constant dense<0.000000e+00> : vector<8x8xf32>
    %802 = tpu.matmul %799, %800, %cst_275 {dimension_numbers = #tpu.dot_dimension_numbers<[1], [1], [0], [0], [0, 0, 1, 0], [], []>} : vector<8x8xf32>, vector<8x8xf32>, vector<8x8xf32> -> vector<8x8xf32>
    %cst_276 = arith.constant 0.353553385 : f32
    %803 = vector.broadcast %cst_276 : f32 to vector<8x8xf32>
    %804 = arith.mulf %802, %803 : vector<8x8xf32>
    %805 = vector.broadcast %1 : vector<1x8xf32> to vector<8x8xf32>
    %806 = arith.addf %804, %805 : vector<8x8xf32>
    %cst_277 = arith.constant dense<0xFF800000> : vector<8xf32>
    %807 = vector.multi_reduction <maximumf>, %806, %cst_277 [1] : vector<8x8xf32> to vector<8xf32>
    %808 = vector.shape_cast %807 : vector<8xf32> to vector<8x1xf32>
    %809 = vector.broadcast %808 : vector<8x1xf32> to vector<8x8xf32>
    %810 = arith.subf %806, %809 : vector<8x8xf32>
    %811 = math.exp %810 : vector<8x8xf32>
    %cst_278 = arith.constant dense<0.000000e+00> : vector<8xf32>
    %812 = vector.multi_reduction <add>, %811, %cst_278 [1] : vector<8x8xf32> to vector<8xf32>
    %813 = vector.shape_cast %812 : vector<8xf32> to vector<8x1xf32>
    %814 = tpu.reciprocal %813 {approx = true} : vector<8x1xf32> -> vector<8x1xf32>
    %815 = vector.broadcast %814 : vector<8x1xf32> to vector<8x8xf32>
    %816 = arith.mulf %811, %815 : vector<8x8xf32>
    %cst_279 = arith.constant dense<0.000000e+00> : vector<8x8xf32>
    %817 = tpu.matmul %816, %801, %cst_279 {dimension_numbers = #tpu.dot_dimension_numbers<[1], [0], [0], [1], [0, 0, 1, 1], [], []>} : vector<8x8xf32>, vector<8x8xf32>, vector<8x8xf32> -> vector<8x8xf32>
    %818 = tpu.concatenate %760, %779, %798, %817 in 1 : vector<8x8xf32>, vector<8x8xf32>, vector<8x8xf32>, vector<8x8xf32> -> vector<8x32xf32>
    %cst_280 = arith.constant dense<0.000000e+00> : vector<8x32xf32>
    %819 = tpu.matmul %818, %740, %cst_280 {dimension_numbers = #tpu.dot_dimension_numbers<[1], [0], [0], [1], [0, 0, 1, 1], [], []>} : vector<8x32xf32>, vector<32x32xf32>, vector<8x32xf32> -> vector<8x32xf32>
    %820 = vector.broadcast %741 : vector<1x32xf32> to vector<8x32xf32>
    %821 = arith.addf %819, %820 : vector<8x32xf32>
    %822 = arith.addf %727, %821 : vector<8x32xf32>
    %c0_281 = arith.constant 0 : index
    %c4608 = arith.constant 4608 : index
    %823 = vector.load %arg9[%c0_281, %c4608] : memref<1x5504xf32, #tpu.memory_space<vmem>>, vector<1x32xf32>
    %c0_282 = arith.constant 0 : index
    %c4736 = arith.constant 4736 : index
    %824 = vector.load %arg9[%c0_282, %c4736] : memref<1x5504xf32, #tpu.memory_space<vmem>>, vector<1x32xf32>
    %cst_283 = arith.constant dense<0.000000e+00> : vector<8xf32>
    %825 = vector.multi_reduction <add>, %822, %cst_283 [1] : vector<8x32xf32> to vector<8xf32>
    %826 = vector.shape_cast %825 : vector<8xf32> to vector<8x1xf32>
    %cst_284 = arith.constant 3.200000e+01 : f32
    %827 = vector.broadcast %cst_284 : f32 to vector<8x1xf32>
    %828 = arith.divf %826, %827 : vector<8x1xf32>
    %829 = vector.broadcast %828 : vector<8x1xf32> to vector<8x32xf32>
    %830 = arith.subf %822, %829 : vector<8x32xf32>
    %831 = arith.mulf %830, %830 : vector<8x32xf32>
    %cst_285 = arith.constant dense<0.000000e+00> : vector<8xf32>
    %832 = vector.multi_reduction <add>, %831, %cst_285 [1] : vector<8x32xf32> to vector<8xf32>
    %833 = vector.shape_cast %832 : vector<8xf32> to vector<8x1xf32>
    %cst_286 = arith.constant 3.200000e+01 : f32
    %834 = vector.broadcast %cst_286 : f32 to vector<8x1xf32>
    %835 = arith.divf %833, %834 : vector<8x1xf32>
    %836 = vector.broadcast %828 : vector<8x1xf32> to vector<8x32xf32>
    %837 = arith.subf %822, %836 : vector<8x32xf32>
    %cst_287 = arith.constant 9.99999974E-6 : f32
    %838 = vector.broadcast %cst_287 : f32 to vector<8x1xf32>
    %839 = arith.addf %835, %838 : vector<8x1xf32>
    %840 = math.rsqrt %839 : vector<8x1xf32>
    %841 = vector.broadcast %840 : vector<8x1xf32> to vector<8x32xf32>
    %842 = arith.mulf %837, %841 : vector<8x32xf32>
    %843 = vector.broadcast %823 : vector<1x32xf32> to vector<8x32xf32>
    %844 = arith.mulf %842, %843 : vector<8x32xf32>
    %845 = vector.broadcast %824 : vector<1x32xf32> to vector<8x32xf32>
    %846 = arith.addf %844, %845 : vector<8x32xf32>
    %c0_288 = arith.constant 0 : index
    %c2176_289 = arith.constant 2176 : index
    %847 = vector.load %arg7[%c0_288, %c2176_289] : memref<32x2432xf32, #tpu.memory_space<vmem>>, vector<32x64xf32>
    %c0_290 = arith.constant 0 : index
    %c4864 = arith.constant 4864 : index
    %848 = vector.load %arg9[%c0_290, %c4864] : memref<1x5504xf32, #tpu.memory_space<vmem>>, vector<1x64xf32>
    %c0_291 = arith.constant 0 : index
    %c384_292 = arith.constant 384 : index
    %849 = vector.load %arg8[%c0_291, %c384_292] : memref<64x512xf32, #tpu.memory_space<vmem>>, vector<64x32xf32>
    %c0_293 = arith.constant 0 : index
    %c4992 = arith.constant 4992 : index
    %850 = vector.load %arg9[%c0_293, %c4992] : memref<1x5504xf32, #tpu.memory_space<vmem>>, vector<1x32xf32>
    %cst_294 = arith.constant dense<0.000000e+00> : vector<8x64xf32>
    %851 = tpu.matmul %846, %847, %cst_294 {dimension_numbers = #tpu.dot_dimension_numbers<[1], [0], [0], [1], [0, 0, 1, 1], [], []>} : vector<8x32xf32>, vector<32x64xf32>, vector<8x64xf32> -> vector<8x64xf32>
    %852 = vector.broadcast %848 : vector<1x64xf32> to vector<8x64xf32>
    %853 = arith.addf %851, %852 : vector<8x64xf32>
    %854 = arith.negf %853 : vector<8x64xf32>
    %855 = math.exp %854 : vector<8x64xf32>
    %cst_295 = arith.constant 1.000000e+00 : f32
    %856 = vector.broadcast %cst_295 : f32 to vector<8x64xf32>
    %857 = arith.addf %856, %855 : vector<8x64xf32>
    %858 = arith.divf %856, %857 : vector<8x64xf32>
    %859 = arith.mulf %853, %858 : vector<8x64xf32>
    %cst_296 = arith.constant dense<0.000000e+00> : vector<8x32xf32>
    %860 = tpu.matmul %859, %849, %cst_296 {dimension_numbers = #tpu.dot_dimension_numbers<[1], [0], [0], [1], [0, 0, 1, 1], [], []>} : vector<8x64xf32>, vector<64x32xf32>, vector<8x32xf32> -> vector<8x32xf32>
    %861 = vector.broadcast %850 : vector<1x32xf32> to vector<8x32xf32>
    %862 = arith.addf %860, %861 : vector<8x32xf32>
    %863 = arith.addf %846, %862 : vector<8x32xf32>
    %c0_297 = arith.constant 0 : index
    %c5120 = arith.constant 5120 : index
    %864 = vector.load %arg9[%c0_297, %c5120] : memref<1x5504xf32, #tpu.memory_space<vmem>>, vector<1x32xf32>
    %c0_298 = arith.constant 0 : index
    %c5248 = arith.constant 5248 : index
    %865 = vector.load %arg9[%c0_298, %c5248] : memref<1x5504xf32, #tpu.memory_space<vmem>>, vector<1x32xf32>
    %cst_299 = arith.constant dense<0.000000e+00> : vector<8xf32>
    %866 = vector.multi_reduction <add>, %863, %cst_299 [1] : vector<8x32xf32> to vector<8xf32>
    %867 = vector.shape_cast %866 : vector<8xf32> to vector<8x1xf32>
    %cst_300 = arith.constant 3.200000e+01 : f32
    %868 = vector.broadcast %cst_300 : f32 to vector<8x1xf32>
    %869 = arith.divf %867, %868 : vector<8x1xf32>
    %870 = vector.broadcast %869 : vector<8x1xf32> to vector<8x32xf32>
    %871 = arith.subf %863, %870 : vector<8x32xf32>
    %872 = arith.mulf %871, %871 : vector<8x32xf32>
    %cst_301 = arith.constant dense<0.000000e+00> : vector<8xf32>
    %873 = vector.multi_reduction <add>, %872, %cst_301 [1] : vector<8x32xf32> to vector<8xf32>
    %874 = vector.shape_cast %873 : vector<8xf32> to vector<8x1xf32>
    %cst_302 = arith.constant 3.200000e+01 : f32
    %875 = vector.broadcast %cst_302 : f32 to vector<8x1xf32>
    %876 = arith.divf %874, %875 : vector<8x1xf32>
    %877 = vector.broadcast %869 : vector<8x1xf32> to vector<8x32xf32>
    %878 = arith.subf %863, %877 : vector<8x32xf32>
    %cst_303 = arith.constant 9.99999974E-6 : f32
    %879 = vector.broadcast %cst_303 : f32 to vector<8x1xf32>
    %880 = arith.addf %876, %879 : vector<8x1xf32>
    %881 = math.rsqrt %880 : vector<8x1xf32>
    %882 = vector.broadcast %881 : vector<8x1xf32> to vector<8x32xf32>
    %883 = arith.mulf %878, %882 : vector<8x32xf32>
    %884 = vector.broadcast %864 : vector<1x32xf32> to vector<8x32xf32>
    %885 = arith.mulf %883, %884 : vector<8x32xf32>
    %886 = vector.broadcast %865 : vector<1x32xf32> to vector<8x32xf32>
    %887 = arith.addf %885, %886 : vector<8x32xf32>
    %c0_304 = arith.constant 0 : index
    %c2304_305 = arith.constant 2304 : index
    %888 = vector.load %arg7[%c0_304, %c2304_305] : memref<32x2432xf32, #tpu.memory_space<vmem>>, vector<32x128xf32>
    %cst_306 = arith.constant dense<0.000000e+00> : vector<8x128xf32>
    %889 = tpu.matmul %887, %888, %cst_306 {dimension_numbers = #tpu.dot_dimension_numbers<[1], [0], [0], [1], [0, 0, 1, 1], [], []>} : vector<8x32xf32>, vector<32x128xf32>, vector<8x128xf32> -> vector<8x128xf32>
    %c0_307 = arith.constant 0 : index
    %c5376 = arith.constant 5376 : index
    %890 = vector.load %arg9[%c0_307, %c5376] : memref<1x5504xf32, #tpu.memory_space<vmem>>, vector<1x128xf32>
    %891 = vector.broadcast %890 : vector<1x128xf32> to vector<8x128xf32>
    %892 = arith.addf %889, %891 : vector<8x128xf32>
    %c0_308 = arith.constant 0 : index
    %c0_309 = arith.constant 0 : index
    %c0_310 = arith.constant 0 : index
    %893 = vector.load %arg10[%c0_308, %c0_309, %c0_310] : memref<1x8x128xf32, #tpu.memory_space<vmem>>, vector<1x8x128xf32>
    %894 = vector.shape_cast %893 : vector<1x8x128xf32> to vector<8x128xf32>
    %895 = vector.shape_cast %892 : vector<8x128xf32> to vector<1x8x128xf32>
    tpu.vector_store %arg10[%c0_308, %c0_309, %c0_310], %895 {strides = array<i32>} : memref<1x8x128xf32, #tpu.memory_space<vmem>>, vector<1x8x128xf32>,
    %cst_311 = arith.constant dense<0xFF800000> : vector<8xf32>
    %896 = vector.multi_reduction <maximumf>, %892, %cst_311 [1] : vector<8x128xf32> to vector<8xf32>
    %897 = vector.shape_cast %896 : vector<8xf32> to vector<8x1xf32>
    %898 = vector.broadcast %897 : vector<8x1xf32> to vector<8x128xf32>
    %899 = arith.subf %892, %898 : vector<8x128xf32>
    %900 = math.exp %899 : vector<8x128xf32>
    %cst_312 = arith.constant dense<0.000000e+00> : vector<8xf32>
    %901 = vector.multi_reduction <add>, %900, %cst_312 [1] : vector<8x128xf32> to vector<8xf32>
    %902 = vector.shape_cast %901 : vector<8xf32> to vector<8x1xf32>
    %903 = math.log %902 : vector<8x1xf32>
    %904 = arith.addf %897, %903 : vector<8x1xf32>
    %c0_313 = arith.constant 0 : index
    %c0_314 = arith.constant 0 : index
    %c0_315 = arith.constant 0 : index
    %905 = vector.load %arg3[%c0_313, %c0_314, %c0_315] : memref<1x8x1xi32, #tpu.memory_space<vmem>>, vector<1x8x1xi32>
    %906 = vector.shape_cast %905 : vector<1x8x1xi32> to vector<8x1xi32>
    %907 = tpu.iota {dimensions = array<i32: 1>} : vector<8x128xi32>
    %908 = vector.broadcast %906 : vector<8x1xi32> to vector<8x128xi32>
    %909 = arith.cmpi eq, %907, %908 : vector<8x128xi32>
    %910 = arith.extui %909 : vector<8x128xi1> to vector<8x128xi32>
    %911 = arith.sitofp %910 : vector<8x128xi32> to vector<8x128xf32>
    %912 = arith.mulf %892, %911 : vector<8x128xf32>
    %cst_316 = arith.constant dense<0.000000e+00> : vector<8xf32>
    %913 = vector.multi_reduction <add>, %912, %cst_316 [1] : vector<8x128xf32> to vector<8xf32>
    %914 = vector.shape_cast %913 : vector<8xf32> to vector<8x1xf32>
    %915 = arith.subf %904, %914 : vector<8x1xf32>
    %c0_i32 = arith.constant 0 : i32
    %916 = vector.broadcast %c0_i32 : i32 to vector<8x1xi32>
    %917 = arith.cmpi ne, %906, %916 : vector<8x1xi32>
    %918 = arith.extui %917 : vector<8x1xi1> to vector<8x1xi32>
    %919 = arith.sitofp %918 : vector<8x1xi32> to vector<8x1xf32>
    %920 = arith.mulf %915, %919 : vector<8x1xf32>
    %cst_317 = arith.constant dense<0.000000e+00> : vector<1xf32>
    %921 = vector.multi_reduction <add>, %920, %cst_317 [0] : vector<8x1xf32> to vector<1xf32>
    %922 = vector.shape_cast %921 : vector<1xf32> to vector<1x1xf32>
    %cst_318 = arith.constant dense<0.000000e+00> : vector<1xf32>
    %923 = vector.multi_reduction <add>, %919, %cst_318 [0] : vector<8x1xf32> to vector<1xf32>
    %924 = vector.shape_cast %923 : vector<1xf32> to vector<1x1xf32>
    %925 = tpu.iota {dimensions = array<i32: 1>} : vector<1x128xi32>
    %c0_i32_319 = arith.constant 0 : i32
    %926 = vector.broadcast %c0_i32_319 : i32 to vector<1x128xi32>
    %927 = arith.cmpi eq, %925, %926 : vector<1x128xi32>
    %c1_i32 = arith.constant 1 : i32
    %928 = vector.broadcast %c1_i32 : i32 to vector<1x128xi32>
    %929 = arith.cmpi eq, %925, %928 : vector<1x128xi32>
    %cst_320 = arith.constant 0.000000e+00 : f32
    %930 = vector.shape_cast %924 : vector<1x1xf32> to vector<1x1xf32>
    %931 = vector.broadcast %930 : vector<1x1xf32> to vector<1x128xf32>
    %932 = vector.broadcast %cst_320 : f32 to vector<1x128xf32>
    %933 = arith.select %929, %931, %932 : vector<1x128xi1>, vector<1x128xf32>
    %934 = vector.shape_cast %922 : vector<1x1xf32> to vector<1x1xf32>
    %935 = vector.broadcast %934 : vector<1x1xf32> to vector<1x128xf32>
    %936 = arith.select %927, %935, %933 : vector<1x128xi1>, vector<1x128xf32>
    %c0_321 = arith.constant 0 : index
    %c0_322 = arith.constant 0 : index
    %c0_323 = arith.constant 0 : index
    %937 = vector.load %arg11[%c0_321, %c0_322, %c0_323] : memref<1x1x128xf32, #tpu.memory_space<vmem>>, vector<1x1x128xf32>
    %938 = vector.shape_cast %937 : vector<1x1x128xf32> to vector<1x128xf32>
    %939 = vector.shape_cast %936 : vector<1x128xf32> to vector<1x1x128xf32>
    tpu.vector_store %arg11[%c0_321, %c0_322, %c0_323], %939 {strides = array<i32>} : memref<1x1x128xf32, #tpu.memory_space<vmem>>, vector<1x1x128xf32>,
    return
  }
  func.func @transform_0(%arg0: i32) -> (i32, i32, i32) {
    %c0_i32 = arith.constant 0 : i32
    %c0_i32_0 = arith.constant 0 : i32
    %c0_i32_1 = arith.constant 0 : i32
    return %arg0, %c0_i32, %c0_i32_0 : i32, i32, i32
  }
  func.func @transform_1(%arg0: i32) -> (i32, i32, i32) {
    %c0_i32 = arith.constant 0 : i32
    %c0_i32_0 = arith.constant 0 : i32
    %c0_i32_1 = arith.constant 0 : i32
    return %arg0, %c0_i32, %c0_i32_0 : i32, i32, i32
  }
  func.func @transform_2(%arg0: i32) -> (i32, i32, i32) {
    %c0_i32 = arith.constant 0 : i32
    %c0_i32_0 = arith.constant 0 : i32
    %c0_i32_1 = arith.constant 0 : i32
    return %arg0, %c0_i32, %c0_i32_0 : i32, i32, i32
  }
  func.func @transform_3(%arg0: i32) -> (i32, i32, i32) {
    %c0_i32 = arith.constant 0 : i32
    %c0_i32_0 = arith.constant 0 : i32
    %c0_i32_1 = arith.constant 0 : i32
    return %arg0, %c0_i32, %c0_i32_0 : i32, i32, i32
  }
  func.func @transform_4(%arg0: i32) -> (i32, i32) {
    %c0_i32 = arith.constant 0 : i32
    %c0_i32_0 = arith.constant 0 : i32
    %c0_i32_1 = arith.constant 0 : i32
    return %c0_i32, %c0_i32_0 : i32, i32
  }
  func.func @transform_5(%arg0: i32) -> (i32, i32) {
    %c0_i32 = arith.constant 0 : i32
    %c0_i32_0 = arith.constant 0 : i32
    %c0_i32_1 = arith.constant 0 : i32
    return %c0_i32, %c0_i32_0 : i32, i32
  }
  func.func @transform_6(%arg0: i32) -> (i32, i32) {
    %c0_i32 = arith.constant 0 : i32
    %c0_i32_0 = arith.constant 0 : i32
    %c0_i32_1 = arith.constant 0 : i32
    return %c0_i32, %c0_i32_0 : i32, i32
  }
  func.func @transform_7(%arg0: i32) -> (i32, i32) {
    %c0_i32 = arith.constant 0 : i32
    %c0_i32_0 = arith.constant 0 : i32
    %c0_i32_1 = arith.constant 0 : i32
    return %c0_i32, %c0_i32_0 : i32, i32
  }
  func.func @transform_8(%arg0: i32) -> (i32, i32) {
    %c0_i32 = arith.constant 0 : i32
    %c0_i32_0 = arith.constant 0 : i32
    %c0_i32_1 = arith.constant 0 : i32
    return %c0_i32, %c0_i32_0 : i32, i32
  }
  func.func @transform_9(%arg0: i32) -> (i32, i32, i32) {
    %c0_i32 = arith.constant 0 : i32
    %c0_i32_0 = arith.constant 0 : i32
    %c0_i32_1 = arith.constant 0 : i32
    return %arg0, %c0_i32, %c0_i32_0 : i32, i32, i32
  }
  func.func @transform_10(%arg0: i32) -> (i32, i32, i32) {
    %c0_i32 = arith.constant 0 : i32
    %c0_i32_0 = arith.constant 0 : i32
    %c0_i32_1 = arith.constant 0 : i32
    return %arg0, %c0_i32, %c0_i32_0 : i32, i32, i32
  }
}

</mosaic_0001>

<bundles_post_ra>
// kernel: marian_forward.1
= control target key start
LH: loop header
LB: loop body
LE: loop exit
PB: predicated region body
PF: predicated region fallthrough
CT: control target
= control target key end

     0   :  { %s9669_s0 = inlined_call_operand.vmem [shape: s32[2,8,1], index: 0, kind: input, shape index: {}]   ;;  %s9670_s1 = inlined_call_operand.vmem [shape: s32[2,8,1], index: 1, kind: input, shape index: {}]   ;;  %s9671_s2 = inlined_call_operand.vmem [shape: s32[2,8,1], index: 2, kind: input, shape index: {}]   ;;  %s9672_s3 = inlined_call_operand.vmem [shape: f32[2,1,8], index: 3, kind: input, shape index: {}]   ;;  %s9673_s4 = inlined_call_operand.vmem [shape: f32[64,32], index: 4, kind: input, shape index: {}]   ;;  %s9674_s5 = inlined_call_operand.vmem [shape: f32[64,32], index: 5, kind: input, shape index: {}]   ;;  %s9675_s6 = inlined_call_operand.hbm [shape: f32[32,2432], index: 6, kind: input, shape index: {}]   ;;  %s9676_s7 = inlined_call_operand.vmem [shape: f32[64,512], index: 7, kind: input, shape index: {}]   ;;  %s9677_s8 = inlined_call_operand.hbm [shape: f32[1,5504], index: 8, kind: input, shape index: {}]   ;;  %s9678_s9 = inlined_call_operand.hbm [shape: f32[2,8,128], index: 9, kind: output, shape index: {0}]   ;;  %s9679_s10 = inlined_call_operand.vmem [shape: f32[2,1,128], index: 10, kind: output, shape index: {1}]  }
   0x1   :  { %9715 = sst [smem:[#allocation17_spill]] %s9669_s0 }
   0x2   :  { %9716 = sst [smem:[#allocation18_spill]] %s9670_s1 }
   0x3   :  { %9717 = sst [smem:[#allocation19_spill]] %s9672_s3 }
   0x4   :  { %9718 = sst [smem:[#allocation20_spill]] %s9673_s4 }
   0x5   :  { %9719 = sst [smem:[#allocation21_spill]] %s9674_s5 }
   0x6   :  { %9720 = sst [smem:[#allocation22_spill]] %s9675_s6 }
   0x7   :  { %9721 = sst [smem:[#allocation23_spill]] %s9677_s8 }
   0x8   :  { %16 = vsyncpa [#allocation3], 0 }
   0x9   :  { %17 = vsyncpa [#allocation6], 0 }
   0xa   :  { %18 = vsyncpa [#allocation4], 0 }
   0xb   :  { %20 = vsyncpa [#allocation4 + $0x1], 0  ;;  %s8605_s13 = smov 0   ;;  %s8607_s14 = smov 0  }
   0xc   :  { %s8609_s15 = smov 0   ;;  %s8611_s16 = smov 0  }
   0xd LB: > { %9722 = sst [smem:[#allocation11_spill]] %s8513_s13  ;;  %s8626_s17 = sadd.s32 4294967295, %s8525_s16   ;;  %s8525_s16 = sphi %s8611_s16, %s9760_s16   ;;  %s8521_s15 = sphi %s8609_s15, %s9762_s15   ;;  %s8517_s14 = sphi %s8607_s14, %s9764_s14   ;;  %s8513_s13 = sphi %s8605_s13, %s9763_s13  }
   0xe   : > { %9723 = sst [smem:[#allocation12_spill]] %s8521_s15  ;;  %s7204_s18 = sadd.s32 4294967294, %s8525_s16  }
   0xf   : > { %9724 = sst [smem:[#allocation13_spill]] %s8525_s16  ;;  %s8630_s19 = sadd.s32 1, %s8525_s16  }
  0x10   : > { %9725 = sst [smem:[#allocation14_spill]] %s8630_s19  ;;  %s242_s20 = sadd.s32 1, %s8521_s15 }
  0x11   : > { %s239_s21 = ssub.s32 %s8525_s16, %s8630_s19  ;;  %p252_p0 = scmp.ne.s32.totalorder %s8521_s15, %s8517_s14 }
  0x12   : > { %p240_p1 = scmp.eq.s32.totalorder %s239_s21, 0  ;;  %p253_p2 = scmp.eq.s32.totalorder %s8626_s17, 1 }
  0x13   : > { %p258_p3 = scmp.ne.s32.totalorder %s8517_s14, %s8513_s13  ;;  %p259_p4 = scmp.eq.s32.totalorder %s7204_s18, 1 }
  0x14   : > { %s8641_s22 = scalar_select %p240_p1, %s8521_s15, %s242_s20  }
  0x15   : > { %p8643_p5 = por %p253_p2, %p252_p0  ;;  %p8647_p6 = por %p259_p4, %p258_p3 }
  0x16   : > { %9726 = sst [smem:[#allocation15_spill]] %s8641_s22  ;;  %p7205_p7 = scmp.ge.s32.totalorder %s8525_s16, 1 }
  0x17   : > { %s9728_s24 = scalar_select %p8647_p6, 1, 0 }
  0x18   : > { %p292_p8 = scmp.lt.s32.totalorder %s8525_s16, 3  ;;  %p9680_p9 = scmp.eq.s32.totalorder %s8626_s17, 0 }
  0x19   : > { %9729 = sst [smem:[#allocation16_spill]] %s9728_s24  ;;  %s8527_s26 = smov [#allocation2]  }
  0x1a   : > { %p8654_p10 = pnand %p7205_p7, %p292_p8  ;;  %s310_s27 = sshll.u32 %s8527_s26, 4  ;;  %s311_s27 = int_to_ptr.vmem [resolvable:$true] %s310_s27 }
  0x1b   : > { %s8528_s29 = smov [#allocation5]   ;;  %s8416_s11 = scalar_lea.vmem %s311_s27, 9728 }
  0x1c   : > { %p8187_p11 = pneg %p8654_p10  ;;  %s327_s30 = sshll.u32 %s8528_s29, 4  ;;  %s328_s30 = int_to_ptr.vmem [resolvable:$true] %s327_s30 }
  0x1d   : > { %p8417_p0 = scmp.ne.s32.totalorder %s311_s27, %s8416_s11  ;;  %p8424_p3 = scmp.lt.s32.totalorder %s311_s27, %s311_s27 }
  0x1e   : > { %p8662_p12 = pnand %p9680_p9, %p8187_p11  ;;  %p8425_p4 = scmp.lt.s32.totalorder %s8416_s11, %s8416_s11 }
  0x20   : > { %p8407_p13 = pneg %p8662_p12  ;;  %p8426_p7 = por %p8425_p4, %p8424_p3 }
  0x22   : > { %p8419_p1 = pnand %p8417_p0, %p8407_p13 }
  0x24   : > { %p8420_p2 = pneg %p8419_p1 }
  0x26   : > { %p8427_p8 = pnand %p8426_p7, %p8420_p2 }
  0x28   : > { %8430 = shalt.err (!%p8427_p8)
}
  0x29   : > { %s8529_s12 = smov 2432   ;;  %s8530_s18 = smov 152  }
  0x2a   : > { %s9732_s6 = sld [smem:[#allocation22_spill]]  ;;  %s8442_s26 = scalar_lea.vmem %s328_s30, 688 }
  0x2b   : > { %p8443_p11 = scmp.ne.s32.totalorder %s328_s30, %s8442_s26  ;;  %s8449_s29 = scalar_lea.vmem %s328_s30, 704 }
  0x2c   : > { %p8450_p9 = scmp.lt.s32.totalorder %s328_s30, %s328_s30  ;;  %p8451_p3 = scmp.lt.s32.totalorder %s8449_s29, %s8442_s26 }
  0x2d   : > { %p8445_p0 = pnand %p8443_p11, %p8407_p13 }
  0x2e   : > { %p8452_p2 = por %p8451_p3, %p8450_p9 }
  0x2f   : > { %p8446_p1 = pneg %p8445_p0 }
  0x30   : > { %8190 = dma.hbm_to_vmem [thread:$0]  (!%p8662_p12), %s9732_s6, 9728, %s311_s27, [#allocation3], %s8529_s12, %s8529_s12, %s8530_s18  }
  0x31   : > { %p8453_p4 = pnand %p8452_p2, %p8446_p1 }
  0x33   : > { %8456 = shalt.err (!%p8453_p4)
}
  0x34   : > { %s9733_s8 = sld [smem:[#allocation23_spill]]  ;;  %p9734_p7 = scmp.eq.s32.totalorder (!%p8654_p10), %s8626_s17, 0 }
  0x36   : > { %367 = sbr.rel (%p8654_p10) target bundleno = 13967 (0x368f), region = 56 }
  0x3a   : > { %8193 = dma.hbm_to_vmem [thread:$0]  (!%p8662_p12), %s9733_s8, 688, %s328_s30, [#allocation6]  }
  0x3b   : > { %8500 = dma.done.wait (%p9734_p7), [#allocation3], 9728   ;;  %p9735_p13 = pmov %p9734_p7 }
  0x3c   : > { %p9736_p8 = pmov %p9734_p7 }
  0x3d   : > { %8502 = vsyncadd (%p9735_p13), [#allocation3], 4294957568 }
  0x3e   : > { %8504 = dma.done.wait (%p9736_p8), [#allocation6], 688   ;;  %p9737_p9 = pmov %p9734_p7 }
  0x3f   : > { %p422_p11 = scmp.lt.s32.totalorder %s8626_s17, 1  ;;  %v8531_v0 = vmov 0   ;;  %v8532_v1 = vmov 0.0   ;;  %s9738_s0 = sld [smem:[#allocation17_spill]]  ;;  %vm8533_vm0 = vmmov 0   ;;  %v538_v6 = vld [vmem:[#allocation2 + $0x1c8] sm:$0xff]  ;;  %v442_v12 = vlaneseq }
  0x40   : > { %8506 = vsyncadd (%p9737_p9), [#allocation6], 4294966608  ;;  %8257 = vset.pattern.permute.xlu0 %v8531_v0  ;;  %7614 = vmatprep.subr.mxu0 %v8532_v1  ;;  %s9739_s4 = sld [smem:[#allocation20_spill]]  ;;  %vm458_vm1 = vcmask 523264   ;;  %v537_v16 = vld [vmem:[#allocation2 + $0x130] sm:$0xff]  ;;  %v536_v17 = vld [vmem:[#allocation2 + $0x98] sm:$0xff] }
  0x41   : > { %s8697_s22 = scalar_select %p422_p11, %s8626_s17, 1  ;;  %7633 = vmatprep.subr.mxu1 %v8532_v1  ;;  %8258 = vset.pattern.permute.xlu1 %v8531_v0  ;;  %v8745_v13 = vand.u32 127, %v442_v12  ;;  %v535_v18 = vld [vmem:[#allocation2] sm:$0xff]  ;;  %vm546_vm3 = vcmask 261120   ;;  %vm628_vm4 = vcmask 64512   ;;  %vm1312_vm5 = vcmask 130048  }
  0x42   : > { %7630 = vmatprep.mubr.msk.f32.mxu0 %vm8533_vm0, %v8532_v1  ;;  %7641 = vmatprep.mubr.msk.f32.mxu1 %vm8533_vm0, %v8532_v1  ;;  %s9740_s5 = sld [smem:[#allocation21_spill]]  ;;  %v7218_v24 = vld [vmem:[#allocation5] ss:$0 sm:$0xff]  ;;  %s9705_s28 = smov 96   ;;  %vm1314_vm6 = vcmask 195584   ;;  %vm7021_vm11 = vcmask 7168  }
  0x43   : > { %s8701_s25 = sshll.u32 %s8697_s22, 3  ;;  %7634 = vmatpush3.msra.mxu1 %v538_v6  ;;  %s9701_s12 = smov 120  }
  0x44   : > { %7635 = vmatprep.subr.mxu1 %v8532_v1  ;;  %s9697_s18 = smov 80   ;;  %s9703_s20 = smov 112  }
  0x45   : > { %s425_s30 = scalar_lea.vmem %s9738_s0, %s8701_s25  ;;  %7636 = vmatpush3.msra.mxu1 %v537_v16  ;;  %s9689_s21 = smov 72  }
  0x46   : > { %v441_v2 = vld [vmem:[%s425_s30] sm:$0xff]  ;;  %v457_v3 = vld [vmem:[%s9739_s4 + $0x38] sm:$0xff]  ;;  %v456_v4 = vld [vmem:[%s9739_s4 + $0x30] sm:$0xff]  ;;  %7637 = vmatprep.subr.mxu1 %v8532_v1  ;;  %s9681_s30 = smov 64   ;;  %s9741_s3 = sld [smem:[#allocation19_spill]] }
  0x47   : > { %445 = vperm.xlu0 %8257, %v441_v2   ;;  %7615 = vmatpush3.msra.mxu0 %v457_v3  ;;  %v455_v5 = vld [vmem:[%s9739_s4 + $0x28] sm:$0xff]  ;;  %v454_v7 = vld [vmem:[%s9739_s4 + $0x20] sm:$0xff]  ;;  %v453_v8 = vld [vmem:[%s9739_s4 + $0x18] sm:$0xff]  ;;  %s9707_s27 = smov 88   ;;  %s9699_s26 = smov 104  }
  0x48   : > { %7616 = vmatprep.subr.mxu0 %v8532_v1  ;;  %v452_v9 = vld [vmem:[%s9739_s4 + $0x10] sm:$0xff]  ;;  %v451_v10 = vld [vmem:[%s9739_s4 + $0x8] sm:$0xff]  ;;  %v450_v11 = vld [vmem:[%s9739_s4] sm:$0xff]  ;;  %7638 = vmatpush3.msra.mxu1 %v536_v17  ;;  %s9687_s29 = smov 56   ;;  %s9751_s0 = smov 40  }
  0x49   : > { %7617 = vmatpush3.msra.mxu0 %v456_v4  ;;  %7639 = vmatprep.subr.mxu1 %v8532_v1  ;;  %v533_v20 = vld [vmem:[%s9740_s5] sm:$0xff]  ;;  %s9753_s6 = smov 16   ;;  %s9754_s8 = smov 24  }
  0x4a   : > { %7618 = vmatprep.subr.mxu0 %v8532_v1  ;;  %7640 = vmatpush3.msra.mxu1 %v535_v18  ;;  %s9755_s1 = sld [smem:[#allocation18_spill]] }
  0x4b   : > { %7619 = vmatpush3.msra.mxu0 %v455_v5  ;;  %7644 = vmatprep.subr.mxu1 %v8532_v1 }
  0x4c   : > { %7620 = vmatprep.subr.mxu0 %v8532_v1  ;;  %s8796_s11 = scalar_lea.vmem %s9741_s3, %s8697_s22  ;;  %s9752_s3 = smov 8  }
  0x4d   : > { %7621 = vmatpush3.msra.mxu0 %v454_v7  ;;  %v8799_v34 = vld [vmem:[%s8796_s11] ss:$0 sm:$0xff] }
  0x4e   : > { %7622 = vmatprep.subr.mxu0 %v8532_v1 }
  0x4f   : > { %7623 = vmatpush3.msra.mxu0 %v453_v8 }
  0x50   : > { %7624 = vmatprep.subr.mxu0 %v8532_v1  ;;  %s429_s24 = scalar_lea.vmem %s9755_s1, %s8701_s25  ;;  %s9756_s1 = smov 88  }
  0x51   : > { %7625 = vmatpush3.msra.mxu0 %v452_v9 }
  0x52   : > { %7626 = vmatprep.subr.mxu0 %v8532_v1 }
  0x53   : > { %7627 = vmatpush3.msra.mxu0 %v451_v10 }
  0x54   : > { %7628 = vmatprep.subr.mxu0 %v8532_v1 }
  0x55   : > { %7629 = vmatpush3.msra.mxu0 %v450_v11 }
  0x56   : > { %7664 = vmatprep.subr.mxu0 %v8532_v1 }
  0xc2   : > { %v446_v14 = vpop.permute.xlu0 %445 }
  0xc3   : > { %vm447_vm2 = vcmp.eq.s32.totalorder %v8745_v13, %v446_v14 }
  0xc4   : > { %v7216_v15 = vsel %vm447_vm2, 1.0, %v8532_v1 }
  0xc5   : > { %7631 = vmatmul.mubr.msk.f32.vlgmr.msra.gmra.mxu0 %vm458_vm1, %v7216_v15 }
  0xc6   : > { %7666 = vmatprep.mubr.msk.f32.mxu0 %vm8533_vm0, %v8532_v1 }
 0x185   : > { %v528_v19 = vpop.f32.mrf.mxu0 }
 0x186   : > { %v532_v21 = vmul.f32 5.656854, %v528_v19 }
 0x187   : > { %v7632_v22 = vpop.f32.mrf.mxu0 }
 0x188   : > { %v8758_v23 = vadd.f32 %v533_v20, %v532_v21 }
 0x18a   : > { %7642 = vmatmul.mubr.msk.f32.vlgmr.msra.gmra.mxu1 %vm546_vm3, %v8758_v23 }
 0x18b   : > { %7646 = vmatprep.mubr.msk.f32.mxu1 %vm8533_vm0, %v8532_v1 }
 0x24a   : > { %v616_v25 = vpop.f32.mrf.mxu1 }
 0x24b   : > { %v8764_v26 = vadd.f32 %v7218_v24, %v616_v25 }
 0x24c   : > { %v7643_v27 = vpop.f32.mrf.mxu1 }
 0x24d   : > { %626 = vrot.lane.b32.xlu0 %v8764_v26, %s9705_s28  ;;  %s9742_s28 = smov 96  }
 0x251   : > { %722 = vrot.lane.b32.xlu0 %v8764_v26, %s9681_s30  ;;  %s9683_s30 = smov 40  }
 0x255   : > { %798 = vrot.lane.b32.xlu0 %v8764_v26, %s9701_s12  ;;  %s9746_s12 = smov 80  }
 0x259   : > { %967 = vrot.lane.b32.xlu0 %v8764_v26, %s9697_s18  ;;  %s9745_s18 = smov 104  }
 0x25d   : > { %965 = vrot.lane.b32.xlu0 %v8764_v26, %s9703_s20  ;;  %s9748_s20 = smov 56  }
 0x261   : > { %1134 = vrot.lane.b32.xlu0 %v8764_v26, %s9689_s21  ;;  %s9691_s21 = smov 24  }
 0x2bf   : > { %v627_v28 = vpop.permute.xlu0 %626 }
 0x2c0   : > { %7645 = vmatpush3.xpose.msk.msra.mxu1 %vm628_vm4, %v627_v28 }
 0x2c1   : > { %7649 = vmatprep.subr.mxu1 %v8532_v1 }
 0x2c3   : > { %7647 = vmatmul.mubr.msk.f32.vlgmr.msra.gmra.mxu1 %vm628_vm4, %v8764_v26  ;;  %v723_v29 = vpop.permute.xlu0 %722 }
 0x2c4   : > { %7650 = vmatpush3.msra.mxu1 %v723_v29  ;;  %7651 = vmatprep.mubr.msk.f32.mxu1 %vm8533_vm0, %v8532_v1 }
 0x2c5   : > { %7654 = vmatprep.subr.mxu1 %v8532_v1 }
 0x2c7   : > { %v799_v30 = vpop.permute.xlu0 %798 }
 0x2cb   : > { %v968_v31 = vpop.permute.xlu0 %967 }
 0x2cc   : > { %7665 = vmatpush3.xpose.msk.msra.mxu0 %vm628_vm4, %v968_v31 }
 0x2cd   : > { %7674 = vmatprep.subr.mxu0 %v8532_v1 }
 0x2cf   : > { %v966_v32 = vpop.permute.xlu0 %965 }
 0x2d0   : > { %7667 = vmatmul.mubr.msk.f32.vlgmr.msra.gmra.mxu0 %vm628_vm4, %v966_v32 }
 0x2d1   : > { %7676 = vmatprep.mubr.msk.f32.mxu0 %vm8533_vm0, %v8532_v1 }
 0x2d3   : > { %v1135_v33 = vpop.permute.xlu0 %1134 }
 0x2d4   : > { %7675 = vmatpush3.xpose.msk.msra.mxu0 %vm628_vm4, %v1135_v33 }
 0x2d5   : > { %7684 = vmatprep.subr.mxu0 %v8532_v1 }
 0x383   : > { %v699_v35 = vpop.f32.mrf.mxu1 }
 0x384   : > { %v703_v36 = vmul.f32 0.35355338, %v699_v35  ;;  %v623_v35 = vld [vmem:[#allocation2 + $0x1d0] sm:$0xff] }
 0x385   : > { %v7648_v37 = vpop.f32.mrf.mxu1 }
 0x386   : > { %v710_v38 = vadd.f32 %v8799_v34, %v703_v36  ;;  %v622_v36 = vld [vmem:[#allocation2 + $0x138] sm:$0xff]  ;;  %v621_v37 = vld [vmem:[#allocation2 + $0xa0] sm:$0xff] }
 0x388   : > { %v711_v39 = vsel %vm628_vm4, %v710_v38, -inf }
 0x389   : > { %712 = vmax.xlane.f32.xlu1 %v711_v39 }
 0x390   : > { %v1039_v40 = vpop.f32.mrf.mxu0 }
 0x391   : > { %v1043_v47 = vmul.f32 0.35355338, %v1039_v40 }
 0x392   : > { %v7668_v41 = vpop.f32.mrf.mxu0 }
 0x393   : > { %v1044_v48 = vadd.f32 %v8799_v34, %v1043_v47 }
 0x395   : > { %v1045_v49 = vsel %vm628_vm4, %v1044_v48, -inf }
 0x412   : > { %v713_v42 = vpop.xlane.xlu1 %712 }
 0x413   : > { %v714_v43 = vsub.f32 %v710_v38, %v713_v42  ;;  %v620_v38 = vld [vmem:[#allocation2 + $0x8] sm:$0xff] }
 0x415   : > { %v715_v44 = vmul.f32 1.442695, %v714_v43 }
 0x417   : > { %8259 = vpow2.f32 %v715_v44 }
 0x424   : > { %v8260_v45 = vpop.eup %8259 }
 0x425   : > { %v717_v46 = vsel %vm628_vm4, %v8260_v45, 0.0 }
 0x426   : > { %718 = vadd.xlane.f32.xlu1 %v717_v46 }
 0x437   : > { %800 = vrot.lane.b32.xlu1 %v8764_v26, %s9707_s27 }
 0x43b   : > { %1132 = vrot.lane.b32.xlu1 %v8764_v26, %s9699_s26  ;;  %s9747_s26 = smov 72  }
 0x45f   : > { %1046 = vmax.xlane.f32.xlu1 %v1045_v49 }
 0x4af   : > { %v719_v50 = vpop.xlane.xlu1 %718 }
 0x4b0   : > { %8261 = vrcp.f32 %v719_v50 }
 0x4b3   : > { %v801_v51 = vpop.permute.xlu1 %800 }
 0x4b7   : > { %v1133_v52 = vpop.permute.xlu1 %1132 }
 0x4b8   : > { %7677 = vmatmul.mubr.msk.f32.vlgmr.msra.gmra.mxu0 %vm628_vm4, %v1133_v52 }
 0x4b9   : > { %7692 = vmatprep.mubr.msk.f32.mxu0 %vm8533_vm0, %v8532_v1  ;;  %7685 = vmatpush3.msra.mxu0 %v623_v35 }
 0x4ba   : > { %7686 = vmatprep.subr.mxu0 %v8532_v1 }
 0x4bb   : > { %7687 = vmatpush3.msra.mxu0 %v622_v36 }
 0x4bc   : > { %7688 = vmatprep.subr.mxu0 %v8532_v1 }
 0x4bd   : > { %v8262_v53 = vpop.eup %8261  ;;  %7689 = vmatpush3.msra.mxu0 %v621_v37 }
 0x4be   : > { %v721_v54 = vmul.f32 %v8262_v53, %v8260_v45  ;;  %7690 = vmatprep.subr.mxu0 %v8532_v1 }
 0x4bf   : > { %7691 = vmatpush3.msra.mxu0 %v620_v38 }
 0x4c0   : > { %7652 = vmatmul.mubr.msk.f32.vlgmr.msra.gmra.mxu1 %vm628_vm4, %v721_v54  ;;  %7706 = vmatprep.subr.mxu0 %v8532_v1 }
 0x4c1   : > { %7655 = vmatpush3.xpose.msk.msra.mxu1 %vm628_vm4, %v801_v51  ;;  %7656 = vmatprep.mubr.msk.f32.mxu1 %vm8533_vm0, %v8532_v1  ;;  %v7233_v51 = vld [vmem:[#allocation5 + $0x1] ss:$0 sm:$0xff] }
 0x4c2   : > { %7659 = vmatprep.subr.mxu1 %v8532_v1 }
 0x4c4   : > { %7657 = vmatmul.mubr.msk.f32.vlgmr.msra.gmra.mxu1 %vm628_vm4, %v799_v30 }
 0x4c5   : > { %7661 = vmatprep.mubr.msk.f32.mxu1 %vm8533_vm0, %v8532_v1 }
 0x4e8   : > { %v1047_v55 = vpop.xlane.xlu1 %1046 }
 0x4e9   : > { %v1048_v56 = vsub.f32 %v1044_v48, %v1047_v55 }
 0x4eb   : > { %v1049_v57 = vmul.f32 1.442695, %v1048_v56 }
 0x4ed   : > { %8263 = vpow2.f32 %v1049_v57 }
 0x4fa   : > { %v8264_v58 = vpop.eup %8263 }
 0x4fb   : > { %v1051_v59 = vsel %vm628_vm4, %v8264_v58, 0.0 }
 0x4fc   : > { %1052 = vadd.xlane.f32.xlu1 %v1051_v59 }
 0x50d   : > { %889 = vrot.lane.b32.xlu1 %v8764_v26, %s9687_s29  ;;  %s9693_s29 = smov 16  }
 0x511   : > { %1223 = vrot.lane.b32.xlu1 %v8764_v26, %s9683_s30  ;;  %s9685_s30 = smov 48  }
 0x578   : > { %v1206_v60 = vpop.f32.mrf.mxu0 }
 0x579   : > { %v1210_v2 = vmul.f32 0.35355338, %v1206_v60 }
 0x57a   : > { %v7678_v61 = vpop.f32.mrf.mxu0 }
 0x57b   : > { %v1211_v9 = vadd.f32 %v8799_v34, %v1210_v2 }
 0x57d   : > { %v1212_v10 = vsel %vm628_vm4, %v1211_v9, -inf }
 0x580   : > { %v8826_v62 = vpop.f32.mrf.mxu1 }
 0x582   : > { %v7653_v63 = vpop.f32.mrf.mxu1 }
 0x583   : > { %v1428_v63 = vld [vmem:[#allocation2 + $0x140] sm:$0xff] }
 0x584   : > { %v872_v0 = vpop.f32.mrf.mxu1 }
 0x585   : > { %v876_v3 = vmul.f32 0.35355338, %v872_v0  ;;  %v1053_v4 = vpop.xlane.xlu1 %1052  ;;  %v1427_v0 = vld [vmem:[#allocation2 + $0xa8] sm:$0xff] }
 0x586   : > { %v7658_v5 = vpop.f32.mrf.mxu1 }
 0x587   : > { %v877_v6 = vadd.f32 %v8799_v34, %v876_v3 }
 0x589   : > { %v890_v7 = vpop.permute.xlu1 %889  ;;  %v878_v8 = vsel %vm628_vm4, %v877_v6, -inf }
 0x58a   : > { %879 = vmax.xlane.f32.xlu0 %v878_v8  ;;  %7660 = vmatpush3.msra.mxu1 %v890_v7  ;;  %v7236_v8 = vld [vmem:[#allocation5 + $0x3] ss:$0 sm:$0xff] }
 0x58b   : > { %7669 = vmatprep.subr.mxu1 %v8532_v1 }
 0x58e   : > { %1213 = vmax.xlane.f32.xlu0 %v1212_v10 }
 0x613   : > { %v880_v11 = vpop.xlane.xlu0 %879 }
 0x614   : > { %v881_v14 = vsub.f32 %v877_v6, %v880_v11  ;;  %v7235_v6 = vld [vmem:[#allocation5 + $0x2] ss:$0 sm:$0xff] }
 0x615   : > { %v1438_v11 = vld [vmem:[%s9676_s7 + $0xe0] sm:$0xff] }
 0x616   : > { %v882_v17 = vmul.f32 1.442695, %v881_v14  ;;  %v1437_v14 = vld [vmem:[%s9676_s7 + $0xc0] sm:$0xff] }
 0x617   : > { %v1214_v15 = vpop.xlane.xlu0 %1213 }
 0x618   : > { %v1215_v16 = vsub.f32 %v1211_v9, %v1214_v15  ;;  %v1436_v15 = vld [vmem:[%s9676_s7 + $0xa0] sm:$0xff] }
 0x61a   : > { %v1216_v18 = vmul.f32 1.442695, %v1215_v16  ;;  %v1435_v16 = vld [vmem:[%s9676_s7 + $0x80] sm:$0xff] }
 0x61c   : > { %8265 = vpow2.f32 %v1216_v18  ;;  %v1433_v18 = vld [vmem:[%s9676_s7 + $0x40] sm:$0xff] }
 0x61d   : > { %8267 = vpow2.f32 %v882_v17  ;;  %v1434_v17 = vld [vmem:[%s9676_s7 + $0x60] sm:$0xff] }
 0x629   : > { %v8266_v19 = vpop.eup %8265 }
 0x62a   : > { %v1218_v20 = vsel %vm628_vm4, %v8266_v19, 0.0  ;;  %v8268_v21 = vpop.eup %8267 }
 0x62b   : > { %1219 = vadd.xlane.f32.xlu0 %v1218_v20  ;;  %v884_v22 = vsel %vm628_vm4, %v8268_v21, 0.0  ;;  %v1431_v20 = vld [vmem:[%s9676_s7] sm:$0xff] }
 0x62f   : > { %885 = vadd.xlane.f32.xlu0 %v884_v22 }
 0x645   : > { %1056 = vrot.lane.b32.xlu0 %v8764_v26, %s9685_s30  ;;  %v1224_v26 = vpop.permute.xlu1 %1223  ;;  %s9695_s30 = smov 8  }
 0x6b4   : > { %v1220_v24 = vpop.xlane.xlu0 %1219 }
 0x6b8   : > { %v886_v25 = vpop.xlane.xlu0 %885 }
 0x6b9   : > { %8269 = vrcp.f32 %v886_v25 }
 0x6ba   : > { %8271 = vrcp.f32 %v1053_v4 }
 0x6bb   : > { %8273 = vrcp.f32 %v1220_v24 }
 0x6bc   : > { %v1057_v30 = vpop.permute.xlu0 %1056 }
 0x6c6   : > { %v8270_v27 = vpop.eup %8269 }
 0x6c7   : > { %v888_v28 = vmul.f32 %v8270_v27, %v8268_v21  ;;  %v8272_v29 = vpop.eup %8271  ;;  %v7237_v21 = vld [vmem:[#allocation5 + $0x4] ss:$0 sm:$0xff] }
 0x6c8   : > { %v1055_v31 = vmul.f32 %v8272_v29, %v8264_v58  ;;  %v8274_v32 = vpop.eup %8273 }
 0x6c9   : > { %7662 = vmatmul.mubr.msk.f32.vlgmr.msra.gmra.mxu1 %vm628_vm4, %v888_v28  ;;  %v1222_v33 = vmul.f32 %v8274_v32, %v8266_v19  ;;  %v1432_v19 = vld [vmem:[%s9676_s7 + $0x20] sm:$0xff] }
 0x6ca   : > { %7670 = vmatpush3.msra.mxu1 %v1057_v30  ;;  %7671 = vmatprep.mubr.msk.f32.mxu1 %vm8533_vm0, %v8532_v1  ;;  %v7240_v32 = vld [vmem:[#allocation5 + $0x5] ss:$0 sm:$0xff] }
 0x6cb   : > { %7679 = vmatprep.subr.mxu1 %v8532_v1 }
 0x6cd   : > { %7672 = vmatmul.mubr.msk.f32.vlgmr.msra.gmra.mxu1 %vm628_vm4, %v1055_v31 }
 0x6ce   : > { %7680 = vmatpush3.msra.mxu1 %v1224_v26  ;;  %7681 = vmatprep.mubr.msk.f32.mxu1 %vm8533_vm0, %v8532_v1 }
 0x6cf   : > { %7695 = vmatprep.subr.mxu1 %v8532_v1 }
 0x6d1   : > { %7682 = vmatmul.mubr.msk.f32.vlgmr.msra.gmra.mxu1 %vm628_vm4, %v1222_v33 }
 0x6d2   : > { %7703 = vmatprep.mubr.msk.f32.mxu1 %vm8533_vm0, %v8532_v1 }
 0x789   : > { %v961_v39 = vpop.f32.mrf.mxu1 }
 0x78a   : > { %1300 = vrot.lane.b32.xlu1 %v961_v39, %s9695_s30  ;;  %s9744_s30 = smov 120  }
 0x78b   : > { %v7663_v40 = vpop.f32.mrf.mxu1 }
 0x78d   : > { %v1128_v41 = vpop.f32.mrf.mxu1 }
 0x78e   : > { %1304 = vrot.lane.b32.xlu0 %v1128_v41, %s9693_s29  ;;  %s9743_s29 = smov 112  }
 0x78f   : > { %v7673_v42 = vpop.f32.mrf.mxu1 }
 0x791   : > { %v1295_v43 = vpop.f32.mrf.mxu1 }
 0x792   : > { %1308 = vrot.lane.b32.xlu1 %v1295_v43, %s9691_s21  ;;  %v1638_v43 = vld [vmem:[#allocation2 + $0x1e0] sm:$0xff]  ;;  %s9749_s21 = smov 64  }
 0x793   : > { %v7683_v44 = vpop.f32.mrf.mxu1 }
 0x794   : > { %v1637_v44 = vld [vmem:[#allocation2 + $0x148] sm:$0xff] }
 0x7fc   : > { %v1301_v45 = vpop.permute.xlu1 %1300 }
 0x7fd   : > { %v1311_v47 = vsel %vm628_vm4, %v8826_v62, %v1301_v45  ;;  %v1429_v62 = vld [vmem:[#allocation2 + $0x1d8] sm:$0xff]  ;;  %v1636_v45 = vld [vmem:[#allocation2 + $0xb0] sm:$0xff] }
 0x7fe   : > { %7696 = vmatpush3.msra.mxu1 %v1429_v62 }
 0x7ff   : > { %7697 = vmatprep.subr.mxu1 %v8532_v1 }
 0x800   : > { %v1305_v46 = vpop.permute.xlu0 %1304  ;;  %7698 = vmatpush3.msra.mxu1 %v1428_v63 }
 0x801   : > { %v1313_v48 = vsel %vm1312_vm5, %v1311_v47, %v1305_v46  ;;  %7699 = vmatprep.subr.mxu1 %v8532_v1  ;;  %v1635_v46 = vld [vmem:[#allocation2 + $0x18] sm:$0xff] }
 0x802   : > { %7700 = vmatpush3.msra.mxu1 %v1427_v0 }
 0x803   : > { %7701 = vmatprep.subr.mxu1 %v8532_v1 }
 0x804   : > { %v1309_v49 = vpop.permute.xlu1 %1308 }
 0x805   : > { %v1315_v50 = vsel %vm1314_vm6, %v1313_v48, %v1309_v49 }
 0x806   : > { %7693 = vmatmul.mubr.msk.f32.vlgmr.msra.gmra.mxu0 %vm546_vm3, %v1315_v50 }
 0x807   : > { %7722 = vmatprep.mubr.msk.f32.mxu0 %vm8533_vm0, %v8532_v1  ;;  %7707 = vmatpush3.msra.mxu0 %v1438_v11 }
 0x808   : > { %7708 = vmatprep.subr.mxu0 %v8532_v1 }
 0x809   : > { %7709 = vmatpush3.msra.mxu0 %v1437_v14 }
 0x80a   : > { %7710 = vmatprep.subr.mxu0 %v8532_v1 }
 0x80b   : > { %7711 = vmatpush3.msra.mxu0 %v1436_v15 }
 0x80c   : > { %7712 = vmatprep.subr.mxu0 %v8532_v1 }
 0x80d   : > { %7713 = vmatpush3.msra.mxu0 %v1435_v16 }
 0x80e   : > { %7714 = vmatprep.subr.mxu0 %v8532_v1 }
 0x80f   : > { %7715 = vmatpush3.msra.mxu0 %v1434_v17 }
 0x810   : > { %7716 = vmatprep.subr.mxu0 %v8532_v1 }
 0x811   : > { %7717 = vmatpush3.msra.mxu0 %v1433_v18 }
 0x812   : > { %7718 = vmatprep.subr.mxu0 %v8532_v1 }
 0x813   : > { %7719 = vmatpush3.msra.mxu0 %v1432_v19 }
 0x814   : > { %7720 = vmatprep.subr.mxu0 %v8532_v1 }
 0x815   : > { %7721 = vmatpush3.msra.mxu0 %v1431_v20 }
 0x816   : > { %7746 = vmatprep.subr.mxu0 %v8532_v1 }
 0x8c6   : > { %v1391_v52 = vpop.f32.mrf.mxu0 }
 0x8c7   : > { %v1392_v53 = vadd.f32 %v7233_v51, %v1391_v52  ;;  %v7242_v51 = vld [vmem:[#allocation5 + $0x6] ss:$0 sm:$0xff] }
 0x8c8   : > { %v7694_v54 = vpop.f32.mrf.mxu0 }
 0x8c9   : > { %v1395_v55 = vadd.f32 %v1392_v53, %v8758_v23  ;;  %v1426_v23 = vld [vmem:[#allocation2 + $0x10] sm:$0xff]  ;;  %v7243_v53 = vld [vmem:[#allocation5 + $0x7] ss:$0 sm:$0xff] }
 0x8ca   : > { %7702 = vmatpush3.msra.mxu1 %v1426_v23 }
 0x8cb   : > { %v1398_v56 = vsel %vm546_vm3, %v1395_v55, 0.0  ;;  %7725 = vmatprep.subr.mxu1 %v8532_v1 }
 0x8cc   : > { %1399 = vadd.xlane.f32.xlu0 %v1398_v56  ;;  %v7244_v56 = vld [vmem:[#allocation5 + $0x8] ss:$0 sm:$0xff] }
 0x955   : > { %v1400_v57 = vpop.xlane.xlu0 %1399 }
 0x956   : > { %v1402_v58 = vmul.f32 0.03125, %v1400_v57 }
 0x958   : > { %v1403_v59 = vsub.f32 %v1395_v55, %v1402_v58 }
 0x95a   : > { %v1404_v60 = vmul.f32 %v1403_v59, %v1403_v59 }
 0x95c   : > { %v1405_v61 = vsel %vm546_vm3, %v1404_v60, 0.0 }
 0x95d   : > { %1406 = vadd.xlane.f32.xlu1 %v1405_v61 }
 0x9e6   : > { %v1407_v2 = vpop.xlane.xlu1 %1406 }
 0x9e7   : > { %v1408_v3 = vmul.f32 0.03125, %v1407_v2 }
 0x9e9   : > { %v1409_v4 = vadd.f32 1e-05, %v1408_v3 }
 0x9eb   : > { %8275 = vrsqrt.f32 %v1409_v4 }
 0x9f8   : > { %v8276_v5 = vpop.eup %8275 }
 0x9f9   : > { %v1411_v7 = vmul.f32 %v8276_v5, %v1403_v59 }
 0x9fb   : > { %v1418_v9 = vmul.f32 %v7235_v6, %v1411_v7 }
 0x9fd   : > { %v1425_v10 = vadd.f32 %v7236_v8, %v1418_v9 }
 0x9ff   : > { %7704 = vmatmul.mubr.msk.f32.vlgmr.msra.gmra.mxu1 %vm546_vm3, %v1425_v10 }
 0xa00   : > { %7733 = vmatprep.mubr.msk.f32.mxu1 %vm8533_vm0, %v8532_v1  ;;  %7726 = vmatpush3.msra.mxu1 %v1638_v43 }
 0xa01   : > { %7727 = vmatprep.subr.mxu1 %v8532_v1 }
 0xa02   : > { %7728 = vmatpush3.msra.mxu1 %v1637_v44 }
 0xa03   : > { %7729 = vmatprep.subr.mxu1 %v8532_v1 }
 0xa04   : > { %7730 = vmatpush3.msra.mxu1 %v1636_v45 }
 0xa05   : > { %7731 = vmatprep.subr.mxu1 %v8532_v1 }
 0xa06   : > { %7732 = vmatpush3.msra.mxu1 %v1635_v46 }
 0xa07   : > { %7736 = vmatprep.subr.mxu1 %v8532_v1 }
 0xabf   : > { %v1515_v22 = vpop.f32.mrf.mxu1 }
 0xac0   : > { %v1516_v24 = vadd.f32 %v7237_v21, %v1515_v22 }
 0xac1   : > { %v7705_v25 = vpop.f32.mrf.mxu1 }
 0xac2   : > { %v7239_v27 = vmul.f32 -1.442695, %v1516_v24 }
 0xac4   : > { %8277 = vpow2.f32 %v7239_v27 }
 0xad1   : > { %v8278_v28 = vpop.eup %8277 }
 0xad2   : > { %v1522_v29 = vadd.f32 1.0, %v8278_v28 }
 0xad4   : > { %8279 = vrcp.f32 %v1522_v29 }
 0xae1   : > { %v8280_v30 = vpop.eup %8279 }
 0xae2   : > { %v1525_v31 = vmul.f32 %v8280_v30, %v1516_v24 }
 0xae4   : > { %7723 = vmatmul.mubr.msk.f32.vlgmr.msra.gmra.mxu0 %vm458_vm1, %v1525_v31 }
 0xae5   : > { %7748 = vmatprep.mubr.msk.f32.mxu0 %vm8533_vm0, %v8532_v1 }
 0xba4   : > { %v1601_v26 = vpop.f32.mrf.mxu0 }
 0xba5   : > { %v1602_v33 = vadd.f32 %v7240_v32, %v1601_v26 }
 0xba6   : > { %v7724_v35 = vpop.f32.mrf.mxu0 }
 0xba7   : > { %v1605_v36 = vadd.f32 %v1602_v33, %v1425_v10 }
 0xba9   : > { %v1608_v37 = vsel %vm546_vm3, %v1605_v36, 0.0 }
 0xbaa   : > { %1609 = vadd.xlane.f32.xlu0 %v1608_v37 }
 0xc33   : > { %v1610_v38 = vpop.xlane.xlu0 %1609 }
 0xc34   : > { %v1611_v39 = vmul.f32 0.03125, %v1610_v38 }
 0xc36   : > { %v1612_v40 = vsub.f32 %v1605_v36, %v1611_v39 }
 0xc38   : > { %v1613_v41 = vmul.f32 %v1612_v40, %v1612_v40 }
 0xc3a   : > { %v1614_v42 = vsel %vm546_vm3, %v1613_v41, 0.0 }
 0xc3b   : > { %1615 = vadd.xlane.f32.xlu0 %v1614_v42 }
 0xcc4   : > { %v1616_v47 = vpop.xlane.xlu0 %1615 }
 0xcc5   : > { %v1617_v48 = vmul.f32 0.03125, %v1616_v47 }
 0xcc7   : > { %v1618_v49 = vadd.f32 1e-05, %v1617_v48 }
 0xcc9   : > { %8281 = vrsqrt.f32 %v1618_v49 }
 0xcd6   : > { %v8282_v50 = vpop.eup %8281 }
 0xcd7   : > { %v1620_v52 = vmul.f32 %v8282_v50, %v1612_v40 }
 0xcd9   : > { %v1627_v54 = vmul.f32 %v7242_v51, %v1620_v52 }
 0xcdb   : > { %v8913_v55 = vadd.f32 %v7243_v53, %v1627_v54 }
 0xcdd   : > { %7734 = vmatmul.mubr.msk.f32.vlgmr.msra.gmra.mxu1 %vm546_vm3, %v8913_v55 }
 0xcde   : > { %7738 = vmatprep.mubr.msk.f32.mxu1 %vm8533_vm0, %v8532_v1 }
 0xd9d   : > { %v1715_v57 = vpop.f32.mrf.mxu1 }
 0xd9e   : > { %v8919_v58 = vadd.f32 %v7244_v56, %v1715_v57 }
 0xd9f   : > { %v7735_v59 = vpop.f32.mrf.mxu1 }
 0xda0   : > { %1892 = vrot.lane.b32.xlu0 %v8919_v58, %s9707_s27  ;;  %1725 = vrot.lane.b32.xlu1 %v8919_v58, %s9742_s28  ;;  %s9750_s27 = smov 48  }
 0xda4   : > { %2057 = vrot.lane.b32.xlu0 %v8919_v58, %s9743_s29  ;;  %1890 = vrot.lane.b32.xlu1 %v8919_v58, %s9744_s30 }
 0xda8   : > { %2224 = vrot.lane.b32.xlu0 %v8919_v58, %s9745_s18  ;;  %2059 = vrot.lane.b32.xlu1 %v8919_v58, %s9746_s12 }
 0xdac   : > { %2226 = vrot.lane.b32.xlu1 %v8919_v58, %s9747_s26 }
 0xe12   : > { %v1893_v60 = vpop.permute.xlu0 %1892  ;;  %v1726_v61 = vpop.permute.xlu1 %1725 }
 0xe13   : > { %7737 = vmatpush3.xpose.msk.msra.mxu1 %vm628_vm4, %v1726_v61  ;;  %7747 = vmatpush3.xpose.msk.msra.mxu0 %vm628_vm4, %v1893_v60 }
 0xe14   : > { %7756 = vmatprep.subr.mxu0 %v8532_v1  ;;  %7741 = vmatprep.subr.mxu1 %v8532_v1 }
 0xe16   : > { %7739 = vmatmul.mubr.msk.f32.vlgmr.msra.gmra.mxu1 %vm628_vm4, %v8919_v58  ;;  %v1891_v62 = vpop.permute.xlu1 %1890  ;;  %v2058_v0 = vpop.permute.xlu0 %2057 }
 0xe17   : > { %7749 = vmatmul.mubr.msk.f32.vlgmr.msra.gmra.mxu0 %vm628_vm4, %v1891_v62  ;;  %7743 = vmatprep.mubr.msk.f32.mxu1 %vm8533_vm0, %v8532_v1 }
 0xe18   : > { %7758 = vmatprep.mubr.msk.f32.mxu0 %vm8533_vm0, %v8532_v1 }
 0xe1a   : > { %v2060_v63 = vpop.permute.xlu1 %2059  ;;  %v2225_v2 = vpop.permute.xlu0 %2224 }
 0xe1b   : > { %7757 = vmatpush3.xpose.msk.msra.mxu0 %vm628_vm4, %v2060_v63  ;;  %v1722_v63 = vld [vmem:[#allocation2 + $0x1e8] sm:$0xff] }
 0xe1c   : > { %7766 = vmatprep.subr.mxu0 %v8532_v1 }
 0xe1e   : > { %7759 = vmatmul.mubr.msk.f32.vlgmr.msra.gmra.mxu0 %vm628_vm4, %v2058_v0  ;;  %v2227_v23 = vpop.permute.xlu1 %2226 }
 0xe1f   : > { %7767 = vmatpush3.xpose.msk.msra.mxu0 %vm628_vm4, %v2227_v23  ;;  %7768 = vmatprep.mubr.msk.f32.mxu0 %vm8533_vm0, %v8532_v1 }
 0xe20   : > { %7776 = vmatprep.subr.mxu0 %v8532_v1 }
 0xe22   : > { %7769 = vmatmul.mubr.msk.f32.vlgmr.msra.gmra.mxu0 %vm628_vm4, %v2225_v2 }
 0xe23   : > { %7784 = vmatprep.mubr.msk.f32.mxu0 %vm8533_vm0, %v8532_v1  ;;  %7777 = vmatpush3.msra.mxu0 %v1722_v63  ;;  %v7262_v63 = vld [vmem:[#allocation5 + $0xc] ss:$0 sm:$0xff] }
 0xe24   : > { %7778 = vmatprep.subr.mxu0 %v8532_v1 }
 0xed6   : > { %v1797_v3 = vpop.f32.mrf.mxu1 }
 0xed7   : > { %v1801_v4 = vmul.f32 0.35355338, %v1797_v3  ;;  %v1964_v5 = vpop.f32.mrf.mxu0 }
 0xed8   : > { %v1968_v6 = vmul.f32 0.35355338, %v1964_v5  ;;  %v7740_v7 = vpop.f32.mrf.mxu1  ;;  %v1720_v5 = vld [vmem:[#allocation2 + $0xb8] sm:$0xff] }
 0xed9   : > { %v7750_v8 = vpop.f32.mrf.mxu0  ;;  %v1802_v9 = vadd.f32 %v8799_v34, %v1801_v4  ;;  %v1721_v4 = vld [vmem:[#allocation2 + $0x150] sm:$0xff] }
 0xeda   : > { %v1969_v10 = vadd.f32 %v8799_v34, %v1968_v6  ;;  %7779 = vmatpush3.msra.mxu0 %v1721_v4  ;;  %v1719_v6 = vld [vmem:[#allocation2 + $0x20] sm:$0xff] }
 0xedb   : > { %v1803_v11 = vsel %vm628_vm4, %v1802_v9, -inf  ;;  %7780 = vmatprep.subr.mxu0 %v8532_v1 }
 0xedc   : > { %1804 = vmax.xlane.f32.xlu1 %v1803_v11  ;;  %v1970_v14 = vsel %vm628_vm4, %v1969_v10, -inf  ;;  %7781 = vmatpush3.msra.mxu0 %v1720_v5 }
 0xedd   : > { %1971 = vmax.xlane.f32.xlu0 %v1970_v14  ;;  %7782 = vmatprep.subr.mxu0 %v8532_v1 }
 0xede   : > { %v2131_v15 = vpop.f32.mrf.mxu0  ;;  %7783 = vmatpush3.msra.mxu0 %v1719_v6 }
 0xedf   : > { %v2135_v16 = vmul.f32 0.35355338, %v2131_v15  ;;  %7798 = vmatprep.subr.mxu0 %v8532_v1 }
 0xee0   : > { %v7760_v17 = vpop.f32.mrf.mxu0 }
 0xee1   : > { %v2136_v18 = vadd.f32 %v8799_v34, %v2135_v16 }
 0xee2   : > { %v2298_v19 = vpop.f32.mrf.mxu0 }
 0xee3   : > { %v2302_v20 = vmul.f32 0.35355338, %v2298_v19  ;;  %v2137_v21 = vsel %vm628_vm4, %v2136_v18, -inf  ;;  %v7258_v19 = vld [vmem:[#allocation5 + $0x9] ss:$0 sm:$0xff] }
 0xee4   : > { %2138 = vmax.xlane.f32.xlu0 %v2137_v21  ;;  %v7770_v22 = vpop.f32.mrf.mxu0 }
 0xee5   : > { %v2303_v24 = vadd.f32 %v8799_v34, %v2302_v20 }
 0xee7   : > { %v2304_v25 = vsel %vm628_vm4, %v2303_v24, -inf }
 0xee8   : > { %2305 = vmax.xlane.f32.xlu1 %v2304_v25 }
 0xef9   : > { %1981 = vrot.lane.b32.xlu1 %v8919_v58, %s9748_s20 }
 0xf65   : > { %v1805_v27 = vpop.xlane.xlu1 %1804 }
 0xf66   : > { %v1806_v28 = vsub.f32 %v1802_v9, %v1805_v27  ;;  %v1972_v29 = vpop.xlane.xlu0 %1971  ;;  %v2728_v27 = vld [vmem:[%s429_s24] sm:$0xff] }
 0xf67   : > { %v1973_v30 = vsub.f32 %v1969_v10, %v1972_v29 }
 0xf68   : > { %v1807_v31 = vmul.f32 1.442695, %v1806_v28 }
 0xf69   : > { %v1974_v32 = vmul.f32 1.442695, %v1973_v30 }
 0xf6a   : > { %8283 = vpow2.f32 %v1807_v31 }
 0xf6b   : > { %8285 = vpow2.f32 %v1974_v32 }
 0xf6d   : > { %v2139_v41 = vpop.xlane.xlu0 %2138 }
 0xf6e   : > { %v2140_v42 = vsub.f32 %v2136_v18, %v2139_v41  ;;  %v7261_v41 = vld [vmem:[#allocation5 + $0xb] ss:$0 sm:$0xff] }
 0xf70   : > { %v2141_v43 = vmul.f32 1.442695, %v2140_v42 }
 0xf71   : > { %v2306_v26 = vpop.xlane.xlu1 %2305 }
 0xf72   : > { %v2307_v33 = vsub.f32 %v2303_v24, %v2306_v26  ;;  %v2518_v26 = vld [vmem:[#allocation2 + $0x1f0] sm:$0xff] }
 0xf74   : > { %v2308_v35 = vmul.f32 1.442695, %v2307_v33  ;;  %v2517_v33 = vld [vmem:[#allocation2 + $0x158] sm:$0xff] }
 0xf75   : > { %v1982_v46 = vpop.permute.xlu1 %1981 }
 0xf76   : > { %8287 = vpow2.f32 %v2308_v35  ;;  %v2515_v35 = vld [vmem:[#allocation2 + $0x28] sm:$0xff] }
 0xf77   : > { %v8284_v36 = vpop.eup %8283  ;;  %8289 = vpow2.f32 %v2141_v43 }
 0xf78   : > { %v8286_v34 = vpop.eup %8285  ;;  %v1809_v37 = vsel %vm628_vm4, %v8284_v36, 0.0 }
 0xf79   : > { %1810 = vadd.xlane.f32.xlu0 %v1809_v37  ;;  %v1976_v38 = vsel %vm628_vm4, %v8286_v34, 0.0 }
 0xf7a   : > { %1977 = vadd.xlane.f32.xlu1 %v1976_v38 }
 0xf83   : > { %v8288_v39 = vpop.eup %8287 }
 0xf84   : > { %v2310_v40 = vsel %vm628_vm4, %v8288_v39, 0.0  ;;  %v8290_v44 = vpop.eup %8289 }
 0xf85   : > { %2311 = vadd.xlane.f32.xlu1 %v2310_v40  ;;  %v2143_v45 = vsel %vm628_vm4, %v8290_v44, 0.0 }
 0xf8f   : > { %1814 = vrot.lane.b32.xlu0 %v8919_v58, %s9749_s21 }
 0xf96   : > { %2148 = vrot.lane.b32.xlu1 %v8919_v58, %s9750_s27 }
 0xfae   : > { %2144 = vadd.xlane.f32.xlu0 %v2143_v45  ;;  %v8396_v45 = vld [vmem:[%s9739_s4 + $0x30] sm:$0xff] }
 0xfc4   : > { %2315 = vrot.lane.b32.xlu0 %v8919_v58, %s9751_s0 }
0x1002   : > { %v1811_v47 = vpop.xlane.xlu0 %1810 }
0x1003   : > { %8291 = vrcp.f32 %v1811_v47  ;;  %v1978_v48 = vpop.xlane.xlu1 %1977  ;;  %v8398_v47 = vld [vmem:[%s9739_s4 + $0x20] sm:$0xff] }
0x1004   : > { %8293 = vrcp.f32 %v1978_v48 }
0x1006   : > { %v1815_v49 = vpop.permute.xlu0 %1814 }
0x1007   : > { %7742 = vmatpush3.msra.mxu1 %v1815_v49  ;;  %v8399_v49 = vld [vmem:[%s9739_s4 + $0x18] sm:$0xff] }
0x1008   : > { %7751 = vmatprep.subr.mxu1 %v8532_v1 }
0x100e   : > { %v2312_v51 = vpop.xlane.xlu1 %2311 }
0x1010   : > { %v8292_v50 = vpop.eup %8291 }
0x1011   : > { %v1813_v52 = vmul.f32 %v8292_v50, %v8284_v36  ;;  %v8294_v53 = vpop.eup %8293  ;;  %v8400_v50 = vld [vmem:[%s9739_s4 + $0x10] sm:$0xff] }
0x1012   : > { %v1980_v54 = vmul.f32 %v8294_v53, %v8286_v34  ;;  %v2149_v56 = vpop.permute.xlu1 %2148  ;;  %v8402_v53 = vld [vmem:[%s9739_s4] sm:$0xff] }
0x1013   : > { %7744 = vmatmul.mubr.msk.f32.vlgmr.msra.gmra.mxu1 %vm628_vm4, %v1813_v52 }
0x1014   : > { %7752 = vmatpush3.msra.mxu1 %v1982_v46  ;;  %7753 = vmatprep.mubr.msk.f32.mxu1 %vm8533_vm0, %v8532_v1  ;;  %v8397_v46 = vld [vmem:[%s9739_s4 + $0x28] sm:$0xff] }
0x1015   : > { %7761 = vmatprep.subr.mxu1 %v8532_v1 }
0x1017   : > { %7754 = vmatmul.mubr.msk.f32.vlgmr.msra.gmra.mxu1 %vm628_vm4, %v1980_v54  ;;  %v2527_v54 = vld [vmem:[%s9676_s7 + $0xe8] sm:$0xff] }
0x1018   : > { %7762 = vmatpush3.msra.mxu1 %v2149_v56  ;;  %7763 = vmatprep.mubr.msk.f32.mxu1 %vm8533_vm0, %v8532_v1  ;;  %v2526_v56 = vld [vmem:[%s9676_s7 + $0xc8] sm:$0xff] }
0x1019   : > { %7771 = vmatprep.subr.mxu1 %v8532_v1 }
0x1037   : > { %v2145_v57 = vpop.xlane.xlu0 %2144 }
0x1038   : > { %8295 = vrcp.f32 %v2145_v57  ;;  %v2525_v57 = vld [vmem:[%s9676_s7 + $0xa8] sm:$0xff] }
0x1039   : > { %8297 = vrcp.f32 %v2312_v51  ;;  %v8401_v51 = vld [vmem:[%s9739_s4 + $0x8] sm:$0xff] }
0x103b   : > { %v2316_v61 = vpop.permute.xlu0 %2315 }
0x1045   : > { %v8296_v58 = vpop.eup %8295 }
0x1046   : > { %v2147_v59 = vmul.f32 %v8296_v58, %v8290_v44  ;;  %v8298_v60 = vpop.eup %8297  ;;  %v8395_v44 = vld [vmem:[%s9739_s4 + $0x38] sm:$0xff]  ;;  %v2524_v58 = vld [vmem:[%s9676_s7 + $0x88] sm:$0xff]  ;;  %s414_s4 = sand.u32 1, %s8517_s14  }
0x1047   : > { %v2314_v62 = vmul.f32 %v8298_v60, %v8288_v39  ;;  %v7260_v39 = vld [vmem:[#allocation5 + $0xa] ss:$0 sm:$0xff]  ;;  %s9606_s13 = sshll.u32 %s414_s4, 3 }
0x1048   : > { %7764 = vmatmul.mubr.msk.f32.vlgmr.msra.gmra.mxu1 %vm628_vm4, %v2147_v59  ;;  %v2523_v59 = vld [vmem:[%s9676_s7 + $0x68] sm:$0xff]  ;;  %s416_s16 = scalar_lea.vmem [#allocation7], %s9606_s13 }
0x1049   : > { %7772 = vmatpush3.msra.mxu1 %v2316_v61  ;;  %7773 = vmatprep.mubr.msk.f32.mxu1 %vm8533_vm0, %v8532_v1  ;;  %v2522_v60 = vld [vmem:[%s9676_s7 + $0x48] sm:$0xff] }
0x104a   : > { %7787 = vmatprep.subr.mxu1 %v8532_v1  ;;  %v2521_v61 = vld [vmem:[%s9676_s7 + $0x28] sm:$0xff] }
0x104c   : > { %7774 = vmatmul.mubr.msk.f32.vlgmr.msra.gmra.mxu1 %vm628_vm4, %v2314_v62  ;;  %v2520_v62 = vld [vmem:[%s9676_s7 + $0x8] sm:$0xff] }
0x104d   : > { %7795 = vmatprep.mubr.msk.f32.mxu1 %vm8533_vm0, %v8532_v1  ;;  %7788 = vmatpush3.msra.mxu1 %v2518_v26 }
0x104e   : > { %7789 = vmatprep.subr.mxu1 %v8532_v1 }
0x104f   : > { %7790 = vmatpush3.msra.mxu1 %v2517_v33  ;;  %v2725_v33 = vshrl.u32 %v442_v12, 7 }
0x1050   : > { %7791 = vmatprep.subr.mxu1 %v8532_v1 }
0x1051   : > { %vm2726_vm8 = vcmp.le.s32.totalorder %v8745_v13, %v2725_v33  ;;  %v2897_v33 = vld [vmem:[#allocation2 + $0x200] sm:$0xff] }
0x10d3   : > { %v1886_v0 = vpop.f32.mrf.mxu1 }
0x10d5   : > { %v7745_v23 = vpop.f32.mrf.mxu1 }
0x10d7   : > { %v2053_v2 = vpop.f32.mrf.mxu1 }
0x10d8   : > { %2392 = vrot.lane.b32.xlu1 %v2053_v2, %s9752_s3 }
0x10d9   : > { %v7755_v3 = vpop.f32.mrf.mxu1 }
0x1108   : > { %v2220_v7 = vpop.f32.mrf.mxu1 }
0x1109   : > { %2396 = vrot.lane.b32.xlu0 %v2220_v7, %s9753_s6 }
0x110a   : > { %v7765_v8 = vpop.f32.mrf.mxu1 }
0x110c   : > { %v2387_v9 = vpop.f32.mrf.mxu1 }
0x110d   : > { %2400 = vrot.lane.b32.xlu1 %v2387_v9, %s9754_s8 }
0x110e   : > { %v7775_v10 = vpop.f32.mrf.mxu1 }
0x110f   : > { %v2813_v10 = vld [vmem:[#allocation2 + $0x1f8] sm:$0xff] }
0x114a   : > { %v2393_v11 = vpop.permute.xlu1 %2392 }
0x114b   : > { %v2403_v15 = vsel %vm628_vm4, %v1886_v0, %v2393_v11  ;;  %v2812_v11 = vld [vmem:[#allocation2 + $0x160] sm:$0xff] }
0x117b   : > { %v2397_v14 = vpop.permute.xlu0 %2396 }
0x117c   : > { %v2404_v16 = vsel %vm1312_vm5, %v2403_v15, %v2397_v14  ;;  %v2811_v15 = vld [vmem:[#allocation2 + $0xc8] sm:$0xff] }
0x117f   : > { %v2401_v17 = vpop.permute.xlu1 %2400 }
0x1180   : > { %v2405_v18 = vsel %vm1314_vm6, %v2404_v16, %v2401_v17  ;;  %v2810_v16 = vld [vmem:[#allocation2 + $0x30] sm:$0xff]  ;;  %v8403_v17 = vld [vmem:[%s9740_s5] sm:$0xff] }
0x1181   : > { %7785 = vmatmul.mubr.msk.f32.vlgmr.msra.gmra.mxu0 %vm546_vm3, %v2405_v18 }
0x1182   : > { %7814 = vmatprep.mubr.msk.f32.mxu0 %vm8533_vm0, %v8532_v1  ;;  %7799 = vmatpush3.msra.mxu0 %v2527_v54 }
0x1183   : > { %7800 = vmatprep.subr.mxu0 %v8532_v1 }
0x1184   : > { %7801 = vmatpush3.msra.mxu0 %v2526_v56 }
0x1185   : > { %7802 = vmatprep.subr.mxu0 %v8532_v1 }
0x1186   : > { %7803 = vmatpush3.msra.mxu0 %v2525_v57 }
0x1187   : > { %7804 = vmatprep.subr.mxu0 %v8532_v1 }
0x1188   : > { %7805 = vmatpush3.msra.mxu0 %v2524_v58 }
0x1189   : > { %7806 = vmatprep.subr.mxu0 %v8532_v1 }
0x118a   : > { %7807 = vmatpush3.msra.mxu0 %v2523_v59 }
0x118b   : > { %7808 = vmatprep.subr.mxu0 %v8532_v1 }
0x118c   : > { %7809 = vmatpush3.msra.mxu0 %v2522_v60 }
0x118d   : > { %7810 = vmatprep.subr.mxu0 %v8532_v1 }
0x118e   : > { %7811 = vmatpush3.msra.mxu0 %v2521_v61 }
0x118f   : > { %7812 = vmatprep.subr.mxu0 %v8532_v1 }
0x1190   : > { %7813 = vmatpush3.msra.mxu0 %v2520_v62 }
0x1191   : > { %7836 = vmatprep.subr.mxu0 %v8532_v1 }
0x1241   : > { %v2481_v20 = vpop.f32.mrf.mxu0 }
0x1242   : > { %v2482_v21 = vadd.f32 %v7258_v19, %v2481_v20 }
0x1243   : > { %v7786_v22 = vpop.f32.mrf.mxu0 }
0x1244   : > { %v2485_v24 = vadd.f32 %v2482_v21, %v8913_v55  ;;  %v2516_v55 = vld [vmem:[#allocation2 + $0xc0] sm:$0xff]  ;;  %v7271_v21 = vld [vmem:[#allocation5 + $0x10] ss:$0 sm:$0xff] }
0x1245   : > { %7792 = vmatpush3.msra.mxu1 %v2516_v55 }
0x1246   : > { %v2488_v25 = vsel %vm546_vm3, %v2485_v24, 0.0  ;;  %7793 = vmatprep.subr.mxu1 %v8532_v1 }
0x1247   : > { %2489 = vadd.xlane.f32.xlu0 %v2488_v25  ;;  %7794 = vmatpush3.msra.mxu1 %v2515_v35  ;;  %v8548_v35 = vmov -1e+09  }
0x1248   : > { %7817 = vmatprep.subr.mxu1 %v8532_v1 }
0x125d   : > { %2730 = vperm.xlu0 %8257, %v2728_v27  }
0x12d0   : > { %v2490_v28 = vpop.xlane.xlu0 %2489 }
0x12d1   : > { %v2491_v29 = vmul.f32 0.03125, %v2490_v28 }
0x12d3   : > { %v2492_v30 = vsub.f32 %v2485_v24, %v2491_v29 }
0x12d5   : > { %v2493_v31 = vmul.f32 %v2492_v30, %v2492_v30 }
0x12d7   : > { %v2494_v32 = vsel %vm546_vm3, %v2493_v31, 0.0 }
0x12d8   : > { %2495 = vadd.xlane.f32.xlu1 %v2494_v32  ;;  %v2731_v48 = vpop.permute.xlu0 %2730 }
0x12d9   : > { %vm2732_vm7 = vcmp.eq.s32.totalorder %v8745_v13, %v2731_v48 }
0x12da   : > { %v7269_v52 = vsel %vm2732_vm7, 1.0, %v8532_v1 }
0x1361   : > { %v2496_v36 = vpop.xlane.xlu1 %2495 }
0x1362   : > { %v2497_v34 = vmul.f32 0.03125, %v2496_v36  ;;  %v9148_v36 = vsel %vm2726_vm8, 0.0, %v8548_v35  ;;  %v2895_v35 = vld [vmem:[#allocation2 + $0xd0] sm:$0xff] }
0x1364   : > { %v2498_v37 = vadd.f32 1e-05, %v2497_v34 }
0x1366   : > { %8299 = vrsqrt.f32 %v2498_v37 }
0x1373   : > { %v8300_v38 = vpop.eup %8299 }
0x1374   : > { %v2500_v40 = vmul.f32 %v8300_v38, %v2492_v30 }
0x1376   : > { %v2507_v42 = vmul.f32 %v7260_v39, %v2500_v40 }
0x1378   : > { %v9016_v43 = vadd.f32 %v7261_v41, %v2507_v42 }
0x137a   : > { %7796 = vmatmul.mubr.msk.f32.vlgmr.msra.gmra.mxu1 %vm546_vm3, %v9016_v43 }
0x137b   : > { %7818 = vmatpush3.msra.mxu1 %v8395_v44  ;;  %7833 = vmatprep.mubr.msk.f32.mxu1 %vm8533_vm0, %v8532_v1 }
0x137c   : > { %7819 = vmatprep.subr.mxu1 %v8532_v1 }
0x137d   : > { %7820 = vmatpush3.msra.mxu1 %v8396_v45 }
0x137e   : > { %7821 = vmatprep.subr.mxu1 %v8532_v1 }
0x137f   : > { %7822 = vmatpush3.msra.mxu1 %v8397_v46 }
0x1380   : > { %7823 = vmatprep.subr.mxu1 %v8532_v1 }
0x1381   : > { %7824 = vmatpush3.msra.mxu1 %v8398_v47 }
0x1382   : > { %7825 = vmatprep.subr.mxu1 %v8532_v1 }
0x1383   : > { %7826 = vmatpush3.msra.mxu1 %v8399_v49 }
0x1384   : > { %7827 = vmatprep.subr.mxu1 %v8532_v1 }
0x1385   : > { %7828 = vmatpush3.msra.mxu1 %v8400_v50 }
0x1386   : > { %7829 = vmatprep.subr.mxu1 %v8532_v1 }
0x1387   : > { %7830 = vmatpush3.msra.mxu1 %v8401_v51 }
0x1388   : > { %7831 = vmatprep.subr.mxu1 %v8532_v1 }
0x1389   : > { %7832 = vmatpush3.msra.mxu1 %v8402_v53 }
0x138a   : > { %7834 = vmatmul.mubr.msk.f32.vlgmr.msra.gmra.mxu1 %vm458_vm1, %v7269_v52  ;;  %7847 = vmatprep.subr.mxu1 %v8532_v1 }
0x138b   : > { %7849 = vmatprep.mubr.msk.f32.mxu1 %vm8533_vm0, %v8532_v1 }
0x143a   : > { %v2604_v0 = vpop.f32.mrf.mxu1 }
0x143b   : > { %v2605_v23 = vadd.f32 %v7262_v63, %v2604_v0 }
0x143c   : > { %v7797_v2 = vpop.f32.mrf.mxu1 }
0x143d   : > { %v7264_v3 = vmul.f32 -1.442695, %v2605_v23 }
0x143f   : > { %8301 = vpow2.f32 %v7264_v3 }
0x144a   : > { %v2804_v4 = vpop.f32.mrf.mxu1 }
0x144b   : > { %v2808_v14 = vmul.f32 5.656854, %v2804_v4 }
0x144c   : > { %v8302_v5 = vpop.eup %8301  ;;  %v7835_v6 = vpop.f32.mrf.mxu1 }
0x144d   : > { %v2611_v7 = vadd.f32 1.0, %v8302_v5  ;;  %v9099_v18 = vadd.f32 %v8403_v17, %v2808_v14 }
0x144f   : > { %8303 = vrcp.f32 %v2611_v7 }
0x145c   : > { %v8304_v8 = vpop.eup %8303 }
0x145d   : > { %v2614_v9 = vmul.f32 %v8304_v8, %v2605_v23 }
0x145f   : > { %7815 = vmatmul.mubr.msk.f32.vlgmr.msra.gmra.mxu0 %vm458_vm1, %v2614_v9 }
0x1460   : > { %7837 = vmatpush3.msra.mxu0 %v2813_v10  ;;  %7844 = vmatprep.mubr.msk.f32.mxu0 %vm8533_vm0, %v8532_v1 }
0x1461   : > { %7838 = vmatprep.subr.mxu0 %v8532_v1 }
0x1462   : > { %7839 = vmatpush3.msra.mxu0 %v2812_v11 }
0x1463   : > { %7840 = vmatprep.subr.mxu0 %v8532_v1 }
0x1464   : > { %7841 = vmatpush3.msra.mxu0 %v2811_v15 }
0x1465   : > { %7842 = vmatprep.subr.mxu0 %v8532_v1 }
0x1466   : > { %7843 = vmatpush3.msra.mxu0 %v2810_v16 }
0x1467   : > { %7845 = vmatmul.mubr.msk.f32.vlgmr.msra.gmra.mxu0 %vm546_vm3, %v9099_v18  ;;  %7857 = vmatprep.subr.mxu0 %v8532_v1 }
0x1468   : > { %7859 = vmatprep.mubr.msk.f32.mxu0 %vm8533_vm0, %v8532_v1 }
0x151f   : > { %v9107_v19 = vpop.f32.mrf.mxu0 }
0x1521   : > { %v7816_v20 = vpop.f32.mrf.mxu0 }
0x1527   : > { %v2890_v22 = vpop.f32.mrf.mxu0 }
0x1528   : > { %v9109_v24 = vadd.f32 %v7271_v21, %v2890_v22 }
0x1529   : > { %v7846_v25 = vpop.f32.mrf.mxu0 }
0x152a   : > { %3067 = vrot.lane.b32.xlu0 %v9109_v24, %s9756_s1  ;;  %2900 = vrot.lane.b32.xlu1 %v9109_v24, %s9742_s28 }
0x152e   : > { %3234 = vrot.lane.b32.xlu0 %v9109_v24, %s9746_s12  ;;  %3065 = vrot.lane.b32.xlu1 %v9109_v24, %s9744_s30 }
0x1532   : > { %3401 = vrot.lane.b32.xlu0 %v9109_v24, %s9747_s26  ;;  %3232 = vrot.lane.b32.xlu1 %v9109_v24, %s9743_s29 }
0x1536   : > { %3399 = vrot.lane.b32.xlu1 %v9109_v24, %s9745_s18 }
0x159c   : > { %v3068_v27 = vpop.permute.xlu0 %3067  ;;  %v2901_v28 = vpop.permute.xlu1 %2900 }
0x159d   : > { %7848 = vmatpush3.xpose.msk.msra.mxu1 %vm628_vm4, %v2901_v28  ;;  %7858 = vmatpush3.xpose.msk.msra.mxu0 %vm628_vm4, %v3068_v27 }
0x159e   : > { %7867 = vmatprep.subr.mxu0 %v8532_v1  ;;  %7852 = vmatprep.subr.mxu1 %v8532_v1 }
0x15a0   : > { %v3235_v29 = vpop.permute.xlu0 %3234  ;;  %7850 = vmatmul.mubr.msk.f32.vlgmr.msra.gmra.mxu1 %vm628_vm4, %v9109_v24  ;;  %v3066_v30 = vpop.permute.xlu1 %3065 }
0x15a1   : > { %7860 = vmatmul.mubr.msk.f32.vlgmr.msra.gmra.mxu0 %vm628_vm4, %v3066_v30  ;;  %7854 = vmatprep.mubr.msk.f32.mxu1 %vm8533_vm0, %v8532_v1 }
0x15a2   : > { %7868 = vmatpush3.xpose.msk.msra.mxu0 %vm628_vm4, %v3235_v29  ;;  %7869 = vmatprep.mubr.msk.f32.mxu0 %vm8533_vm0, %v8532_v1 }
0x15a3   : > { %7877 = vmatprep.subr.mxu0 %v8532_v1 }
0x15a4   : > { %v3402_v31 = vpop.permute.xlu0 %3401  ;;  %v3233_v32 = vpop.permute.xlu1 %3232 }
0x15a5   : > { %7870 = vmatmul.mubr.msk.f32.vlgmr.msra.gmra.mxu0 %vm628_vm4, %v3233_v32 }
0x15a6   : > { %7878 = vmatpush3.xpose.msk.msra.mxu0 %vm628_vm4, %v3402_v31  ;;  %7879 = vmatprep.mubr.msk.f32.mxu0 %vm8533_vm0, %v8532_v1 }
0x15a7   : > { %7887 = vmatprep.subr.mxu0 %v8532_v1 }
0x15a8   : > { %v3400_v26 = vpop.permute.xlu1 %3399 }
0x15a9   : > { %7880 = vmatmul.mubr.msk.f32.vlgmr.msra.gmra.mxu0 %vm628_vm4, %v3400_v26 }
0x15aa   : > { %7895 = vmatprep.mubr.msk.f32.mxu0 %vm8533_vm0, %v8532_v1  ;;  %7888 = vmatpush3.msra.mxu0 %v2897_v33  ;;  %v7288_v33 = vld [vmem:[#allocation5 + $0x13] ss:$0 sm:$0xff] }
0x15ab   : > { %7889 = vmatprep.subr.mxu0 %v8532_v1 }
0x1660   : > { %v2972_v55 = vpop.f32.mrf.mxu1 }
0x1661   : > { %v2976_v34 = vmul.f32 0.35355338, %v2972_v55  ;;  %v3139_v37 = vpop.f32.mrf.mxu0  ;;  %v2896_v55 = vld [vmem:[#allocation2 + $0x168] sm:$0xff] }
0x1662   : > { %v3143_v38 = vmul.f32 0.35355338, %v3139_v37  ;;  %v7851_v39 = vpop.f32.mrf.mxu1  ;;  %7890 = vmatpush3.msra.mxu0 %v2896_v55  ;;  %v2894_v37 = vld [vmem:[#allocation2 + $0x38] sm:$0xff] }
0x1663   : > { %v7861_v40 = vpop.f32.mrf.mxu0  ;;  %v2977_v41 = vadd.f32 %v2976_v34, %v9148_v36  ;;  %7891 = vmatprep.subr.mxu0 %v8532_v1 }
0x1664   : > { %v3144_v42 = vadd.f32 %v3143_v38, %v9148_v36  ;;  %7892 = vmatpush3.msra.mxu0 %v2895_v35 }
0x1665   : > { %v3306_v44 = vpop.f32.mrf.mxu0  ;;  %v2978_v45 = vsel %vm628_vm4, %v2977_v41, -inf  ;;  %7893 = vmatprep.subr.mxu0 %v8532_v1 }
0x1666   : > { %v3310_v46 = vmul.f32 0.35355338, %v3306_v44  ;;  %2979 = vmax.xlane.f32.xlu0 %v2978_v45  ;;  %v3145_v12 = vsel %vm628_vm4, %v3144_v42, -inf  ;;  %7894 = vmatpush3.msra.mxu0 %v2894_v37 }
0x1667   : > { %3146 = vmax.xlane.f32.xlu1 %v3145_v12  ;;  %v7871_v47 = vpop.f32.mrf.mxu0  ;;  %7909 = vmatprep.subr.mxu0 %v8532_v1 }
0x1668   : > { %v3311_v48 = vadd.f32 %v3310_v46, %v9148_v36  ;;  %v7265_v46 = vld [vmem:[#allocation5 + $0xd] ss:$0 sm:$0xff] }
0x1669   : > { %v3473_v49 = vpop.f32.mrf.mxu0  ;;  %v2691_v12 = vadd.f32 %v7265_v46, %v9107_v19 }
0x166a   : > { %v3477_v50 = vmul.f32 0.35355338, %v3473_v49  ;;  %v3312_v51 = vsel %vm628_vm4, %v3311_v48, -inf }
0x166b   : > { %3313 = vmax.xlane.f32.xlu0 %v3312_v51  ;;  %v7881_v52 = vpop.f32.mrf.mxu0  ;;  %v2694_v47 = vadd.f32 %v2691_v12, %v9016_v43  ;;  %v7285_v43 = vld [vmem:[#allocation5 + $0x11] ss:$0 sm:$0xff] }
0x166c   : > { %v3478_v53 = vadd.f32 %v3477_v50, %v9148_v36 }
0x166e   : > { %v3479_v54 = vsel %vm628_vm4, %v3478_v53, -inf }
0x166f   : > { %3480 = vmax.xlane.f32.xlu0 %v3479_v54 }
0x1678   : > { %2989 = vrot.lane.b32.xlu1 %v9109_v24, %s9749_s21 }
0x16ef   : > { %v2980_v56 = vpop.xlane.xlu0 %2979 }
0x16f0   : > { %v2981_v57 = vsub.f32 %v2977_v41, %v2980_v56  ;;  %v3147_v58 = vpop.xlane.xlu1 %3146 }
0x16f1   : > { %v3148_v59 = vsub.f32 %v3144_v42, %v3147_v58 }
0x16f2   : > { %v2982_v60 = vmul.f32 1.442695, %v2981_v57 }
0x16f3   : > { %v3149_v61 = vmul.f32 1.442695, %v3148_v59 }
0x16f4   : > { %8305 = vpow2.f32 %v2982_v60  ;;  %v2990_v62 = vpop.permute.xlu1 %2989  ;;  %v3314_v63 = vpop.xlane.xlu0 %3313 }
0x16f5   : > { %8307 = vpow2.f32 %v3149_v61  ;;  %v3315_v0 = vsub.f32 %v3311_v48, %v3314_v63  ;;  %7853 = vmatpush3.msra.mxu1 %v2990_v62  ;;  %v2697_v48 = vsel %vm546_vm3, %v2694_v47, 0.0 }
0x16f6   : > { %7862 = vmatprep.subr.mxu1 %v8532_v1 }
0x16f7   : > { %v3316_v23 = vmul.f32 1.442695, %v3315_v0 }
0x16f8   : > { %v3481_v2 = vpop.xlane.xlu0 %3480 }
0x16f9   : > { %8309 = vpow2.f32 %v3316_v23  ;;  %v3482_v3 = vsub.f32 %v3478_v53, %v3481_v2  ;;  %v3777_v23 = vld [vmem:[#allocation2 + $0x210] sm:$0xff]  ;;  %v3776_v2 = vld [vmem:[#allocation2 + $0x178] sm:$0xff] }
0x16fb   : > { %v3483_v4 = vmul.f32 1.442695, %v3482_v3  ;;  %v3775_v3 = vld [vmem:[#allocation2 + $0xe0] sm:$0xff] }
0x16fd   : > { %8311 = vpow2.f32 %v3483_v4  ;;  %v3774_v4 = vld [vmem:[#allocation2 + $0x48] sm:$0xff] }
0x1701   : > { %v8306_v5 = vpop.eup %8305 }
0x1702   : > { %v8308_v6 = vpop.eup %8307  ;;  %v2984_v7 = vsel %vm628_vm4, %v8306_v5, 0.0 }
0x1703   : > { %2985 = vadd.xlane.f32.xlu1 %v2984_v7  ;;  %v3151_v8 = vsel %vm628_vm4, %v8308_v6, 0.0 }
0x1704   : > { %3152 = vadd.xlane.f32.xlu0 %v3151_v8 }
0x1706   : > { %v8310_v9 = vpop.eup %8309 }
0x1707   : > { %v3318_v10 = vsel %vm628_vm4, %v8310_v9, 0.0 }
0x1708   : > { %3319 = vadd.xlane.f32.xlu1 %v3318_v10 }
0x170a   : > { %v8312_v11 = vpop.eup %8311 }
0x170b   : > { %v3485_v14 = vsel %vm628_vm4, %v8312_v11, 0.0 }
0x170c   : > { %3486 = vadd.xlane.f32.xlu0 %v3485_v14 }
0x1719   : > { %3323 = vrot.lane.b32.xlu1 %v9109_v24, %s9750_s27 }
0x171d   : > { %3490 = vrot.lane.b32.xlu1 %v9109_v24, %s9751_s0 }
0x1722   : > { %3156 = vrot.lane.b32.xlu0 %v9109_v24, %s9748_s20 }
0x178c   : > { %v2986_v15 = vpop.xlane.xlu1 %2985 }
0x178d   : > { %8313 = vrcp.f32 %v2986_v15  ;;  %v3153_v16 = vpop.xlane.xlu0 %3152  ;;  %v7267_v15 = vld [vmem:[#allocation5 + $0xe] ss:$0 sm:$0xff] }
0x178e   : > { %8315 = vrcp.f32 %v3153_v16 }
0x1791   : > { %v3320_v17 = vpop.xlane.xlu1 %3319 }
0x1792   : > { %8317 = vrcp.f32 %v3320_v17  ;;  %v7268_v17 = vld [vmem:[#allocation5 + $0xf] ss:$0 sm:$0xff] }
0x1795   : > { %v3487_v20 = vpop.xlane.xlu0 %3486  ;;  %v3324_v28 = vpop.permute.xlu1 %3323 }
0x1796   : > { %8319 = vrcp.f32 %v3487_v20 }
0x1799   : > { %v3157_v27 = vpop.permute.xlu0 %3156  ;;  %v3491_v32 = vpop.permute.xlu1 %3490 }
0x179a   : > { %v8314_v21 = vpop.eup %8313 }
0x179b   : > { %v2988_v22 = vmul.f32 %v8314_v21, %v8306_v5  ;;  %v8316_v25 = vpop.eup %8315 }
0x179c   : > { %v3155_v24 = vmul.f32 %v8316_v25, %v8308_v6  ;;  %v3692_v25 = vld [vmem:[#allocation2 + $0x170] sm:$0xff] }
0x179d   : > { %7855 = vmatmul.mubr.msk.f32.vlgmr.msra.gmra.mxu1 %vm628_vm4, %v2988_v22  ;;  %v3693_v22 = vld [vmem:[#allocation2 + $0x208] sm:$0xff] }
0x179e   : > { %7863 = vmatpush3.msra.mxu1 %v3157_v27  ;;  %7864 = vmatprep.mubr.msk.f32.mxu1 %vm8533_vm0, %v8532_v1  ;;  %v3691_v27 = vld [vmem:[#allocation2 + $0xd8] sm:$0xff] }
0x179f   : > { %7872 = vmatprep.subr.mxu1 %v8532_v1  ;;  %v8318_v29 = vpop.eup %8317 }
0x17a0   : > { %v3322_v30 = vmul.f32 %v8318_v29, %v8310_v9 }
0x17a1   : > { %7865 = vmatmul.mubr.msk.f32.vlgmr.msra.gmra.mxu1 %vm628_vm4, %v3155_v24 }
0x17a2   : > { %7873 = vmatpush3.msra.mxu1 %v3324_v28  ;;  %7874 = vmatprep.mubr.msk.f32.mxu1 %vm8533_vm0, %v8532_v1  ;;  %v3690_v28 = vld [vmem:[#allocation2 + $0x40] sm:$0xff] }
0x17a3   : > { %7882 = vmatprep.subr.mxu1 %v8532_v1  ;;  %v8320_v31 = vpop.eup %8319 }
0x17a4   : > { %v3489_v26 = vmul.f32 %v8320_v31, %v8312_v11 }
0x17a5   : > { %7875 = vmatmul.mubr.msk.f32.vlgmr.msra.gmra.mxu1 %vm628_vm4, %v3322_v30 }
0x17a6   : > { %7883 = vmatpush3.msra.mxu1 %v3491_v32  ;;  %7884 = vmatprep.mubr.msk.f32.mxu1 %vm8533_vm0, %v8532_v1  ;;  %v7287_v32 = vld [vmem:[#allocation5 + $0x12] ss:$0 sm:$0xff] }
0x17a7   : > { %7898 = vmatprep.subr.mxu1 %v8532_v1 }
0x17a9   : > { %7885 = vmatmul.mubr.msk.f32.vlgmr.msra.gmra.mxu1 %vm628_vm4, %v3489_v26 }
0x17aa   : > { %7906 = vmatprep.mubr.msk.f32.mxu1 %vm8533_vm0, %v8532_v1  ;;  %7899 = vmatpush3.msra.mxu1 %v3693_v22 }
0x17ab   : > { %7900 = vmatprep.subr.mxu1 %v8532_v1 }
0x17ac   : > { %7901 = vmatpush3.msra.mxu1 %v3692_v25 }
0x17ad   : > { %7902 = vmatprep.subr.mxu1 %v8532_v1 }
0x17ae   : > { %7903 = vmatpush3.msra.mxu1 %v3691_v27 }
0x17af   : > { %7904 = vmatprep.subr.mxu1 %v8532_v1 }
0x17b0   : > { %7905 = vmatpush3.msra.mxu1 %v3690_v28 }
0x17b1   : > { %7920 = vmatprep.subr.mxu1 %v8532_v1 }
0x185d   : > { %v3061_v34 = vpop.f32.mrf.mxu1 }
0x185f   : > { %v7856_v38 = vpop.f32.mrf.mxu1 }
0x1861   : > { %v3228_v39 = vpop.f32.mrf.mxu1 }
0x1862   : > { %3567 = vrot.lane.b32.xlu0 %v3228_v39, %s9752_s3 }
0x1863   : > { %v7866_v40 = vpop.f32.mrf.mxu1 }
0x1865   : > { %v3395_v41 = vpop.f32.mrf.mxu1 }
0x1866   : > { %3571 = vrot.lane.b32.xlu1 %v3395_v41, %s9753_s6  ;;  %v7289_v41 = vld [vmem:[#allocation5 + $0x14] ss:$0 sm:$0xff] }
0x1867   : > { %v7876_v42 = vpop.f32.mrf.mxu1 }
0x1869   : > { %v3562_v44 = vpop.f32.mrf.mxu1 }
0x186a   : > { %3575 = vrot.lane.b32.xlu0 %v3562_v44, %s9754_s8 }
0x186b   : > { %v7886_v45 = vpop.f32.mrf.mxu1 }
0x188a   : > { %2698 = vadd.xlane.f32.xlu1 %v2697_v48 }
0x18d4   : > { %v3568_v49 = vpop.permute.xlu0 %3567 }
0x18d5   : > { %v3578_v51 = vsel %vm628_vm4, %v3061_v34, %v3568_v49  ;;  %v7291_v34 = vld [vmem:[#allocation5 + $0x15] ss:$0 sm:$0xff] }
0x18d8   : > { %v3572_v50 = vpop.permute.xlu1 %3571 }
0x18d9   : > { %v3579_v52 = vsel %vm1312_vm5, %v3578_v51, %v3572_v50 }
0x18dc   : > { %v3576_v53 = vpop.permute.xlu0 %3575 }
0x18dd   : > { %v3580_v54 = vsel %vm1314_vm6, %v3579_v52, %v3576_v53  ;;  %v9259_v53 = vld [vmem:[%s8796_s11] ss:$0 sm:$0xff]  ;;  %s433_s11 = scalar_lea.vmem %s9671_s2, %s8701_s25  ;;  %s7366_s25 = sshll.u32 %s8626_s17, 7 }
0x18de   : > { %7896 = vmatmul.mubr.msk.f32.vlgmr.msra.gmra.mxu0 %vm546_vm3, %v3580_v54  ;;  %s9624_s5 = scalar_lea.hbm %s9678_s9, %s7366_s25 }
0x18df   : > { %7917 = vmatprep.mubr.msk.f32.mxu0 %vm8533_vm0, %v8532_v1  ;;  %7910 = vmatpush3.msra.mxu0 %v3777_v23 }
0x18e0   : > { %7911 = vmatprep.subr.mxu0 %v8532_v1 }
0x18e1   : > { %7912 = vmatpush3.msra.mxu0 %v3776_v2 }
0x18e2   : > { %7913 = vmatprep.subr.mxu0 %v8532_v1 }
0x18e3   : > { %7914 = vmatpush3.msra.mxu0 %v3775_v3 }
0x18e4   : > { %7915 = vmatprep.subr.mxu0 %v8532_v1 }
0x18e5   : > { %7916 = vmatpush3.msra.mxu0 %v3774_v4 }
0x18e6   : > { %7930 = vmatprep.subr.mxu0 %v8532_v1 }
0x1913   : > { %v2699_v19 = vpop.xlane.xlu1 %2698 }
0x1914   : > { %v2700_v56 = vmul.f32 0.03125, %v2699_v19 }
0x1916   : > { %v2701_v58 = vsub.f32 %v2694_v47, %v2700_v56 }
0x1918   : > { %v2702_v63 = vmul.f32 %v2701_v58, %v2701_v58 }
0x191a   : > { %v2703_v0 = vsel %vm546_vm3, %v2702_v63, 0.0 }
0x199e   : > { %v3656_v57 = vpop.f32.mrf.mxu0 }
0x199f   : > { %v3657_v59 = vadd.f32 %v7285_v43, %v3656_v57 }
0x19a0   : > { %v7897_v60 = vpop.f32.mrf.mxu0 }
0x19a1   : > { %v3660_v61 = vadd.f32 %v3657_v59, %v9099_v18 }
0x19a3   : > { %v3663_v62 = vsel %vm546_vm3, %v3660_v61, 0.0 }
0x19a4   : > { %3664 = vadd.xlane.f32.xlu0 %v3663_v62 }
0x19a8   : > { %2704 = vadd.xlane.f32.xlu0 %v2703_v0 }
0x1a2d   : > { %v3665_v18 = vpop.xlane.xlu0 %3664 }
0x1a2e   : > { %v3666_v5 = vmul.f32 0.03125, %v3665_v18 }
0x1a30   : > { %v3667_v6 = vsub.f32 %v3660_v61, %v3666_v5 }
0x1a31   : > { %v2705_v7 = vpop.xlane.xlu0 %2704 }
0x1a32   : > { %v2706_v8 = vmul.f32 0.03125, %v2705_v7  ;;  %v3668_v9 = vmul.f32 %v3667_v6, %v3667_v6 }
0x1a34   : > { %v2707_v10 = vadd.f32 1e-05, %v2706_v8  ;;  %v3669_v11 = vsel %vm546_vm3, %v3668_v9, 0.0 }
0x1a35   : > { %3670 = vadd.xlane.f32.xlu1 %v3669_v11 }
0x1a36   : > { %8321 = vrsqrt.f32 %v2707_v10 }
0x1a43   : > { %v8322_v14 = vpop.eup %8321 }
0x1a44   : > { %v2709_v16 = vmul.f32 %v8322_v14, %v2701_v58 }
0x1a46   : > { %v2716_v20 = vmul.f32 %v7267_v15, %v2709_v16 }
0x1a48   : > { %v9210_v21 = vadd.f32 %v7268_v17, %v2716_v20 }
0x1a4a   : > { %7918 = vmatmul.mubr.msk.f32.vlgmr.msra.gmra.mxu0 %vm546_vm3, %v9210_v21 }
0x1a4b   : > { %7932 = vmatprep.mubr.msk.f32.mxu0 %vm8533_vm0, %v8532_v1 }
0x1abe   : > { %v3671_v24 = vpop.xlane.xlu1 %3670 }
0x1abf   : > { %v3672_v29 = vmul.f32 0.03125, %v3671_v24 }
0x1ac1   : > { %v3673_v30 = vadd.f32 1e-05, %v3672_v29 }
0x1ac3   : > { %8323 = vrsqrt.f32 %v3673_v30 }
0x1ad0   : > { %v8324_v31 = vpop.eup %8323 }
0x1ad1   : > { %v3675_v26 = vmul.f32 %v8324_v31, %v3667_v6 }
0x1ad3   : > { %v3682_v55 = vmul.f32 %v7287_v32, %v3675_v26 }
0x1ad5   : > { %v9220_v35 = vadd.f32 %v7288_v33, %v3682_v55 }
0x1ad7   : > { %7907 = vmatmul.mubr.msk.f32.vlgmr.msra.gmra.mxu1 %vm546_vm3, %v9220_v35 }
0x1ad8   : > { %7922 = vmatprep.mubr.msk.f32.mxu1 %vm8533_vm0, %v8532_v1 }
0x1b0a   : > { %v3854_v37 = vpop.f32.mrf.mxu0 }
0x1b0b   : > { %v9226_v38 = vadd.f32 %v7291_v34, %v3854_v37 }
0x1b0c   : > { %v7919_v39 = vpop.f32.mrf.mxu0 }
0x1b0d   : > { %4030 = vrot.lane.b32.xlu0 %v9226_v38, %s9744_s30  ;;  %7921 = vmatpush3.xpose.msk.msra.mxu1 %vm628_vm4, %v9226_v38 }
0x1b0e   : > { %7925 = vmatprep.subr.mxu1 %v8532_v1 }
0x1b7f   : > { %v4031_v40 = vpop.permute.xlu0 %4030 }
0x1b80   : > { %7931 = vmatpush3.xpose.msk.msra.mxu0 %vm628_vm4, %v4031_v40 }
0x1b81   : > { %7940 = vmatprep.subr.mxu0 %v8532_v1 }
0x1b97   : > { %v3770_v42 = vpop.f32.mrf.mxu1 }
0x1b98   : > { %v3771_v44 = vadd.f32 %v7289_v41, %v3770_v42 }
0x1b99   : > { %v7908_v45 = vpop.f32.mrf.mxu1 }
0x1b9a   : > { %4028 = vrot.lane.b32.xlu1 %v3771_v44, %s9744_s30  ;;  %4195 = vrot.lane.b32.xlu0 %v3771_v44, %s9743_s29 }
0x1b9b   : > { %7923 = vmatmul.mubr.msk.f32.vlgmr.msra.gmra.mxu1 %vm628_vm4, %v3771_v44 }
0x1b9c   : > { %7927 = vmatprep.mubr.msk.f32.mxu1 %vm8533_vm0, %v8532_v1 }
0x1b9e   : > { %4197 = vrot.lane.b32.xlu1 %v9226_v38, %s9743_s29  ;;  %4362 = vrot.lane.b32.xlu0 %v3771_v44, %s9745_s18 }
0x1ba2   : > { %4364 = vrot.lane.b32.xlu1 %v9226_v38, %s9745_s18 }
0x1c0c   : > { %v4029_v46 = vpop.permute.xlu1 %4028  ;;  %v4196_v47 = vpop.permute.xlu0 %4195 }
0x1c0d   : > { %7933 = vmatmul.mubr.msk.f32.vlgmr.msra.gmra.mxu0 %vm628_vm4, %v4029_v46 }
0x1c0e   : > { %7942 = vmatprep.mubr.msk.f32.mxu0 %vm8533_vm0, %v8532_v1 }
0x1c10   : > { %v4198_v12 = vpop.permute.xlu1 %4197  ;;  %v4363_v49 = vpop.permute.xlu0 %4362 }
0x1c11   : > { %7941 = vmatpush3.xpose.msk.msra.mxu0 %vm628_vm4, %v4198_v12 }
0x1c12   : > { %7950 = vmatprep.subr.mxu0 %v8532_v1 }
0x1c14   : > { %v4365_v48 = vpop.permute.xlu1 %4364  ;;  %7943 = vmatmul.mubr.msk.f32.vlgmr.msra.gmra.mxu0 %vm628_vm4, %v4196_v47 }
0x1c15   : > { %7951 = vmatpush3.xpose.msk.msra.mxu0 %vm628_vm4, %v4365_v48  ;;  %7952 = vmatprep.mubr.msk.f32.mxu0 %vm8533_vm0, %v8532_v1 }
0x1c16   : > { %7960 = vmatprep.subr.mxu0 %v8532_v1 }
0x1c18   : > { %7953 = vmatmul.mubr.msk.f32.vlgmr.msra.gmra.mxu0 %vm628_vm4, %v4363_v49 }
0x1c19   : > { %7968 = vmatprep.mubr.msk.f32.mxu0 %vm8533_vm0, %v8532_v1 }
0x1c5b   : > { %v3935_v50 = vpop.f32.mrf.mxu1 }
0x1c5c   : > { %v3939_v51 = vmul.f32 0.35355338, %v3935_v50  ;;  %v3861_v50 = vld [vmem:[#allocation2 + $0x218] sm:$0xff] }
0x1c5d   : > { %v7924_v52 = vpop.f32.mrf.mxu1  ;;  %7961 = vmatpush3.msra.mxu0 %v3861_v50 }
0x1c5e   : > { %v3940_v54 = vadd.f32 %v9259_v53, %v3939_v51  ;;  %7962 = vmatprep.subr.mxu0 %v8532_v1  ;;  %v3860_v51 = vld [vmem:[#allocation2 + $0x180] sm:$0xff]  ;;  %v3859_v52 = vld [vmem:[#allocation2 + $0xe8] sm:$0xff] }
0x1c5f   : > { %7963 = vmatpush3.msra.mxu0 %v3860_v51 }
0x1c60   : > { %v3941_v19 = vsel %vm628_vm4, %v3940_v54, -inf  ;;  %7964 = vmatprep.subr.mxu0 %v8532_v1 }
0x1c61   : > { %3942 = vmax.xlane.f32.xlu1 %v3941_v19  ;;  %7965 = vmatpush3.msra.mxu0 %v3859_v52 }
0x1c62   : > { %7966 = vmatprep.subr.mxu0 %v8532_v1 }
0x1ccd   : > { %v4102_v56 = vpop.f32.mrf.mxu0 }
0x1cce   : > { %v4106_v43 = vmul.f32 0.35355338, %v4102_v56 }
0x1ccf   : > { %v7934_v57 = vpop.f32.mrf.mxu0 }
0x1cd0   : > { %v4107_v58 = vadd.f32 %v9259_v53, %v4106_v43 }
0x1cd2   : > { %v4108_v59 = vsel %vm628_vm4, %v4107_v58, -inf }
0x1cd3   : > { %4109 = vmax.xlane.f32.xlu0 %v4108_v59 }
0x1cd4   : > { %v4269_v60 = vpop.f32.mrf.mxu0 }
0x1cd5   : > { %v4273_v61 = vmul.f32 0.35355338, %v4269_v60 }
0x1cd6   : > { %v7944_v62 = vpop.f32.mrf.mxu0 }
0x1cd7   : > { %v4274_v63 = vadd.f32 %v9259_v53, %v4273_v61 }
0x1cd8   : > { %v4436_v0 = vpop.f32.mrf.mxu0 }
0x1cd9   : > { %v4440_v23 = vmul.f32 0.35355338, %v4436_v0  ;;  %v4275_v2 = vsel %vm628_vm4, %v4274_v63, -inf }
0x1cda   : > { %4276 = vmax.xlane.f32.xlu0 %v4275_v2  ;;  %v7954_v3 = vpop.f32.mrf.mxu0  ;;  %v7305_v2 = vld [vmem:[#allocation5 + $0x16] ss:$0 sm:$0xff] }
0x1cdb   : > { %v4441_v4 = vadd.f32 %v9259_v53, %v4440_v23 }
0x1cdd   : > { %v4442_v18 = vsel %vm628_vm4, %v4441_v4, -inf }
0x1cde   : > { %4443 = vmax.xlane.f32.xlu1 %v4442_v18 }
0x1cea   : > { %v3943_v5 = vpop.xlane.xlu1 %3942 }
0x1ceb   : > { %v3944_v6 = vsub.f32 %v3940_v54, %v3943_v5  ;;  %v3858_v54 = vld [vmem:[#allocation2 + $0x50] sm:$0xff] }
0x1cec   : > { %7967 = vmatpush3.msra.mxu0 %v3858_v54 }
0x1ced   : > { %v3945_v7 = vmul.f32 1.442695, %v3944_v6  ;;  %7982 = vmatprep.subr.mxu0 %v8532_v1 }
0x1cef   : > { %8325 = vpow2.f32 %v3945_v7  ;;  %4119 = vrot.lane.b32.xlu1 %v9226_v38, %s9756_s1 }
0x1cfc   : > { %v8326_v8 = vpop.eup %8325 }
0x1cfd   : > { %v3947_v9 = vsel %vm628_vm4, %v8326_v8, 0.0 }
0x1cfe   : > { %3948 = vadd.xlane.f32.xlu0 %v3947_v9 }
0x1d14   : > { %3952 = vrot.lane.b32.xlu0 %v9226_v38, %s9742_s28 }
0x1d5c   : > { %v4110_v10 = vpop.xlane.xlu0 %4109 }
0x1d5d   : > { %v4111_v11 = vsub.f32 %v4107_v58, %v4110_v10 }
0x1d5f   : > { %v4112_v14 = vmul.f32 1.442695, %v4111_v11 }
0x1d61   : > { %8327 = vpow2.f32 %v4112_v14  ;;  %v4656_v14 = vld [vmem:[#allocation2 + $0x220] sm:$0xff] }
0x1d63   : > { %v4277_v15 = vpop.xlane.xlu0 %4276 }
0x1d64   : > { %v4278_v16 = vsub.f32 %v4274_v63, %v4277_v15  ;;  %v4655_v15 = vld [vmem:[#allocation2 + $0x188] sm:$0xff] }
0x1d66   : > { %v4279_v17 = vmul.f32 1.442695, %v4278_v16  ;;  %v4654_v16 = vld [vmem:[#allocation2 + $0xf0] sm:$0xff] }
0x1d67   : > { %v4444_v20 = vpop.xlane.xlu1 %4443 }
0x1d68   : > { %8329 = vpow2.f32 %v4279_v17  ;;  %v4445_v22 = vsub.f32 %v4441_v4, %v4444_v20 }
0x1d6a   : > { %v4446_v25 = vmul.f32 1.442695, %v4445_v22 }
0x1d6b   : > { %v4120_v34 = vpop.permute.xlu1 %4119 }
0x1d6c   : > { %8331 = vpow2.f32 %v4446_v25 }
0x1d6e   : > { %v8328_v27 = vpop.eup %8327 }
0x1d6f   : > { %v4114_v28 = vsel %vm628_vm4, %v8328_v27, 0.0 }
0x1d70   : > { %4115 = vadd.xlane.f32.xlu1 %v4114_v28 }
0x1d75   : > { %v8330_v24 = vpop.eup %8329 }
0x1d76   : > { %v4281_v29 = vsel %vm628_vm4, %v8330_v24, 0.0 }
0x1d77   : > { %4282 = vadd.xlane.f32.xlu0 %v4281_v29 }
0x1d79   : > { %v8332_v30 = vpop.eup %8331 }
0x1d7a   : > { %v4448_v31 = vsel %vm628_vm4, %v8332_v30, 0.0 }
0x1d7b   : > { %4449 = vadd.xlane.f32.xlu1 %v4448_v31  ;;  %v4665_v31 = vld [vmem:[%s9676_s7 + $0xf0] sm:$0xff] }
0x1d87   : > { %v3949_v32 = vpop.xlane.xlu0 %3948 }
0x1d88   : > { %8333 = vrcp.f32 %v3949_v32  ;;  %v4664_v32 = vld [vmem:[%s9676_s7 + $0xd0] sm:$0xff] }
0x1d8b   : > { %v3953_v26 = vpop.permute.xlu0 %3952 }
0x1d8c   : > { %7926 = vmatpush3.msra.mxu1 %v3953_v26  ;;  %4286 = vrot.lane.b32.xlu1 %v9226_v38, %s9746_s12  ;;  %v4663_v26 = vld [vmem:[%s9676_s7 + $0xb0] sm:$0xff] }
0x1d8d   : > { %4453 = vrot.lane.b32.xlu0 %v9226_v38, %s9747_s26  ;;  %7935 = vmatprep.subr.mxu1 %v8532_v1 }
0x1d95   : > { %v8334_v33 = vpop.eup %8333 }
0x1d96   : > { %v3951_v55 = vmul.f32 %v8334_v33, %v8326_v8  ;;  %v4662_v33 = vld [vmem:[%s9676_s7 + $0x90] sm:$0xff] }
0x1d98   : > { %7928 = vmatmul.mubr.msk.f32.vlgmr.msra.gmra.mxu1 %vm628_vm4, %v3951_v55  ;;  %v4661_v55 = vld [vmem:[%s9676_s7 + $0x70] sm:$0xff] }
0x1d99   : > { %7936 = vmatpush3.msra.mxu1 %v4120_v34  ;;  %7937 = vmatprep.mubr.msk.f32.mxu1 %vm8533_vm0, %v8532_v1  ;;  %v4660_v34 = vld [vmem:[%s9676_s7 + $0x50] sm:$0xff] }
0x1d9a   : > { %7945 = vmatprep.subr.mxu1 %v8532_v1 }
0x1df9   : > { %v4116_v37 = vpop.xlane.xlu1 %4115 }
0x1dfa   : > { %8335 = vrcp.f32 %v4116_v37  ;;  %v4659_v37 = vld [vmem:[%s9676_s7 + $0x30] sm:$0xff] }
0x1e00   : > { %v4283_v39 = vpop.xlane.xlu0 %4282 }
0x1e01   : > { %8337 = vrcp.f32 %v4283_v39  ;;  %v4658_v39 = vld [vmem:[%s9676_s7 + $0x10] sm:$0xff] }
0x1e04   : > { %v4450_v40 = vpop.xlane.xlu1 %4449  ;;  %v4454_v46 = vpop.permute.xlu0 %4453 }
0x1e05   : > { %8339 = vrcp.f32 %v4450_v40  ;;  %v7309_v40 = vld [vmem:[#allocation5 + $0x19] ss:$0 sm:$0xff] }
0x1e07   : > { %v8336_v38 = vpop.eup %8335 }
0x1e08   : > { %v4287_v41 = vpop.permute.xlu1 %4286  ;;  %v4118_v42 = vmul.f32 %v8336_v38, %v8328_v27  ;;  %v7307_v27 = vld [vmem:[#allocation5 + $0x17] ss:$0 sm:$0xff] }
0x1e0a   : > { %7938 = vmatmul.mubr.msk.f32.vlgmr.msra.gmra.mxu1 %vm628_vm4, %v4118_v42 }
0x1e0b   : > { %7946 = vmatpush3.msra.mxu1 %v4287_v41  ;;  %7947 = vmatprep.mubr.msk.f32.mxu1 %vm8533_vm0, %v8532_v1 }
0x1e0c   : > { %7955 = vmatprep.subr.mxu1 %v8532_v1 }
0x1e0e   : > { %v8338_v44 = vpop.eup %8337 }
0x1e0f   : > { %v4285_v45 = vmul.f32 %v8338_v44, %v8330_v24  ;;  %v7308_v24 = vld [vmem:[#allocation5 + $0x18] ss:$0 sm:$0xff] }
0x1e11   : > { %7948 = vmatmul.mubr.msk.f32.vlgmr.msra.gmra.mxu1 %vm628_vm4, %v4285_v45 }
0x1e12   : > { %v8340_v12 = vpop.eup %8339  ;;  %7956 = vmatpush3.msra.mxu1 %v4454_v46  ;;  %7957 = vmatprep.mubr.msk.f32.mxu1 %vm8533_vm0, %v8532_v1 }
0x1e13   : > { %v4452_v47 = vmul.f32 %v8340_v12, %v8332_v30  ;;  %7971 = vmatprep.subr.mxu1 %v8532_v1 }
0x1e15   : > { %7958 = vmatmul.mubr.msk.f32.vlgmr.msra.gmra.mxu1 %vm628_vm4, %v4452_v47 }
0x1e16   : > { %7979 = vmatprep.mubr.msk.f32.mxu1 %vm8533_vm0, %v8532_v1  ;;  %7972 = vmatpush3.msra.mxu1 %v4656_v14 }
0x1e17   : > { %7973 = vmatprep.subr.mxu1 %v8532_v1 }
0x1e18   : > { %7974 = vmatpush3.msra.mxu1 %v4655_v15 }
0x1e19   : > { %7975 = vmatprep.subr.mxu1 %v8532_v1 }
0x1e1a   : > { %7976 = vmatpush3.msra.mxu1 %v4654_v16 }
0x1e1b   : > { %7977 = vmatprep.subr.mxu1 %v8532_v1 }
0x1e58   : > { %v4024_v48 = vpop.f32.mrf.mxu1 }
0x1e5a   : > { %v7929_v49 = vpop.f32.mrf.mxu1 }
0x1eca   : > { %v4191_v19 = vpop.f32.mrf.mxu1 }
0x1ecb   : > { %4530 = vrot.lane.b32.xlu1 %v4191_v19, %s9752_s3 }
0x1ecc   : > { %v7939_v56 = vpop.f32.mrf.mxu1 }
0x1ed1   : > { %v4358_v43 = vpop.f32.mrf.mxu1 }
0x1ed2   : > { %4534 = vrot.lane.b32.xlu0 %v4358_v43, %s9753_s6 }
0x1ed3   : > { %v7949_v57 = vpop.f32.mrf.mxu1 }
0x1ed5   : > { %v4525_v58 = vpop.f32.mrf.mxu1 }
0x1ed6   : > { %4538 = vrot.lane.b32.xlu1 %v4525_v58, %s9754_s8 }
0x1ed7   : > { %v7959_v59 = vpop.f32.mrf.mxu1 }
0x1ed8   : > { %v4865_v59 = vld [vmem:[#allocation2 + $0x228] sm:$0xff] }
0x1f3d   : > { %v4531_v60 = vpop.permute.xlu1 %4530 }
0x1f3e   : > { %v4541_v62 = vsel %vm628_vm4, %v4024_v48, %v4531_v60  ;;  %v7312_v48 = vld [vmem:[#allocation5 + $0x1a] ss:$0 sm:$0xff]  ;;  %v4864_v60 = vld [vmem:[#allocation2 + $0x190] sm:$0xff] }
0x1f44   : > { %v4535_v61 = vpop.permute.xlu0 %4534 }
0x1f45   : > { %v4542_v63 = vsel %vm1312_vm5, %v4541_v62, %v4535_v61  ;;  %v4863_v61 = vld [vmem:[#allocation2 + $0xf8] sm:$0xff]  ;;  %v4862_v62 = vld [vmem:[#allocation2 + $0x60] sm:$0xff] }
0x1f48   : > { %v4539_v0 = vpop.permute.xlu1 %4538 }
0x1f49   : > { %v4543_v23 = vsel %vm1314_vm6, %v4542_v63, %v4539_v0 }
0x1f4a   : > { %7969 = vmatmul.mubr.msk.f32.vlgmr.msra.gmra.mxu0 %vm546_vm3, %v4543_v23 }
0x1f4b   : > { %7998 = vmatprep.mubr.msk.f32.mxu0 %vm8533_vm0, %v8532_v1  ;;  %7983 = vmatpush3.msra.mxu0 %v4665_v31 }
0x1f4c   : > { %7984 = vmatprep.subr.mxu0 %v8532_v1 }
0x1f4d   : > { %7985 = vmatpush3.msra.mxu0 %v4664_v32 }
0x1f4e   : > { %7986 = vmatprep.subr.mxu0 %v8532_v1 }
0x1f4f   : > { %7987 = vmatpush3.msra.mxu0 %v4663_v26 }
0x1f50   : > { %7988 = vmatprep.subr.mxu0 %v8532_v1 }
0x1f51   : > { %7989 = vmatpush3.msra.mxu0 %v4662_v33 }
0x1f52   : > { %7990 = vmatprep.subr.mxu0 %v8532_v1 }
0x1f53   : > { %7991 = vmatpush3.msra.mxu0 %v4661_v55 }
0x1f54   : > { %7992 = vmatprep.subr.mxu0 %v8532_v1 }
0x1f55   : > { %7993 = vmatpush3.msra.mxu0 %v4660_v34 }
0x1f56   : > { %7994 = vmatprep.subr.mxu0 %v8532_v1 }
0x1f57   : > { %7995 = vmatpush3.msra.mxu0 %v4659_v37 }
0x1f58   : > { %7996 = vmatprep.subr.mxu0 %v8532_v1 }
0x1f59   : > { %7997 = vmatpush3.msra.mxu0 %v4658_v39 }
0x1f5a   : > { %8022 = vmatprep.subr.mxu0 %v8532_v1 }
0x200a   : > { %v4619_v3 = vpop.f32.mrf.mxu0 }
0x200b   : > { %v4620_v4 = vadd.f32 %v7305_v2, %v4619_v3  ;;  %v7314_v3 = vld [vmem:[#allocation5 + $0x1b] ss:$0 sm:$0xff] }
0x200c   : > { %v7970_v18 = vpop.f32.mrf.mxu0 }
0x200d   : > { %v4623_v5 = vadd.f32 %v4620_v4, %v9220_v35  ;;  %v4653_v35 = vld [vmem:[#allocation2 + $0x58] sm:$0xff] }
0x200e   : > { %7978 = vmatpush3.msra.mxu1 %v4653_v35  ;;  %v7315_v18 = vld [vmem:[#allocation5 + $0x1c] ss:$0 sm:$0xff] }
0x200f   : > { %v4626_v6 = vsel %vm546_vm3, %v4623_v5, 0.0  ;;  %8001 = vmatprep.subr.mxu1 %v8532_v1 }
0x2010   : > { %4627 = vadd.xlane.f32.xlu0 %v4626_v6 }
0x2099   : > { %v4628_v7 = vpop.xlane.xlu0 %4627 }
0x209a   : > { %v4629_v8 = vmul.f32 0.03125, %v4628_v7  ;;  %v7316_v7 = vld [vmem:[#allocation5 + $0x1d] ss:$0 sm:$0xff] }
0x209c   : > { %v4630_v9 = vsub.f32 %v4623_v5, %v4629_v8 }
0x209e   : > { %v4631_v10 = vmul.f32 %v4630_v9, %v4630_v9 }
0x20a0   : > { %v4632_v11 = vsel %vm546_vm3, %v4631_v10, 0.0 }
0x20a1   : > { %4633 = vadd.xlane.f32.xlu1 %v4632_v11 }
0x212a   : > { %v4634_v17 = vpop.xlane.xlu1 %4633 }
0x212b   : > { %v4635_v20 = vmul.f32 0.03125, %v4634_v17 }
0x212d   : > { %v4636_v22 = vadd.f32 1e-05, %v4635_v20 }
0x212f   : > { %8341 = vrsqrt.f32 %v4636_v22 }
0x213c   : > { %v8342_v25 = vpop.eup %8341 }
0x213d   : > { %v4638_v28 = vmul.f32 %v8342_v25, %v4630_v9 }
0x213f   : > { %v4645_v29 = vmul.f32 %v7307_v27, %v4638_v28 }
0x2141   : > { %v4652_v30 = vadd.f32 %v7308_v24, %v4645_v29 }
0x2143   : > { %7980 = vmatmul.mubr.msk.f32.vlgmr.msra.gmra.mxu1 %vm546_vm3, %v4652_v30 }
0x2144   : > { %8009 = vmatprep.mubr.msk.f32.mxu1 %vm8533_vm0, %v8532_v1  ;;  %8002 = vmatpush3.msra.mxu1 %v4865_v59 }
0x2145   : > { %8003 = vmatprep.subr.mxu1 %v8532_v1 }
0x2146   : > { %8004 = vmatpush3.msra.mxu1 %v4864_v60 }
0x2147   : > { %8005 = vmatprep.subr.mxu1 %v8532_v1 }
0x2148   : > { %8006 = vmatpush3.msra.mxu1 %v4863_v61 }
0x2149   : > { %8007 = vmatprep.subr.mxu1 %v8532_v1 }
0x214a   : > { %8008 = vmatpush3.msra.mxu1 %v4862_v62 }
0x214b   : > { %8012 = vmatprep.subr.mxu1 %v8532_v1 }
0x2203   : > { %v4742_v38 = vpop.f32.mrf.mxu1 }
0x2204   : > { %v4743_v41 = vadd.f32 %v7309_v40, %v4742_v38 }
0x2205   : > { %v7981_v42 = vpop.f32.mrf.mxu1 }
0x2206   : > { %v7311_v44 = vmul.f32 -1.442695, %v4743_v41 }
0x2208   : > { %8343 = vpow2.f32 %v7311_v44 }
0x2215   : > { %v8344_v45 = vpop.eup %8343 }
0x2216   : > { %v4749_v46 = vadd.f32 1.0, %v8344_v45 }
0x2218   : > { %8345 = vrcp.f32 %v4749_v46 }
0x2225   : > { %v8346_v12 = vpop.eup %8345 }
0x2226   : > { %v4752_v47 = vmul.f32 %v8346_v12, %v4743_v41 }
0x2228   : > { %7999 = vmatmul.mubr.msk.f32.vlgmr.msra.gmra.mxu0 %vm458_vm1, %v4752_v47 }
0x2229   : > { %8024 = vmatprep.mubr.msk.f32.mxu0 %vm8533_vm0, %v8532_v1 }
0x22e8   : > { %v4828_v49 = vpop.f32.mrf.mxu0 }
0x22e9   : > { %v4829_v50 = vadd.f32 %v7312_v48, %v4828_v49 }
0x22ea   : > { %v8000_v51 = vpop.f32.mrf.mxu0 }
0x22eb   : > { %v4832_v52 = vadd.f32 %v4829_v50, %v4652_v30 }
0x22ed   : > { %v4835_v54 = vsel %vm546_vm3, %v4832_v52, 0.0 }
0x22ee   : > { %4836 = vadd.xlane.f32.xlu0 %v4835_v54 }
0x2377   : > { %v4837_v19 = vpop.xlane.xlu0 %4836 }
0x2378   : > { %v4838_v56 = vmul.f32 0.03125, %v4837_v19 }
0x237a   : > { %v4839_v43 = vsub.f32 %v4832_v52, %v4838_v56 }
0x237c   : > { %v4840_v57 = vmul.f32 %v4839_v43, %v4839_v43 }
0x237e   : > { %v4841_v58 = vsel %vm546_vm3, %v4840_v57, 0.0 }
0x237f   : > { %4842 = vadd.xlane.f32.xlu0 %v4841_v58 }
0x2408   : > { %v4843_v63 = vpop.xlane.xlu0 %4842 }
0x2409   : > { %v4844_v0 = vmul.f32 0.03125, %v4843_v63 }
0x240b   : > { %v4845_v23 = vadd.f32 1e-05, %v4844_v0 }
0x240d   : > { %8347 = vrsqrt.f32 %v4845_v23 }
0x241a   : > { %v8348_v2 = vpop.eup %8347 }
0x241b   : > { %v4847_v4 = vmul.f32 %v8348_v2, %v4839_v43 }
0x241d   : > { %v4854_v5 = vmul.f32 %v7314_v3, %v4847_v4 }
0x241f   : > { %v9361_v6 = vadd.f32 %v7315_v18, %v4854_v5 }
0x2421   : > { %8010 = vmatmul.mubr.msk.f32.vlgmr.msra.gmra.mxu1 %vm546_vm3, %v9361_v6 }
0x2422   : > { %8014 = vmatprep.mubr.msk.f32.mxu1 %vm8533_vm0, %v8532_v1 }
0x24e1   : > { %v4942_v8 = vpop.f32.mrf.mxu1 }
0x24e2   : > { %v9367_v9 = vadd.f32 %v7316_v7, %v4942_v8 }
0x24e3   : > { %v8011_v10 = vpop.f32.mrf.mxu1 }
0x24e4   : > { %5119 = vrot.lane.b32.xlu0 %v9367_v9, %s9756_s1  ;;  %4952 = vrot.lane.b32.xlu1 %v9367_v9, %s9742_s28 }
0x24e8   : > { %5284 = vrot.lane.b32.xlu0 %v9367_v9, %s9743_s29  ;;  %5117 = vrot.lane.b32.xlu1 %v9367_v9, %s9744_s30 }
0x24ec   : > { %5451 = vrot.lane.b32.xlu0 %v9367_v9, %s9745_s18  ;;  %5286 = vrot.lane.b32.xlu1 %v9367_v9, %s9746_s12 }
0x24f0   : > { %5453 = vrot.lane.b32.xlu1 %v9367_v9, %s9747_s26 }
0x2556   : > { %v5120_v11 = vpop.permute.xlu0 %5119  ;;  %v4953_v14 = vpop.permute.xlu1 %4952 }
0x2557   : > { %8013 = vmatpush3.xpose.msk.msra.mxu1 %vm628_vm4, %v4953_v14  ;;  %8023 = vmatpush3.xpose.msk.msra.mxu0 %vm628_vm4, %v5120_v11 }
0x2558   : > { %8032 = vmatprep.subr.mxu0 %v8532_v1  ;;  %8017 = vmatprep.subr.mxu1 %v8532_v1 }
0x255a   : > { %8015 = vmatmul.mubr.msk.f32.vlgmr.msra.gmra.mxu1 %vm628_vm4, %v9367_v9  ;;  %v5118_v15 = vpop.permute.xlu1 %5117  ;;  %v5285_v35 = vpop.permute.xlu0 %5284 }
0x255b   : > { %8025 = vmatmul.mubr.msk.f32.vlgmr.msra.gmra.mxu0 %vm628_vm4, %v5118_v15  ;;  %8019 = vmatprep.mubr.msk.f32.mxu1 %vm8533_vm0, %v8532_v1 }
0x255c   : > { %8034 = vmatprep.mubr.msk.f32.mxu0 %vm8533_vm0, %v8532_v1 }
0x255e   : > { %v5287_v16 = vpop.permute.xlu1 %5286  ;;  %v5452_v20 = vpop.permute.xlu0 %5451 }
0x255f   : > { %8033 = vmatpush3.xpose.msk.msra.mxu0 %vm628_vm4, %v5287_v16 }
0x2560   : > { %8042 = vmatprep.subr.mxu0 %v8532_v1 }
0x2562   : > { %8035 = vmatmul.mubr.msk.f32.vlgmr.msra.gmra.mxu0 %vm628_vm4, %v5285_v35  ;;  %v5454_v17 = vpop.permute.xlu1 %5453  ;;  %v4949_v35 = vld [vmem:[#allocation2 + $0x230] sm:$0xff] }
0x2563   : > { %8043 = vmatpush3.xpose.msk.msra.mxu0 %vm628_vm4, %v5454_v17  ;;  %8044 = vmatprep.mubr.msk.f32.mxu0 %vm8533_vm0, %v8532_v1  ;;  %v4948_v17 = vld [vmem:[#allocation2 + $0x198] sm:$0xff] }
0x2564   : > { %8052 = vmatprep.subr.mxu0 %v8532_v1 }
0x2566   : > { %8045 = vmatmul.mubr.msk.f32.vlgmr.msra.gmra.mxu0 %vm628_vm4, %v5452_v20 }
0x2567   : > { %8060 = vmatprep.mubr.msk.f32.mxu0 %vm8533_vm0, %v8532_v1  ;;  %8053 = vmatpush3.msra.mxu0 %v4949_v35 }
0x2568   : > { %8054 = vmatprep.subr.mxu0 %v8532_v1 }
0x2569   : > { %8055 = vmatpush3.msra.mxu0 %v4948_v17 }
0x256a   : > { %8056 = vmatprep.subr.mxu0 %v8532_v1 }
0x261a   : > { %v5024_v22 = vpop.f32.mrf.mxu1 }
0x261b   : > { %v5028_v25 = vmul.f32 0.35355338, %v5024_v22  ;;  %v5191_v27 = vpop.f32.mrf.mxu0 }
0x261c   : > { %v5195_v28 = vmul.f32 0.35355338, %v5191_v27  ;;  %v8016_v24 = vpop.f32.mrf.mxu1 }
0x261d   : > { %v5029_v29 = vadd.f32 %v5028_v25, %v9148_v36  ;;  %v8026_v30 = vpop.f32.mrf.mxu0  ;;  %v4946_v24 = vld [vmem:[#allocation2 + $0x68] sm:$0xff] }
0x261e   : > { %v5196_v31 = vadd.f32 %v5195_v28, %v9148_v36  ;;  %v4947_v28 = vld [vmem:[#allocation2 + $0x100] sm:$0xff] }
0x261f   : > { %v5030_v32 = vsel %vm628_vm4, %v5029_v29, -inf  ;;  %8057 = vmatpush3.msra.mxu0 %v4947_v28 }
0x2620   : > { %5031 = vmax.xlane.f32.xlu1 %v5030_v32  ;;  %v5197_v26 = vsel %vm628_vm4, %v5196_v31, -inf  ;;  %8058 = vmatprep.subr.mxu0 %v8532_v1 }
0x2621   : > { %5198 = vmax.xlane.f32.xlu0 %v5197_v26  ;;  %8059 = vmatpush3.msra.mxu0 %v4946_v24 }
0x2622   : > { %v5358_v33 = vpop.f32.mrf.mxu0  ;;  %8074 = vmatprep.subr.mxu0 %v8532_v1 }
0x2623   : > { %v5362_v55 = vmul.f32 0.35355338, %v5358_v33 }
0x2624   : > { %v8036_v34 = vpop.f32.mrf.mxu0 }
0x2625   : > { %v5363_v37 = vadd.f32 %v5362_v55, %v9148_v36 }
0x2626   : > { %v5525_v39 = vpop.f32.mrf.mxu0 }
0x2627   : > { %v5529_v40 = vmul.f32 0.35355338, %v5525_v39  ;;  %v5364_v38 = vsel %vm628_vm4, %v5363_v37, -inf  ;;  %v5829_v39 = vld [vmem:[#allocation2 + $0x240] sm:$0xff] }
0x2628   : > { %5365 = vmax.xlane.f32.xlu0 %v5364_v38  ;;  %v8046_v41 = vpop.f32.mrf.mxu0  ;;  %v5828_v38 = vld [vmem:[#allocation2 + $0x1a8] sm:$0xff] }
0x2629   : > { %v5530_v42 = vadd.f32 %v5529_v40, %v9148_v36  ;;  %v5827_v41 = vld [vmem:[#allocation2 + $0x110] sm:$0xff] }
0x262b   : > { %v5531_v44 = vsel %vm628_vm4, %v5530_v42, -inf }
0x262c   : > { %5532 = vmax.xlane.f32.xlu1 %v5531_v44  ;;  %v7330_v44 = vld [vmem:[#allocation5 + $0x1e] ss:$0 sm:$0xff] }
0x263d   : > { %5208 = vrot.lane.b32.xlu1 %v9367_v9, %s9748_s20 }
0x26a9   : > { %v5032_v45 = vpop.xlane.xlu1 %5031 }
0x26aa   : > { %v5033_v46 = vsub.f32 %v5029_v29, %v5032_v45  ;;  %v5199_v12 = vpop.xlane.xlu0 %5198 }
0x26ab   : > { %v5200_v47 = vsub.f32 %v5196_v31, %v5199_v12 }
0x26ac   : > { %v5034_v48 = vmul.f32 1.442695, %v5033_v46 }
0x26ad   : > { %v5201_v49 = vmul.f32 1.442695, %v5200_v47 }
0x26ae   : > { %8349 = vpow2.f32 %v5034_v48 }
0x26af   : > { %8351 = vpow2.f32 %v5201_v49 }
0x26b1   : > { %v5366_v58 = vpop.xlane.xlu0 %5365 }
0x26b2   : > { %v5367_v59 = vsub.f32 %v5363_v37, %v5366_v58  ;;  %v5743_v58 = vld [vmem:[#allocation2 + $0x108] sm:$0xff] }
0x26b4   : > { %v5368_v60 = vmul.f32 1.442695, %v5367_v59  ;;  %v5742_v59 = vld [vmem:[#allocation2 + $0x70] sm:$0xff] }
0x26b5   : > { %v5533_v50 = vpop.xlane.xlu1 %5532 }
0x26b6   : > { %v5534_v51 = vsub.f32 %v5530_v42, %v5533_v50  ;;  %v5826_v42 = vld [vmem:[#allocation2 + $0x78] sm:$0xff] }
0x26b8   : > { %v5535_v52 = vmul.f32 1.442695, %v5534_v51  ;;  %v7336_v51 = vld [vmem:[#allocation5 + $0x22] ss:$0 sm:$0xff] }
0x26b9   : > { %v5209_v63 = vpop.permute.xlu1 %5208 }
0x26ba   : > { %8353 = vpow2.f32 %v5535_v52 }
0x26bb   : > { %v8350_v54 = vpop.eup %8349  ;;  %8355 = vpow2.f32 %v5368_v60 }
0x26bc   : > { %v8352_v36 = vpop.eup %8351  ;;  %v5036_v19 = vsel %vm628_vm4, %v8350_v54, 0.0 }
0x26bd   : > { %5037 = vadd.xlane.f32.xlu0 %v5036_v19  ;;  %v5203_v56 = vsel %vm628_vm4, %v8352_v36, 0.0 }
0x26be   : > { %5204 = vadd.xlane.f32.xlu1 %v5203_v56 }
0x26c7   : > { %v8354_v43 = vpop.eup %8353 }
0x26c8   : > { %v5537_v57 = vsel %vm628_vm4, %v8354_v43, 0.0  ;;  %v8356_v61 = vpop.eup %8355 }
0x26c9   : > { %5538 = vadd.xlane.f32.xlu1 %v5537_v57  ;;  %v5370_v62 = vsel %vm628_vm4, %v8356_v61, 0.0  ;;  %v5744_v57 = vld [vmem:[#allocation2 + $0x1a0] sm:$0xff] }
0x26d3   : > { %5041 = vrot.lane.b32.xlu0 %v9367_v9, %s9749_s21 }
0x26da   : > { %5375 = vrot.lane.b32.xlu1 %v9367_v9, %s9750_s27 }
0x26f2   : > { %5371 = vadd.xlane.f32.xlu0 %v5370_v62 }
0x2708   : > { %5542 = vrot.lane.b32.xlu0 %v9367_v9, %s9751_s0 }
0x2746   : > { %v5038_v0 = vpop.xlane.xlu0 %5037 }
0x2747   : > { %8357 = vrcp.f32 %v5038_v0  ;;  %v5205_v23 = vpop.xlane.xlu1 %5204  ;;  %v7332_v0 = vld [vmem:[#allocation5 + $0x1f] ss:$0 sm:$0xff] }
0x2748   : > { %8359 = vrcp.f32 %v5205_v23 }
0x274a   : > { %v5042_v2 = vpop.permute.xlu0 %5041 }
0x274b   : > { %8018 = vmatpush3.msra.mxu1 %v5042_v2  ;;  %v7333_v2 = vld [vmem:[#allocation5 + $0x20] ss:$0 sm:$0xff] }
0x274c   : > { %8027 = vmatprep.subr.mxu1 %v8532_v1 }
0x2752   : > { %v5539_v4 = vpop.xlane.xlu1 %5538 }
0x2754   : > { %v8358_v3 = vpop.eup %8357 }
0x2755   : > { %v5040_v18 = vmul.f32 %v8358_v3, %v8350_v54  ;;  %v8360_v5 = vpop.eup %8359 }
0x2756   : > { %v5207_v7 = vmul.f32 %v8360_v5, %v8352_v36  ;;  %v5376_v8 = vpop.permute.xlu1 %5375 }
0x2757   : > { %8020 = vmatmul.mubr.msk.f32.vlgmr.msra.gmra.mxu1 %vm628_vm4, %v5040_v18  ;;  %v7334_v18 = vld [vmem:[#allocation5 + $0x21] ss:$0 sm:$0xff] }
0x2758   : > { %8028 = vmatpush3.msra.mxu1 %v5209_v63  ;;  %8029 = vmatprep.mubr.msk.f32.mxu1 %vm8533_vm0, %v8532_v1 }
0x2759   : > { %8037 = vmatprep.subr.mxu1 %v8532_v1 }
0x275b   : > { %8030 = vmatmul.mubr.msk.f32.vlgmr.msra.gmra.mxu1 %vm628_vm4, %v5207_v7 }
0x275c   : > { %8038 = vmatpush3.msra.mxu1 %v5376_v8  ;;  %8039 = vmatprep.mubr.msk.f32.mxu1 %vm8533_vm0, %v8532_v1 }
0x275d   : > { %8047 = vmatprep.subr.mxu1 %v8532_v1 }
0x277b   : > { %v5372_v9 = vpop.xlane.xlu0 %5371 }
0x277c   : > { %8361 = vrcp.f32 %v5372_v9 }
0x277d   : > { %8363 = vrcp.f32 %v5539_v4 }
0x277f   : > { %v5543_v15 = vpop.permute.xlu0 %5542 }
0x2789   : > { %v8362_v10 = vpop.eup %8361 }
0x278a   : > { %v5374_v11 = vmul.f32 %v8362_v10, %v8356_v61  ;;  %v8364_v14 = vpop.eup %8363 }
0x278b   : > { %v5541_v16 = vmul.f32 %v8364_v14, %v8354_v43  ;;  %v5745_v43 = vld [vmem:[#allocation2 + $0x238] sm:$0xff] }
0x278c   : > { %8040 = vmatmul.mubr.msk.f32.vlgmr.msra.gmra.mxu1 %vm628_vm4, %v5374_v11 }
0x278d   : > { %8048 = vmatpush3.msra.mxu1 %v5543_v15  ;;  %8049 = vmatprep.mubr.msk.f32.mxu1 %vm8533_vm0, %v8532_v1 }
0x278e   : > { %8063 = vmatprep.subr.mxu1 %v8532_v1 }
0x2790   : > { %8050 = vmatmul.mubr.msk.f32.vlgmr.msra.gmra.mxu1 %vm628_vm4, %v5541_v16 }
0x2791   : > { %8071 = vmatprep.mubr.msk.f32.mxu1 %vm8533_vm0, %v8532_v1  ;;  %8064 = vmatpush3.msra.mxu1 %v5745_v43 }
0x2792   : > { %8065 = vmatprep.subr.mxu1 %v8532_v1 }
0x2793   : > { %8066 = vmatpush3.msra.mxu1 %v5744_v57 }
0x2794   : > { %8067 = vmatprep.subr.mxu1 %v8532_v1 }
0x2795   : > { %8068 = vmatpush3.msra.mxu1 %v5743_v58 }
0x2796   : > { %8069 = vmatprep.subr.mxu1 %v8532_v1 }
0x2797   : > { %8070 = vmatpush3.msra.mxu1 %v5742_v59 }
0x2798   : > { %8085 = vmatprep.subr.mxu1 %v8532_v1 }
0x2817   : > { %v5113_v20 = vpop.f32.mrf.mxu1 }
0x2819   : > { %v8021_v22 = vpop.f32.mrf.mxu1 }
0x281b   : > { %v5280_v25 = vpop.f32.mrf.mxu1 }
0x281c   : > { %5619 = vrot.lane.b32.xlu1 %v5280_v25, %s9752_s3 }
0x281d   : > { %v8031_v27 = vpop.f32.mrf.mxu1 }
0x284c   : > { %v5447_v29 = vpop.f32.mrf.mxu1 }
0x284d   : > { %5623 = vrot.lane.b32.xlu0 %v5447_v29, %s9753_s6 }
0x284e   : > { %v8041_v30 = vpop.f32.mrf.mxu1 }
0x2850   : > { %v5614_v31 = vpop.f32.mrf.mxu1 }
0x2851   : > { %5627 = vrot.lane.b32.xlu1 %v5614_v31, %s9754_s8 }
0x2852   : > { %v8051_v32 = vpop.f32.mrf.mxu1 }
0x288e   : > { %v5620_v26 = vpop.permute.xlu1 %5619 }
0x288f   : > { %v5630_v55 = vsel %vm628_vm4, %v5113_v20, %v5620_v26 }
0x28bf   : > { %v5624_v33 = vpop.permute.xlu0 %5623 }
0x28c0   : > { %v5631_v34 = vsel %vm1312_vm5, %v5630_v55, %v5624_v33 }
0x28c3   : > { %v5628_v37 = vpop.permute.xlu1 %5627 }
0x28c4   : > { %v5632_v40 = vsel %vm1314_vm6, %v5631_v34, %v5628_v37 }
0x28c5   : > { %8061 = vmatmul.mubr.msk.f32.vlgmr.msra.gmra.mxu0 %vm546_vm3, %v5632_v40 }
0x28c6   : > { %8075 = vmatpush3.msra.mxu0 %v5829_v39  ;;  %8082 = vmatprep.mubr.msk.f32.mxu0 %vm8533_vm0, %v8532_v1 }
0x28c7   : > { %8076 = vmatprep.subr.mxu0 %v8532_v1 }
0x28c8   : > { %8077 = vmatpush3.msra.mxu0 %v5828_v38 }
0x28c9   : > { %8078 = vmatprep.subr.mxu0 %v8532_v1 }
0x28ca   : > { %8079 = vmatpush3.msra.mxu0 %v5827_v41 }
0x28cb   : > { %8080 = vmatprep.subr.mxu0 %v8532_v1 }
0x28cc   : > { %8081 = vmatpush3.msra.mxu0 %v5826_v42 }
0x28cd   : > { %8083 = vmatmul.mubr.msk.f32.vlgmr.msra.gmra.mxu0 %vm546_vm3, %v9210_v21  ;;  %8095 = vmatprep.subr.mxu0 %v8532_v1 }
0x28ce   : > { %8097 = vmatprep.mubr.msk.f32.mxu0 %vm8533_vm0, %v8532_v1 }
0x2985   : > { %v5708_v45 = vpop.f32.mrf.mxu0 }
0x2986   : > { %v5709_v46 = vadd.f32 %v7330_v44, %v5708_v45 }
0x2987   : > { %v8062_v12 = vpop.f32.mrf.mxu0 }
0x2988   : > { %v5712_v47 = vadd.f32 %v5709_v46, %v9361_v6 }
0x298a   : > { %v5715_v48 = vsel %vm546_vm3, %v5712_v47, 0.0 }
0x298b   : > { %5716 = vadd.xlane.f32.xlu0 %v5715_v48 }
0x298d   : > { %v5903_v49 = vpop.f32.mrf.mxu0 }
0x298e   : > { %v9463_v52 = vadd.f32 %v7336_v51, %v5903_v49 }
0x298f   : > { %v8084_v50 = vpop.f32.mrf.mxu0 }
0x29a1   : > { %6079 = vrot.lane.b32.xlu0 %v9463_v52, %s9744_s30 }
0x29a5   : > { %6246 = vrot.lane.b32.xlu0 %v9463_v52, %s9743_s29 }
0x29a9   : > { %6413 = vrot.lane.b32.xlu0 %v9463_v52, %s9745_s18 }
0x2a14   : > { %v5717_v21 = vpop.xlane.xlu0 %5716 }
0x2a15   : > { %v5718_v54 = vmul.f32 0.03125, %v5717_v21 }
0x2a17   : > { %v5719_v6 = vsub.f32 %v5712_v47, %v5718_v54 }
0x2a18   : > { %v6080_v36 = vpop.permute.xlu0 %6079 }
0x2a19   : > { %8096 = vmatpush3.xpose.msk.msra.mxu0 %vm628_vm4, %v6080_v36  ;;  %v5720_v19 = vmul.f32 %v5719_v6, %v5719_v6 }
0x2a1a   : > { %8105 = vmatprep.subr.mxu0 %v8532_v1 }
0x2a1b   : > { %v5721_v56 = vsel %vm546_vm3, %v5720_v19, 0.0 }
0x2a1c   : > { %5722 = vadd.xlane.f32.xlu1 %v5721_v56  ;;  %v6247_v9 = vpop.permute.xlu0 %6246 }
0x2a20   : > { %v6414_v14 = vpop.permute.xlu0 %6413 }
0x2aa5   : > { %v5723_v60 = vpop.xlane.xlu1 %5722 }
0x2aa6   : > { %v5724_v61 = vmul.f32 0.03125, %v5723_v60 }
0x2aa8   : > { %v5725_v62 = vadd.f32 1e-05, %v5724_v61 }
0x2aaa   : > { %8365 = vrsqrt.f32 %v5725_v62 }
0x2ab7   : > { %v8366_v63 = vpop.eup %8365 }
0x2ab8   : > { %v5727_v23 = vmul.f32 %v8366_v63, %v5719_v6 }
0x2aba   : > { %v5734_v3 = vmul.f32 %v7332_v0, %v5727_v23 }
0x2abc   : > { %v9478_v4 = vadd.f32 %v7333_v2, %v5734_v3 }
0x2abe   : > { %8072 = vmatmul.mubr.msk.f32.vlgmr.msra.gmra.mxu1 %vm546_vm3, %v9478_v4 }
0x2abf   : > { %8086 = vmatpush3.xpose.msk.msra.mxu1 %vm628_vm4, %v9463_v52  ;;  %8087 = vmatprep.mubr.msk.f32.mxu1 %vm8533_vm0, %v8532_v1 }
0x2ac0   : > { %8090 = vmatprep.subr.mxu1 %v8532_v1 }
0x2b7e   : > { %v5822_v5 = vpop.f32.mrf.mxu1 }
0x2b7f   : > { %v5823_v7 = vadd.f32 %v7334_v18, %v5822_v5 }
0x2b80   : > { %v8073_v8 = vpop.f32.mrf.mxu1 }
0x2b81   : > { %6077 = vrot.lane.b32.xlu1 %v5823_v7, %s9744_s30  ;;  %8088 = vmatmul.mubr.msk.f32.vlgmr.msra.gmra.mxu1 %vm628_vm4, %v5823_v7 }
0x2b82   : > { %8092 = vmatprep.mubr.msk.f32.mxu1 %vm8533_vm0, %v8532_v1 }
0x2b85   : > { %6244 = vrot.lane.b32.xlu1 %v5823_v7, %s9743_s29 }
0x2b89   : > { %6411 = vrot.lane.b32.xlu1 %v5823_v7, %s9745_s18 }
0x2bf3   : > { %v6078_v10 = vpop.permute.xlu1 %6077 }
0x2bf4   : > { %8098 = vmatmul.mubr.msk.f32.vlgmr.msra.gmra.mxu0 %vm628_vm4, %v6078_v10 }
0x2bf5   : > { %8106 = vmatpush3.xpose.msk.msra.mxu0 %vm628_vm4, %v6247_v9  ;;  %8107 = vmatprep.mubr.msk.f32.mxu0 %vm8533_vm0, %v8532_v1 }
0x2bf6   : > { %8115 = vmatprep.subr.mxu0 %v8532_v1 }
0x2bf7   : > { %v6245_v11 = vpop.permute.xlu1 %6244 }
0x2bf8   : > { %8108 = vmatmul.mubr.msk.f32.vlgmr.msra.gmra.mxu0 %vm628_vm4, %v6245_v11  ;;  %v5910_v11 = vld [vmem:[#allocation2 + $0x248] sm:$0xff] }
0x2bf9   : > { %8116 = vmatpush3.xpose.msk.msra.mxu0 %vm628_vm4, %v6414_v14  ;;  %8117 = vmatprep.mubr.msk.f32.mxu0 %vm8533_vm0, %v8532_v1  ;;  %v5909_v14 = vld [vmem:[#allocation2 + $0x1b0] sm:$0xff] }
0x2bfa   : > { %8125 = vmatprep.subr.mxu0 %v8532_v1 }
0x2bfb   : > { %v6412_v15 = vpop.permute.xlu1 %6411 }
0x2bfc   : > { %8118 = vmatmul.mubr.msk.f32.vlgmr.msra.gmra.mxu0 %vm628_vm4, %v6412_v15  ;;  %v5908_v15 = vld [vmem:[#allocation2 + $0x118] sm:$0xff] }
0x2bfd   : > { %8133 = vmatprep.mubr.msk.f32.mxu0 %vm8533_vm0, %v8532_v1  ;;  %8126 = vmatpush3.msra.mxu0 %v5910_v11 }
0x2bfe   : > { %8127 = vmatprep.subr.mxu0 %v8532_v1 }
0x2bff   : > { %8128 = vmatpush3.msra.mxu0 %v5909_v14 }
0x2c00   : > { %8129 = vmatprep.subr.mxu0 %v8532_v1 }
0x2c01   : > { %8130 = vmatpush3.msra.mxu0 %v5908_v15 }
0x2c02   : > { %8131 = vmatprep.subr.mxu0 %v8532_v1 }
0x2c41   : > { %v5984_v16 = vpop.f32.mrf.mxu1 }
0x2c42   : > { %v5988_v35 = vmul.f32 0.35355338, %v5984_v16  ;;  %v5907_v16 = vld [vmem:[#allocation2 + $0x80] sm:$0xff] }
0x2c43   : > { %v8089_v17 = vpop.f32.mrf.mxu1  ;;  %8132 = vmatpush3.msra.mxu0 %v5907_v16 }
0x2c44   : > { %v5989_v20 = vadd.f32 %v9259_v53, %v5988_v35  ;;  %8147 = vmatprep.subr.mxu0 %v8532_v1 }
0x2c46   : > { %v5990_v22 = vsel %vm628_vm4, %v5989_v20, -inf }
0x2c47   : > { %5991 = vmax.xlane.f32.xlu0 %v5990_v22 }
0x2cb4   : > { %v6151_v25 = vpop.f32.mrf.mxu0 }
0x2cb5   : > { %v6155_v27 = vmul.f32 0.35355338, %v6151_v25 }
0x2cb6   : > { %v8099_v28 = vpop.f32.mrf.mxu0 }
0x2cb7   : > { %v6156_v24 = vadd.f32 %v9259_v53, %v6155_v27 }
0x2cb8   : > { %v6318_v29 = vpop.f32.mrf.mxu0 }
0x2cb9   : > { %v6322_v30 = vmul.f32 0.35355338, %v6318_v29  ;;  %v6157_v31 = vsel %vm628_vm4, %v6156_v24, -inf }
0x2cba   : > { %6158 = vmax.xlane.f32.xlu1 %v6157_v31  ;;  %v8109_v32 = vpop.f32.mrf.mxu0 }
0x2cbb   : > { %v6323_v26 = vadd.f32 %v9259_v53, %v6322_v30 }
0x2cbc   : > { %v6485_v33 = vpop.f32.mrf.mxu0 }
0x2cbd   : > { %v6489_v55 = vmul.f32 0.35355338, %v6485_v33  ;;  %v6324_v34 = vsel %vm628_vm4, %v6323_v26, -inf }
0x2cbe   : > { %6325 = vmax.xlane.f32.xlu0 %v6324_v34  ;;  %v8119_v37 = vpop.f32.mrf.mxu0 }
0x2cbf   : > { %v6490_v39 = vadd.f32 %v9259_v53, %v6489_v55 }
0x2cc1   : > { %v6491_v40 = vsel %vm628_vm4, %v6490_v39, -inf }
0x2cc2   : > { %6492 = vmax.xlane.f32.xlu0 %v6491_v40 }
0x2ccb   : > { %6001 = vrot.lane.b32.xlu1 %v9463_v52, %s9742_s28  ;;  %s8549_s28 = smov [#allocation7]  }
0x2ccc   : > { %s8461_s29 = sshll.u32 %s8549_s28, 4  ;;  %s8462_s29 = int_to_ptr.vmem [resolvable:$false] %s8461_s29 }
0x2ccd   : > { %s8463_s17 = scalar_lea.vmem %s8462_s29, 256 }
0x2cd0   : > { %v5992_v38 = vpop.xlane.xlu0 %5991 }
0x2cd1   : > { %v5993_v41 = vsub.f32 %v5989_v20, %v5992_v38 }
0x2cd3   : > { %v5994_v42 = vmul.f32 1.442695, %v5993_v41 }
0x2cd5   : > { %8367 = vpow2.f32 %v5994_v42 }
0x2ce2   : > { %v8368_v44 = vpop.eup %8367 }
0x2ce3   : > { %v5996_v45 = vsel %vm628_vm4, %v8368_v44, 0.0 }
0x2cef   : > { %5997 = vadd.xlane.f32.xlu1 %v5996_v45  ;;  %v6705_v45 = vld [vmem:[#allocation2 + $0x250] sm:$0xff] }
0x2d43   : > { %v6159_v46 = vpop.xlane.xlu1 %6158 }
0x2d44   : > { %v6160_v12 = vsub.f32 %v6156_v24, %v6159_v46  ;;  %v6704_v46 = vld [vmem:[#allocation2 + $0x1b8] sm:$0xff] }
0x2d46   : > { %v6161_v47 = vmul.f32 1.442695, %v6160_v12  ;;  %v6703_v12 = vld [vmem:[#allocation2 + $0x120] sm:$0xff] }
0x2d47   : > { %v6002_v48 = vpop.permute.xlu1 %6001  ;;  %v6326_v49 = vpop.xlane.xlu0 %6325 }
0x2d48   : > { %8369 = vpow2.f32 %v6161_v47  ;;  %v6327_v53 = vsub.f32 %v6323_v26, %v6326_v49  ;;  %8091 = vmatpush3.msra.mxu1 %v6002_v48  ;;  %v7350_v26 = vld [vmem:[#allocation5 + $0x23] ss:$0 sm:$0xff] }
0x2d49   : > { %8100 = vmatprep.subr.mxu1 %v8532_v1 }
0x2d4a   : > { %v6328_v50 = vmul.f32 1.442695, %v6327_v53 }
0x2d4b   : > { %v6493_v51 = vpop.xlane.xlu0 %6492 }
0x2d4c   : > { %8371 = vpow2.f32 %v6328_v50  ;;  %v6494_v21 = vsub.f32 %v6490_v39, %v6493_v51  ;;  %v7352_v50 = vld [vmem:[#allocation5 + $0x24] ss:$0 sm:$0xff] }
0x2d4e   : > { %v6495_v54 = vmul.f32 1.442695, %v6494_v21  ;;  %v7353_v21 = vld [vmem:[#allocation5 + $0x25] ss:$0 sm:$0xff] }
0x2d50   : > { %8373 = vpow2.f32 %v6495_v54 }
0x2d55   : > { %v8370_v6 = vpop.eup %8369 }
0x2d56   : > { %v6163_v36 = vsel %vm628_vm4, %v8370_v6, 0.0 }
0x2d57   : > { %6164 = vadd.xlane.f32.xlu0 %v6163_v36  ;;  %v6714_v36 = vld [vmem:[%s9676_s7 + $0xf8] sm:$0xff] }
0x2d59   : > { %v8372_v19 = vpop.eup %8371 }
0x2d5a   : > { %v6330_v56 = vsel %vm628_vm4, %v8372_v19, 0.0 }
0x2d5b   : > { %6331 = vadd.xlane.f32.xlu1 %v6330_v56  ;;  %v6712_v56 = vld [vmem:[%s9676_s7 + $0xb8] sm:$0xff] }
0x2d5d   : > { %v8374_v43 = vpop.eup %8373 }
0x2d5e   : > { %v6497_v57 = vsel %vm628_vm4, %v8374_v43, 0.0 }
0x2d5f   : > { %6498 = vadd.xlane.f32.xlu0 %v6497_v57  ;;  %v6710_v57 = vld [vmem:[%s9676_s7 + $0x78] sm:$0xff] }
0x2d6c   : > { %6335 = vrot.lane.b32.xlu1 %v9463_v52, %s9746_s12 }
0x2d70   : > { %6502 = vrot.lane.b32.xlu1 %v9463_v52, %s9747_s26 }
0x2d75   : > { %6168 = vrot.lane.b32.xlu0 %v9463_v52, %s9756_s1 }
0x2d78   : > { %v5998_v58 = vpop.xlane.xlu1 %5997 }
0x2d79   : > { %8375 = vrcp.f32 %v5998_v58  ;;  %v6709_v58 = vld [vmem:[%s9676_s7 + $0x58] sm:$0xff] }
0x2d86   : > { %v8376_v59 = vpop.eup %8375 }
0x2d87   : > { %v6000_v60 = vmul.f32 %v8376_v59, %v8368_v44  ;;  %v6708_v59 = vld [vmem:[%s9676_s7 + $0x38] sm:$0xff] }
0x2d89   : > { %8093 = vmatmul.mubr.msk.f32.vlgmr.msra.gmra.mxu1 %vm628_vm4, %v6000_v60  ;;  %v6707_v60 = vld [vmem:[%s9676_s7 + $0x18] sm:$0xff] }
0x2d8a   : > { %8102 = vmatprep.mubr.msk.f32.mxu1 %vm8533_vm0, %v8532_v1 }
0x2de0   : > { %v6165_v61 = vpop.xlane.xlu0 %6164 }
0x2de1   : > { %8377 = vrcp.f32 %v6165_v61  ;;  %v7354_v61 = vld [vmem:[#allocation5 + $0x26] ss:$0 sm:$0xff] }
0x2de4   : > { %v6332_v62 = vpop.xlane.xlu1 %6331 }
0x2de5   : > { %8379 = vrcp.f32 %v6332_v62 }
0x2de8   : > { %v6499_v63 = vpop.xlane.xlu0 %6498  ;;  %v6336_v52 = vpop.permute.xlu1 %6335 }
0x2de9   : > { %8381 = vrcp.f32 %v6499_v63 }
0x2dec   : > { %v6169_v0 = vpop.permute.xlu0 %6168  ;;  %v6503_v5 = vpop.permute.xlu1 %6502 }
0x2ded   : > { %8101 = vmatpush3.msra.mxu1 %v6169_v0 }
0x2dee   : > { %v8378_v23 = vpop.eup %8377  ;;  %8110 = vmatprep.subr.mxu1 %v8532_v1 }
0x2def   : > { %v6167_v2 = vmul.f32 %v8378_v23, %v8370_v6 }
0x2df1   : > { %8103 = vmatmul.mubr.msk.f32.vlgmr.msra.gmra.mxu1 %vm628_vm4, %v6167_v2 }
0x2df2   : > { %v8380_v3 = vpop.eup %8379  ;;  %8111 = vmatpush3.msra.mxu1 %v6336_v52  ;;  %8112 = vmatprep.mubr.msk.f32.mxu1 %vm8533_vm0, %v8532_v1 }
0x2df3   : > { %8120 = vmatprep.subr.mxu1 %v8532_v1  ;;  %v6334_v18 = vmul.f32 %v8380_v3, %v8372_v19  ;;  %v6713_v19 = vld [vmem:[%s9676_s7 + $0xd8] sm:$0xff] }
0x2df5   : > { %8113 = vmatmul.mubr.msk.f32.vlgmr.msra.gmra.mxu1 %vm628_vm4, %v6334_v18 }
0x2df6   : > { %v8382_v7 = vpop.eup %8381  ;;  %8121 = vmatpush3.msra.mxu1 %v6503_v5  ;;  %8122 = vmatprep.mubr.msk.f32.mxu1 %vm8533_vm0, %v8532_v1  ;;  %v7357_v5 = vld [vmem:[#allocation5 + $0x27] ss:$0 sm:$0xff] }
0x2df7   : > { %v6501_v8 = vmul.f32 %v8382_v7, %v8374_v43  ;;  %8136 = vmatprep.subr.mxu1 %v8532_v1  ;;  %v6711_v43 = vld [vmem:[%s9676_s7 + $0x98] sm:$0xff] }
0x2df9   : > { %8123 = vmatmul.mubr.msk.f32.vlgmr.msra.gmra.mxu1 %vm628_vm4, %v6501_v8 }
0x2dfa   : > { %8144 = vmatprep.mubr.msk.f32.mxu1 %vm8533_vm0, %v8532_v1  ;;  %8137 = vmatpush3.msra.mxu1 %v6705_v45 }
0x2dfb   : > { %8138 = vmatprep.subr.mxu1 %v8532_v1 }
0x2dfc   : > { %8139 = vmatpush3.msra.mxu1 %v6704_v46 }
0x2dfd   : > { %8140 = vmatprep.subr.mxu1 %v8532_v1 }
0x2dfe   : > { %8141 = vmatpush3.msra.mxu1 %v6703_v12 }
0x2dff   : > { %8142 = vmatprep.subr.mxu1 %v8532_v1 }
0x2e49   : > { %v6073_v9 = vpop.f32.mrf.mxu1 }
0x2e4b   : > { %v8094_v10 = vpop.f32.mrf.mxu1 }
0x2eb1   : > { %v6240_v35 = vpop.f32.mrf.mxu1 }
0x2eb2   : > { %6579 = vrot.lane.b32.xlu0 %v6240_v35, %s9752_s3 }
0x2eb3   : > { %v8104_v17 = vpop.f32.mrf.mxu1 }
0x2eb5   : > { %v6407_v20 = vpop.f32.mrf.mxu1 }
0x2eb6   : > { %6583 = vrot.lane.b32.xlu1 %v6407_v20, %s9753_s6  ;;  %v6914_v20 = vld [vmem:[#allocation2 + $0x258] sm:$0xff]  ;;  %s7068_s6 = sshll.u32 %s416_s16, 4  ;;  %s7069_s6 = int_to_ptr.vmem [resolvable:$true] %s7068_s6 }
0x2eb7   : > { %v8114_v22 = vpop.f32.mrf.mxu1  ;;  %s8457_s27 = scalar_lea.vmem %s7069_s6, 128  ;;  %p8464_p1 = scmp.lt.s32.totalorder %s7069_s6, %s8462_s29 }
0x2eb8   : > { %v6913_v22 = vld [vmem:[#allocation2 + $0x1c0] sm:$0xff]  ;;  %p8458_p10 = scmp.ne.s32.totalorder %s7069_s6, %s8457_s27  ;;  %p8465_p3 = scmp.lt.s32.totalorder %s8463_s17, %s8457_s27 }
0x2eb9   : > { %v6574_v25 = vpop.f32.mrf.mxu1 }
0x2eba   : > { %6587 = vrot.lane.b32.xlu0 %v6574_v25, %s9754_s8  ;;  %v6912_v25 = vld [vmem:[#allocation2 + $0x128] sm:$0xff]  ;;  %s7052_s8 = scalar_lea.sflag [#allocation4], %s414_s4  ;;  %p8459_p12 = pnand %p8458_p10, %p8643_p5 }
0x2ebb   : > { %v8124_v27 = vpop.f32.mrf.mxu1  ;;  %p8466_p2 = por %p8465_p3, %p8464_p1 }
0x2ebc   : > { %v6911_v27 = vld [vmem:[#allocation2 + $0x90] sm:$0xff]  ;;  %p8460_p0 = pneg %p8459_p12 }
0x2ebe   : > { %p8467_p4 = pnand %p8466_p2, %p8460_p0 }
0x2f24   : > { %v6580_v28 = vpop.permute.xlu0 %6579 }
0x2f25   : > { %v6590_v29 = vsel %vm628_vm4, %v6073_v9, %v6580_v28 }
0x2f28   : > { %v6584_v24 = vpop.permute.xlu1 %6583 }
0x2f29   : > { %v6591_v30 = vsel %vm1312_vm5, %v6590_v29, %v6584_v24 }
0x2f2c   : > { %v6588_v31 = vpop.permute.xlu0 %6587 }
0x2f2d   : > { %v6592_v32 = vsel %vm1314_vm6, %v6591_v30, %v6588_v31  ;;  %v7359_v31 = vld [vmem:[#allocation5 + $0x28] ss:$0 sm:$0xff] }
0x2f2e   : > { %8134 = vmatmul.mubr.msk.f32.vlgmr.msra.gmra.mxu0 %vm546_vm3, %v6592_v32 }
0x2f2f   : > { %8163 = vmatprep.mubr.msk.f32.mxu0 %vm8533_vm0, %v8532_v1  ;;  %8148 = vmatpush3.msra.mxu0 %v6714_v36 }
0x2f30   : > { %8149 = vmatprep.subr.mxu0 %v8532_v1 }
0x2f31   : > { %8150 = vmatpush3.msra.mxu0 %v6713_v19 }
0x2f32   : > { %8151 = vmatprep.subr.mxu0 %v8532_v1 }
0x2f33   : > { %8152 = vmatpush3.msra.mxu0 %v6712_v56 }
0x2f34   : > { %8153 = vmatprep.subr.mxu0 %v8532_v1 }
0x2f35   : > { %8154 = vmatpush3.msra.mxu0 %v6711_v43 }
0x2f36   : > { %8155 = vmatprep.subr.mxu0 %v8532_v1 }
0x2f37   : > { %8156 = vmatpush3.msra.mxu0 %v6710_v57 }
0x2f38   : > { %8157 = vmatprep.subr.mxu0 %v8532_v1 }
0x2f39   : > { %8158 = vmatpush3.msra.mxu0 %v6709_v58 }
0x2f3a   : > { %8159 = vmatprep.subr.mxu0 %v8532_v1 }
0x2f3b   : > { %8160 = vmatpush3.msra.mxu0 %v6708_v59 }
0x2f3c   : > { %8161 = vmatprep.subr.mxu0 %v8532_v1 }
0x2f3d   : > { %8162 = vmatpush3.msra.mxu0 %v6707_v60 }
0x2fee   : > { %v6668_v33 = vpop.f32.mrf.mxu0 }
0x2fef   : > { %v6669_v55 = vadd.f32 %v7350_v26, %v6668_v33  ;;  %v7360_v26 = vld [vmem:[#allocation5 + $0x29] ss:$0 sm:$0xff] }
0x2ff0   : > { %v8135_v34 = vpop.f32.mrf.mxu0 }
0x2ff1   : > { %v6672_v37 = vadd.f32 %v6669_v55, %v9478_v4  ;;  %v6702_v4 = vld [vmem:[#allocation2 + $0x88] sm:$0xff] }
0x2ff2   : > { %8143 = vmatpush3.msra.mxu1 %v6702_v4  ;;  %v7361_v34 = vld [vmem:[#allocation5 + $0x2a] ss:$0 sm:$0xff] }
0x2ff3   : > { %v6675_v39 = vsel %vm546_vm3, %v6672_v37, 0.0  ;;  %8166 = vmatprep.subr.mxu1 %v8532_v1 }
0x2ff4   : > { %6676 = vadd.xlane.f32.xlu1 %v6675_v39 }
0x307d   : > { %v6677_v40 = vpop.xlane.xlu1 %6676 }
0x307e   : > { %v6678_v38 = vmul.f32 0.03125, %v6677_v40 }
0x3080   : > { %v6679_v41 = vsub.f32 %v6672_v37, %v6678_v38  ;;  %v7006_v38 = vld [vmem:[%s433_s11] sm:$0xff] }
0x3081   : > { %vm7017_vm10 = vcmp.ne.s32.totalorder %v7006_v38, 0 }
0x3082   : > { %v6680_v42 = vmul.f32 %v6679_v41, %v6679_v41 }
0x3084   : > { %v6681_v44 = vsel %vm546_vm3, %v6680_v42, 0.0 }
0x3085   : > { %6682 = vadd.xlane.f32.xlu0 %v6681_v44 }
0x310e   : > { %v6683_v47 = vpop.xlane.xlu0 %6682 }
0x310f   : > { %v6684_v48 = vmul.f32 0.03125, %v6683_v47  ;;  %v7364_v47 = vsel %vm7017_vm10, 1.0, %v8532_v1 }
0x3111   : > { %v6685_v49 = vadd.f32 1e-05, %v6684_v48  ;;  %v7029_v48 = vsel %vm7021_vm11, %v7364_v47, 0.0 }
0x3113   : > { %8383 = vrsqrt.f32 %v6685_v49  ;;  %v7030_v49 = vrot.slane %v7029_v48, 4 }
0x3120   : > { %v8384_v53 = vpop.eup %8383 }
0x3121   : > { %v6687_v51 = vmul.f32 %v8384_v53, %v6679_v41  ;;  %v7031_v53 = vadd.f32 %v7030_v49, %v7029_v48 }
0x3123   : > { %v6694_v54 = vmul.f32 %v7352_v50, %v6687_v51  ;;  %v7032_v50 = vrot.slane %v7031_v53, 2 }
0x3125   : > { %v6701_v6 = vadd.f32 %v7353_v21, %v6694_v54  ;;  %v7033_v51 = vadd.f32 %v7032_v50, %v7031_v53 }
0x3127   : > { %8145 = vmatmul.mubr.msk.f32.vlgmr.msra.gmra.mxu1 %vm546_vm3, %v6701_v6  ;;  %v7034_v21 = vrot.slane %v7033_v51, 1 }
0x3128   : > { %8174 = vmatprep.mubr.msk.f32.mxu1 %vm8533_vm0, %v8532_v1  ;;  %8167 = vmatpush3.msra.mxu1 %v6914_v20 }
0x3129   : > { %8168 = vmatprep.subr.mxu1 %v8532_v1  ;;  %v7035_v54 = vadd.f32 %v7034_v21, %v7033_v51 }
0x312a   : > { %8169 = vmatpush3.msra.mxu1 %v6913_v22 }
0x312b   : > { %8170 = vmatprep.subr.mxu1 %v8532_v1 }
0x312c   : > { %8171 = vmatpush3.msra.mxu1 %v6912_v25 }
0x312d   : > { %8172 = vmatprep.subr.mxu1 %v8532_v1 }
0x312e   : > { %8173 = vmatpush3.msra.mxu1 %v6911_v27 }
0x31e7   : > { %v6791_v62 = vpop.f32.mrf.mxu1 }
0x31e8   : > { %v6792_v63 = vadd.f32 %v7354_v61, %v6791_v62 }
0x31e9   : > { %v8146_v0 = vpop.f32.mrf.mxu1 }
0x31ea   : > { %v7356_v23 = vmul.f32 -1.442695, %v6792_v63 }
0x31ec   : > { %8385 = vpow2.f32 %v7356_v23 }
0x31f9   : > { %v8386_v52 = vpop.eup %8385 }
0x31fa   : > { %v6798_v2 = vadd.f32 1.0, %v8386_v52 }
0x31fc   : > { %8387 = vrcp.f32 %v6798_v2 }
0x3209   : > { %v8388_v3 = vpop.eup %8387 }
0x320a   : > { %v6801_v18 = vmul.f32 %v8388_v3, %v6792_v63 }
0x320c   : > { %8164 = vmatmul.mubr.msk.f32.vlgmr.msra.gmra.mxu0 %vm458_vm1, %v6801_v18 }
0x32cc   : > { %v6877_v7 = vpop.f32.mrf.mxu0 }
0x32cd   : > { %v6878_v8 = vadd.f32 %v7357_v5, %v6877_v7 }
0x32ce   : > { %v8165_v9 = vpop.f32.mrf.mxu0 }
0x32cf   : > { %v6881_v10 = vadd.f32 %v6878_v8, %v6701_v6 }
0x32d1   : > { %v6884_v11 = vsel %vm546_vm3, %v6881_v10, 0.0 }
0x32d2   : > { %6885 = vadd.xlane.f32.xlu0 %v6884_v11 }
0x335b   : > { %v6886_v14 = vpop.xlane.xlu0 %6885 }
0x335c   : > { %v6887_v15 = vmul.f32 0.03125, %v6886_v14 }
0x335e   : > { %v6888_v16 = vsub.f32 %v6881_v10, %v6887_v15 }
0x3360   : > { %v6889_v35 = vmul.f32 %v6888_v16, %v6888_v16 }
0x3362   : > { %v6890_v17 = vsel %vm546_vm3, %v6889_v35, 0.0 }
0x3363   : > { %6891 = vadd.xlane.f32.xlu1 %v6890_v17 }
0x33ec   : > { %v6892_v28 = vpop.xlane.xlu1 %6891 }
0x33ed   : > { %v6893_v24 = vmul.f32 0.03125, %v6892_v28 }
0x33ef   : > { %v6894_v29 = vadd.f32 1e-05, %v6893_v24 }
0x33f1   : > { %8389 = vrsqrt.f32 %v6894_v29 }
0x33fe   : > { %v8390_v30 = vpop.eup %8389 }
0x33ff   : > { %v6896_v32 = vmul.f32 %v8390_v30, %v6888_v16 }
0x3401   : > { %v6903_v33 = vmul.f32 %v7359_v31, %v6896_v32 }
0x3403   : > { %v6910_v55 = vadd.f32 %v7360_v26, %v6903_v33 }
0x3405   : > { %8175 = vmatmul.mubr.msk.f32.vlgmr.msra.gmra.mxu1 %vm546_vm3, %v6910_v55 }
0x34c5   : > { %v6991_v37 = vpop.f32.mrf.mxu1 }
0x34c6   : > { %v6992_v39 = vadd.f32 %v7361_v34, %v6991_v37 }
0x34c7   : > { %v8176_v40 = vpop.f32.mrf.mxu1 }
0x34c8   : > { %6996 = vmax.xlane.f32.xlu0 %v6992_v39  ;;  %6995 = vst [vmem:[%s416_s16] sm:$0xff] %v6992_v39 }
0x34de   : > { %7008 = vperm.xlu0 %8257, %v7006_v38  }
0x3551   : > { %v6997_v41 = vpop.xlane.xlu0 %6996 }
0x3552   : > { %v6998_v42 = vsub.f32 %v6992_v39, %v6997_v41 }
0x3554   : > { %v6999_v44 = vmul.f32 1.442695, %v6998_v42 }
0x3556   : > { %8391 = vpow2.f32 %v6999_v44 }
0x3559   : > { %v7009_v45 = vpop.permute.xlu0 %7008 }
0x355a   : > { %vm7010_vm9 = vcmp.eq.s32.totalorder %v8745_v13, %v7009_v45 }
0x355b   : > { %v7363_v12 = vsel %vm7010_vm9, 1.0, %v8532_v1 }
0x355c   : > { %v7013_v4 = vmul.f32 %v7363_v12, %v6992_v39 }
0x3563   : > { %v8392_v46 = vpop.eup %8391 }
0x3564   : > { %7001 = vadd.xlane.f32.xlu1 %v8392_v46 }
0x3568   : > { %7014 = vadd.xlane.f32.xlu1 %v7013_v4 }
0x3579   : > { %7040 = vperm.xlu1 %8258, %v7035_v54  }
0x35ed   : > { %v7002_v6 = vpop.xlane.xlu1 %7001 }
0x35ee   : > { %8393 = vlog2.f32 %v7002_v6 }
0x35f1   : > { %v7015_v43 = vpop.xlane.xlu1 %7014 }
0x35fb   : > { %v8394_v36 = vpop.eup %8393 }
0x35fc   : > { %v7004_v19 = vmul.f32 0.6931472, %v8394_v36 }
0x35fe   : > { %v7005_v56 = vadd.f32 %v7004_v19, %v6997_v41 }
0x3600   : > { %v7016_v57 = vsub.f32 %v7005_v56, %v7015_v43 }
0x3602   : > { %v7020_v1 = vmul.f32 %v7364_v47, %v7016_v57 }
0x3604   : > { %v7022_v58 = vsel %vm7021_vm11, %v7020_v1, 0.0 }
0x3605   : > { %v7023_v59 = vrot.slane %v7022_v58, 4 }
0x3607   : > { %v7024_v60 = vadd.f32 %v7023_v59, %v7022_v58 }
0x3609   : > { %v7025_v61 = vrot.slane %v7024_v60, 2 }
0x360b   : > { %v7026_v62 = vadd.f32 %v7025_v61, %v7024_v60 }
0x360d   : > { %v7027_v63 = vrot.slane %v7026_v62, 1 }
0x360f   : > { %v7028_v0 = vadd.f32 %v7027_v63, %v7026_v62 }
0x3611   : > { %7046 = vperm.xlu0 %8257, %v7028_v0  }
0x3612   : > { %8470 = shalt.err (!%p8467_p4)
}
0x3613   : > { %s8471_s30 = scalar_lea.hbm %s9624_s5, 128  ;;  %s8475_s26 = scalar_lea.hbm %s9678_s9, 256 }
0x3614   : > { %p8472_p7 = scmp.ne.s32.totalorder %s9624_s5, %s8471_s30  ;;  %p8476_p9 = scmp.lt.s32.totalorder %s9624_s5, %s9678_s9 }
0x3615   : > { %p8477_p11 = scmp.lt.s32.totalorder %s8475_s26, %s8471_s30 }
0x3616   : > { %p8473_p13 = pnand %p8472_p7, %p8643_p5 }
0x3617   : > { %p8478_p10 = por %p8477_p11, %p8476_p9 }
0x3618   : > { %p8474_p8 = pneg %p8473_p13 }
0x361a   : > { %p8479_p12 = pnand %p8478_p10, %p8474_p8 }
0x361c   : > { %8482 = shalt.err (!%p8479_p12)
}
0x361d   : > { %8185 = dma.vmem_to_hbm [thread:$0]  (%p8643_p5), %s7069_s6, 128, %s9624_s5, %s7052_s8   ;;  %vm7037_vm12 = vcmp.eq.s32.totalorder %v8745_v13, 1  ;;  %v7041_v23 = vpop.permute.xlu1 %7040  ;;  %vm7036_vm13 = vcmp.eq.s32.totalorder %v8745_v13, 0 }
0x361e   : > { %v7043_v52 = vsel %vm7037_vm12, %v7041_v23, 0.0  ;;  %s439_s4 = scalar_lea.vmem %s9679_s10, %s8697_s22 }
0x368c   : > { %v7047_v2 = vpop.permute.xlu0 %7046 }
0x368d   : > { %v7049_v3 = vsel %vm7036_vm13, %v7047_v2, %v7043_v52 }
0x368e   : > { %7050 = vst [vmem:[%s439_s4] sm:$0x1] %v7049_v3 }
0x368f PF: > { %s9757_s13 = sld [smem:[#allocation13_spill]] }
0x3690   : > { %s9758_s16 = sld [smem:[#allocation11_spill]] }
0x3695   : > { %p8202_p0 = scmp.ge.s32.totalorder %s9757_s13, 2 }
0x3696   : > { %s7083_s15 = sand.u32 1, %s9758_s16  }
0x3697   : > { %p8195_p5 = pnand %p8202_p0, %p8647_p6  ;;  %s7084_s19 = scalar_lea.sflag [#allocation4], %s7083_s15 }
0x3699   : > { %p8196_p1 = pneg %p8195_p5 }
0x369b   : > { %8508 = dma.done.wait (%p8196_p1), %s7084_s19, 128  }
0x369c   : > { %8510 = vsyncadd (%p8196_p1), %s7084_s19, 4294967168  ;;  %s9760_s16 = sld [smem:[#allocation14_spill]]  ;;  %s9763_s13 = smov %s8517_s14 }
0x369d   : > { %s9761_s11 = sld [smem:[#allocation12_spill]] }
0x369e   : > { %s9762_s15 = sld [smem:[#allocation15_spill]] }
0x36a2   : > { %p23_p3 = scmp.ge.s32.totalorder %s9760_s16, 4  }
0x36a3   : > { %s9764_s14 = smov %s9761_s11 }
0x36a4   :  { %25 = sbr.rel (!%p23_p3) target bundleno = 13 (0xd), region = 121 }
0x36a9   :  { %7095 = vsyncpa [#allocation3], 1 }
0x36aa   :  { %7097 = vsyncpa [#allocation3 + $0x1], 1 }
0x36ab   :  { %7098 = vsyncpa [#allocation6], 1 }
0x36ac   :  { %7099 = vsyncpa [#allocation4], 1 }
0x36ad   :  { %7101 = vsyncpa [#allocation4 + $0x1], 1 }

</bundles_post_ra>
